<compile_context>
chip_gen: v6e
topology: v6e:2x2x1
jax: 0.10.0
libtpu: 0.0.40
codegen_flags: <defaults>
</compile_context>

<pallas_src>
import functools

import jax
import jax.numpy as jnp
from jax import lax
from jax.experimental import pallas as pl
from jax.experimental.pallas import tpu as pltpu


# ---------------------------------------------------------------------------
# Pallas kernel: fused matmul + bias + activation
# ---------------------------------------------------------------------------
def _mm_bias_act_kernel(a_ref, b_ref, bias_ref, o_ref, *, act):
    acc = jnp.dot(a_ref[...], b_ref[...], preferred_element_type=jnp.float32)
    acc = acc + bias_ref[...]
    if act == "relu":
        acc = jnp.maximum(acc, 0.0)
    elif act == "sigmoid":
        # exact sigmoid via tanh (EUP transcendental, numerically stable)
        acc = 0.5 * (jnp.tanh(0.5 * acc) + 1.0)
    o_ref[...] = acc.astype(o_ref.dtype)


def _choose_tm(m, cap=1024):
    """Largest M-tile <= cap that evenly divides m (multiple of 16 so both f32 and
    bf16 sublane tilings are legal); else a single full-extent block."""
    if m <= cap:
        return m
    for d in range(cap, 15, -1):
        if m % d == 0 and d % 16 == 0:
            return d
    return m


def matmul_bias_act(a, b, bias, act="none"):
    """a: (M, K) bf16, b: (K, N) bf16, bias: (1, N) f32 -> act(a @ b + bias), f32.

    Full-extent K/N block dims (no padding); M tiled into 1-2 grid steps.
    """
    M, K = a.shape
    K2, N = b.shape
    assert K == K2 and bias.shape == (1, N)
    tm = _choose_tm(M)

    return pl.pallas_call(
        functools.partial(_mm_bias_act_kernel, act=act),
        out_shape=jax.ShapeDtypeStruct((M, N), jnp.float32),
        grid=(M // tm,),
        in_specs=[
            pl.BlockSpec((tm, K), lambda i: (i, 0)),
            pl.BlockSpec((K, N), lambda i: (0, 0)),
            pl.BlockSpec((1, N), lambda i: (0, 0)),
        ],
        out_specs=pl.BlockSpec((tm, N), lambda i: (i, 0)),
        compiler_params=pltpu.CompilerParams(dimension_semantics=("parallel",)),
    )(a, b, bias)


# ---------------------------------------------------------------------------
# Plain-JAX glue: patch extraction, conv / conv-transpose wrappers
# ---------------------------------------------------------------------------
def _im2col(x, kh, kw, stride):
    """x: (N, H, W, C) already padded/dilated -> ((N*OH*OW, KH*KW*C), (N, OH, OW))."""
    n, h, w, c = x.shape
    oh = (h - kh) // stride + 1
    ow = (w - kw) // stride + 1
    cols = []
    for i in range(kh):
        for j in range(kw):
            cols.append(x[:, i:i + stride * oh:stride, j:j + stride * ow:stride, :])
    patches = jnp.stack(cols, axis=-2)  # (N, OH, OW, KH*KW, C), ordering (kh, kw, c)
    return patches.reshape(n * oh * ow, kh * kw * c), (n, oh, ow)


def conv2d(x_nhwc, wmat, bias, kh, kw, stride, pad, act):
    """Conv2d with a prepacked (KH*KW*Cin, Cout) bf16 weight matrix."""
    cout = wmat.shape[1]
    xp = jnp.pad(x_nhwc.astype(jnp.bfloat16),
                 ((0, 0), (pad, pad), (pad, pad), (0, 0)))
    patches, (n, oh, ow) = _im2col(xp, kh, kw, stride)
    out = matmul_bias_act(patches, wmat, bias, act)
    return out.reshape(n, oh, ow, cout)


def conv_transpose2d(x_nhwc, wmat, bias, kh, kw, stride, pad, out_pad, act):
    """ConvTranspose2d with a prepacked weight matrix of the equivalent forward conv."""
    cout = wmat.shape[1]
    n, h, w, c = x_nhwc.shape
    x = x_nhwc.astype(jnp.bfloat16)
    hd = (h - 1) * stride + 1
    wd = (w - 1) * stride + 1
    xd = jnp.zeros((n, hd, wd, c), x.dtype).at[:, ::stride, ::stride, :].set(x)
    xp = jnp.pad(xd, ((0, 0),
                      (kh - 1 - pad, kh - 1 - pad + out_pad),
                      (kw - 1 - pad, kw - 1 - pad + out_pad),
                      (0, 0)))
    patches, (n_, oh, ow) = _im2col(xp, kh, kw, 1)
    out = matmul_bias_act(patches, wmat, bias, act)
    return out.reshape(n_, oh, ow, cout)


def conv_transpose2d_1x1_dense(x_nhwc, wdense, bias_dense, kh, kw, cout, act):
    """ConvTranspose2d(stride=1, pad=0) on a 1x1 spatial map == one dense matmul."""
    n = x_nhwc.shape[0]
    a = x_nhwc.reshape(n, -1).astype(jnp.bfloat16)        # (N, Cin)
    out = matmul_bias_act(a, wdense, bias_dense, act)     # (N, KH*KW*Cout)
    return out.reshape(n, kh, kw, cout)


# ---------------------------------------------------------------------------
# Parameter init (PyTorch-like uniform bounds) and one-time weight packing
# ---------------------------------------------------------------------------
def init_params(channels_image, key):
    def uni(k, shape, fan_in):
        bound = 1.0 / jnp.sqrt(float(fan_in))
        return jax.random.uniform(k, shape, jnp.float32, -bound, bound)

    ks = jax.random.split(key, 12)
    p = {}
    # encoder (Conv2d weights: (Cout, Cin, KH, KW))
    p["e1_w"] = uni(ks[0], (16, channels_image, 3, 3), channels_image * 9)
    p["e1_b"] = uni(ks[1], (16,), channels_image * 9)
    p["e2_w"] = uni(ks[2], (32, 16, 3, 3), 16 * 9)
    p["e2_b"] = uni(ks[3], (32,), 16 * 9)
    p["e3_w"] = uni(ks[4], (64, 32, 7, 7), 32 * 49)
    p["e3_b"] = uni(ks[5], (64,), 32 * 49)
    # decoder (ConvTranspose2d weights: (Cin, Cout, KH, KW))
    p["d1_w"] = uni(ks[6], (64, 32, 7, 7), 32 * 49)
    p["d1_b"] = uni(ks[7], (32,), 32 * 49)
    p["d2_w"] = uni(ks[8], (32, 16, 3, 3), 16 * 9)
    p["d2_b"] = uni(ks[9], (16,), 16 * 9)
    p["d3_w"] = uni(ks[10], (16, channels_image, 3, 3), channels_image * 9)
    p["d3_b"] = uni(ks[11], (channels_image,), channels_image * 9)
    return p


def _pack_conv_w(w_oikk):
    cout, cin, kh, kw = w_oikk.shape
    return (jnp.transpose(w_oikk, (2, 3, 1, 0))          # (KH, KW, Cin, Cout)
            .reshape(kh * kw * cin, cout).astype(jnp.bfloat16))


def _pack_convT_w(w_iokk):
    # equivalent forward conv: spatially-flipped kernel, in/out channels swapped
    w_conv = jnp.transpose(jnp.flip(w_iokk, axis=(2, 3)), (1, 0, 2, 3))
    return _pack_conv_w(w_conv)


def prepare_params(p):
    """One-time weight/bias repacking (hoisted out of the per-step forward)."""
    def b2(b):
        return b.astype(jnp.float32).reshape(1, -1)

    pp = {}
    for name in ("e1", "e2", "e3"):
        pp[name + "_w"] = _pack_conv_w(p[name + "_w"])
        pp[name + "_b"] = b2(p[name + "_b"])
    for name in ("d1", "d2", "d3"):
        pp[name + "_w"] = _pack_convT_w(p[name + "_w"])
        pp[name + "_b"] = b2(p[name + "_b"])
    # d1 (7x7 ConvTranspose2d on a 1x1 map): dense form, single matmul, no im2col.
    cin, cout, kh, kw = p["d1_w"].shape
    pp["d1_wdense"] = (jnp.transpose(p["d1_w"], (0, 2, 3, 1))   # (Cin, KH, KW, Cout)
                       .reshape(cin, kh * kw * cout).astype(jnp.bfloat16))
    pp["d1_bdense"] = jnp.tile(p["d1_b"].astype(jnp.float32), kh * kw).reshape(1, -1)
    return pp


# ---------------------------------------------------------------------------
# Forward pass (Pallas path)
# ---------------------------------------------------------------------------
def autoencoder_forward(x_nchw, pp):
    x = jnp.transpose(x_nchw, (0, 2, 3, 1))  # NCHW -> NHWC
    # encoder
    x = conv2d(x, pp["e1_w"], pp["e1_b"], 3, 3, stride=2, pad=1, act="relu")
    x = conv2d(x, pp["e2_w"], pp["e2_b"], 3, 3, stride=2, pad=1, act="relu")
    x = conv2d(x, pp["e3_w"], pp["e3_b"], 7, 7, stride=1, pad=0, act="none")
    # decoder
    if x.shape[1] == 1 and x.shape[2] == 1:
        cout = pp["d1_b"].shape[1]
        x = conv_transpose2d_1x1_dense(x, pp["d1_wdense"], pp["d1_bdense"],
                                       7, 7, cout, act="relu")
    else:
        x = conv_transpose2d(x, pp["d1_w"], pp["d1_b"], 7, 7,
                             stride=1, pad=0, out_pad=0, act="relu")
    x = conv_transpose2d(x, pp["d2_w"], pp["d2_b"], 3, 3,
                         stride=2, pad=1, out_pad=1, act="relu")
    x = conv_transpose2d(x, pp["d3_w"], pp["d3_b"], 3, 3,
                         stride=2, pad=1, out_pad=1, act="sigmoid")
    return jnp.transpose(x, (0, 3, 1, 2))  # NHWC -> NCHW


# ---------------------------------------------------------------------------
# XLA reference (f32, lax.conv_general_dilated) to sanity-check the Pallas path
# ---------------------------------------------------------------------------
def _ref_conv(x, w_oikk, b, stride, pad):
    dn = ("NHWC", "HWIO", "NHWC")
    w = jnp.transpose(w_oikk, (2, 3, 1, 0))
    y = lax.conv_general_dilated(x, w, (stride, stride), [(pad, pad), (pad, pad)],
                                 dimension_numbers=dn)
    return y + b


def _ref_convT(x, w_iokk, b, stride, pad, out_pad):
    dn = ("NHWC", "HWIO", "NHWC")
    kh, kw = w_iokk.shape[2], w_iokk.shape[3]
    w_conv = jnp.transpose(jnp.flip(w_iokk, axis=(2, 3)), (1, 0, 2, 3))
    w = jnp.transpose(w_conv, (2, 3, 1, 0))
    y = lax.conv_general_dilated(
        x, w, (1, 1),
        [(kh - 1 - pad, kh - 1 - pad + out_pad), (kw - 1 - pad, kw - 1 - pad + out_pad)],
        lhs_dilation=(stride, stride), dimension_numbers=dn)
    return y + b


def reference_forward(x_nchw, p):
    x = jnp.transpose(x_nchw, (0, 2, 3, 1))
    x = jax.nn.relu(_ref_conv(x, p["e1_w"], p["e1_b"], 2, 1))
    x = jax.nn.relu(_ref_conv(x, p["e2_w"], p["e2_b"], 2, 1))
    x = _ref_conv(x, p["e3_w"], p["e3_b"], 1, 0)
    x = jax.nn.relu(_ref_convT(x, p["d1_w"], p["d1_b"], 1, 0, 0))
    x = jax.nn.relu(_ref_convT(x, p["d2_w"], p["d2_b"], 2, 1, 1))
    x = jax.nn.sigmoid(_ref_convT(x, p["d3_w"], p["d3_b"], 2, 1, 1))
    return jnp.transpose(x, (0, 3, 1, 2))


if __name__ == "__main__":
    # spatial=28 (MNIST-style) so the kernel-7 encoder conv reduces to 1x1.
    batch, channels_image, spatial = 2, 1, 28
    key = jax.random.PRNGKey(0)
    k_x, k_p = jax.random.split(key)
    x = jax.random.uniform(k_x, (batch, channels_image, spatial, spatial), jnp.float32)

    params = init_params(channels_image, k_p)
    pp = prepare_params(params)               # weight packing: once, outside the jit

    fwd = jax.jit(autoencoder_forward)
    y = jax.block_until_ready(fwd(x, pp))
    assert y.shape == (batch, channels_image, spatial, spatial), y.shape

    y_ref = jax.block_until_ready(jax.jit(reference_forward)(x, params))
    # bf16 matmul operands (f32 accumulation) => looser tolerance vs the f32 reference.
    max_err = float(jnp.max(jnp.abs(y - y_ref)))
    assert jnp.allclose(y, y_ref, rtol=2e-2, atol=2e-2), max_err

    print("KERNEL_OK")
</pallas_src>

<mosaic_0001>
module attributes {stable_mosaic.version = 11 : i64} {
  func.func @_mm_bias_act_kernel(%arg0: i32, %arg1: memref<392x9xbf16, #tpu.memory_space<vmem>>, %arg2: memref<9x16xbf16, #tpu.memory_space<vmem>>, %arg3: memref<1x16xf32, #tpu.memory_space<vmem>>, %arg4: memref<392x16xf32, #tpu.memory_space<vmem>>) attributes {dimension_semantics = [#tpu.dimension_semantics<parallel>], iteration_bounds = array<i64: 1>, scalar_prefetch = 0 : i64, scratch_operands = 0 : i64, tpu.core_type = #tpu.core_type<tc>, window_params = [{transform_indices = @transform_0, window_bounds = array<i64: 392, 9>}, {pipeline_mode = #tpu.pipeline_mode<synchronous>, transform_indices = @transform_1, window_bounds = array<i64: 9, 16>}, {pipeline_mode = #tpu.pipeline_mode<synchronous>, transform_indices = @transform_2, window_bounds = array<i64: 1, 16>}, {transform_indices = @transform_3, window_bounds = array<i64: 392, 16>}]} {
    %c0 = arith.constant 0 : index
    %c0_0 = arith.constant 0 : index
    %0 = vector.load %arg1[%c0, %c0_0] : memref<392x9xbf16, #tpu.memory_space<vmem>>, vector<392x9xbf16>
    %c0_1 = arith.constant 0 : index
    %c0_2 = arith.constant 0 : index
    %1 = vector.load %arg2[%c0_1, %c0_2] : memref<9x16xbf16, #tpu.memory_space<vmem>>, vector<9x16xbf16>
    %cst = arith.constant dense<0.000000e+00> : vector<392x16xf32>
    %2 = tpu.matmul %0, %1, %cst {dimension_numbers = #tpu.dot_dimension_numbers<[1], [0], [0], [1], [0, 0, 1, 1], [], []>} : vector<392x9xbf16>, vector<9x16xbf16>, vector<392x16xf32> -> vector<392x16xf32>
    %c0_3 = arith.constant 0 : index
    %c0_4 = arith.constant 0 : index
    %3 = vector.load %arg3[%c0_3, %c0_4] : memref<1x16xf32, #tpu.memory_space<vmem>>, vector<1x16xf32>
    %4 = vector.broadcast %3 : vector<1x16xf32> to vector<392x16xf32>
    %5 = arith.addf %2, %4 : vector<392x16xf32>
    %cst_5 = arith.constant 0.000000e+00 : f32
    %6 = vector.broadcast %cst_5 : f32 to vector<392x16xf32>
    %7 = arith.maximumf %5, %6 : vector<392x16xf32>
    %c0_6 = arith.constant 0 : index
    %c0_7 = arith.constant 0 : index
    %8 = vector.load %arg4[%c0_6, %c0_7] : memref<392x16xf32, #tpu.memory_space<vmem>>, vector<392x16xf32>
    tpu.vector_store %arg4[%c0_6, %c0_7], %7 {strides = array<i32>} : memref<392x16xf32, #tpu.memory_space<vmem>>, vector<392x16xf32>,
    return
  }
  func.func @transform_0(%arg0: i32) -> (i32, i32) {
    %c0_i32 = arith.constant 0 : i32
    %c0_i32_0 = arith.constant 0 : i32
    return %arg0, %c0_i32 : i32, i32
  }
  func.func @transform_1(%arg0: i32) -> (i32, i32) {
    %c0_i32 = arith.constant 0 : i32
    %c0_i32_0 = arith.constant 0 : i32
    %c0_i32_1 = arith.constant 0 : i32
    return %c0_i32, %c0_i32_0 : i32, i32
  }
  func.func @transform_2(%arg0: i32) -> (i32, i32) {
    %c0_i32 = arith.constant 0 : i32
    %c0_i32_0 = arith.constant 0 : i32
    %c0_i32_1 = arith.constant 0 : i32
    return %c0_i32, %c0_i32_0 : i32, i32
  }
  func.func @transform_3(%arg0: i32) -> (i32, i32) {
    %c0_i32 = arith.constant 0 : i32
    %c0_i32_0 = arith.constant 0 : i32
    return %arg0, %c0_i32 : i32, i32
  }
}

module attributes {stable_mosaic.version = 11 : i64} {
  func.func @_mm_bias_act_kernel(%arg0: i32, %arg1: memref<98x144xbf16, #tpu.memory_space<vmem>>, %arg2: memref<144x32xbf16, #tpu.memory_space<vmem>>, %arg3: memref<1x32xf32, #tpu.memory_space<vmem>>, %arg4: memref<98x32xf32, #tpu.memory_space<vmem>>) attributes {dimension_semantics = [#tpu.dimension_semantics<parallel>], iteration_bounds = array<i64: 1>, scalar_prefetch = 0 : i64, scratch_operands = 0 : i64, tpu.core_type = #tpu.core_type<tc>, window_params = [{transform_indices = @transform_0, window_bounds = array<i64: 98, 144>}, {pipeline_mode = #tpu.pipeline_mode<synchronous>, transform_indices = @transform_1, window_bounds = array<i64: 144, 32>}, {pipeline_mode = #tpu.pipeline_mode<synchronous>, transform_indices = @transform_2, window_bounds = array<i64: 1, 32>}, {transform_indices = @transform_3, window_bounds = array<i64: 98, 32>}]} {
    %c0 = arith.constant 0 : index
    %c0_0 = arith.constant 0 : index
    %0 = vector.load %arg1[%c0, %c0_0] : memref<98x144xbf16, #tpu.memory_space<vmem>>, vector<98x144xbf16>
    %c0_1 = arith.constant 0 : index
    %c0_2 = arith.constant 0 : index
    %1 = vector.load %arg2[%c0_1, %c0_2] : memref<144x32xbf16, #tpu.memory_space<vmem>>, vector<144x32xbf16>
    %cst = arith.constant dense<0.000000e+00> : vector<98x32xf32>
    %2 = tpu.matmul %0, %1, %cst {dimension_numbers = #tpu.dot_dimension_numbers<[1], [0], [0], [1], [0, 0, 1, 1], [], []>} : vector<98x144xbf16>, vector<144x32xbf16>, vector<98x32xf32> -> vector<98x32xf32>
    %c0_3 = arith.constant 0 : index
    %c0_4 = arith.constant 0 : index
    %3 = vector.load %arg3[%c0_3, %c0_4] : memref<1x32xf32, #tpu.memory_space<vmem>>, vector<1x32xf32>
    %4 = vector.broadcast %3 : vector<1x32xf32> to vector<98x32xf32>
    %5 = arith.addf %2, %4 : vector<98x32xf32>
    %cst_5 = arith.constant 0.000000e+00 : f32
    %6 = vector.broadcast %cst_5 : f32 to vector<98x32xf32>
    %7 = arith.maximumf %5, %6 : vector<98x32xf32>
    %c0_6 = arith.constant 0 : index
    %c0_7 = arith.constant 0 : index
    %8 = vector.load %arg4[%c0_6, %c0_7] : memref<98x32xf32, #tpu.memory_space<vmem>>, vector<98x32xf32>
    tpu.vector_store %arg4[%c0_6, %c0_7], %7 {strides = array<i32>} : memref<98x32xf32, #tpu.memory_space<vmem>>, vector<98x32xf32>,
    return
  }
  func.func @transform_0(%arg0: i32) -> (i32, i32) {
    %c0_i32 = arith.constant 0 : i32
    %c0_i32_0 = arith.constant 0 : i32
    return %arg0, %c0_i32 : i32, i32
  }
  func.func @transform_1(%arg0: i32) -> (i32, i32) {
    %c0_i32 = arith.constant 0 : i32
    %c0_i32_0 = arith.constant 0 : i32
    %c0_i32_1 = arith.constant 0 : i32
    return %c0_i32, %c0_i32_0 : i32, i32
  }
  func.func @transform_2(%arg0: i32) -> (i32, i32) {
    %c0_i32 = arith.constant 0 : i32
    %c0_i32_0 = arith.constant 0 : i32
    %c0_i32_1 = arith.constant 0 : i32
    return %c0_i32, %c0_i32_0 : i32, i32
  }
  func.func @transform_3(%arg0: i32) -> (i32, i32) {
    %c0_i32 = arith.constant 0 : i32
    %c0_i32_0 = arith.constant 0 : i32
    return %arg0, %c0_i32 : i32, i32
  }
}

module attributes {stable_mosaic.version = 11 : i64} {
  func.func @_mm_bias_act_kernel(%arg0: i32, %arg1: memref<2x1568xbf16, #tpu.memory_space<vmem>>, %arg2: memref<1568x64xbf16, #tpu.memory_space<vmem>>, %arg3: memref<1x64xf32, #tpu.memory_space<vmem>>, %arg4: memref<2x64xf32, #tpu.memory_space<vmem>>) attributes {dimension_semantics = [#tpu.dimension_semantics<parallel>], iteration_bounds = array<i64: 1>, scalar_prefetch = 0 : i64, scratch_operands = 0 : i64, tpu.core_type = #tpu.core_type<tc>, window_params = [{transform_indices = @transform_0, window_bounds = array<i64: 2, 1568>}, {pipeline_mode = #tpu.pipeline_mode<synchronous>, transform_indices = @transform_1, window_bounds = array<i64: 1568, 64>}, {pipeline_mode = #tpu.pipeline_mode<synchronous>, transform_indices = @transform_2, window_bounds = array<i64: 1, 64>}, {transform_indices = @transform_3, window_bounds = array<i64: 2, 64>}]} {
    %c0 = arith.constant 0 : index
    %c0_0 = arith.constant 0 : index
    %0 = vector.load %arg1[%c0, %c0_0] : memref<2x1568xbf16, #tpu.memory_space<vmem>>, vector<2x1568xbf16>
    %c0_1 = arith.constant 0 : index
    %c0_2 = arith.constant 0 : index
    %1 = vector.load %arg2[%c0_1, %c0_2] : memref<1568x64xbf16, #tpu.memory_space<vmem>>, vector<1568x64xbf16>
    %cst = arith.constant dense<0.000000e+00> : vector<2x64xf32>
    %2 = tpu.matmul %0, %1, %cst {dimension_numbers = #tpu.dot_dimension_numbers<[1], [0], [0], [1], [0, 0, 1, 1], [], []>} : vector<2x1568xbf16>, vector<1568x64xbf16>, vector<2x64xf32> -> vector<2x64xf32>
    %c0_3 = arith.constant 0 : index
    %c0_4 = arith.constant 0 : index
    %3 = vector.load %arg3[%c0_3, %c0_4] : memref<1x64xf32, #tpu.memory_space<vmem>>, vector<1x64xf32>
    %4 = vector.broadcast %3 : vector<1x64xf32> to vector<2x64xf32>
    %5 = arith.addf %2, %4 : vector<2x64xf32>
    %c0_5 = arith.constant 0 : index
    %c0_6 = arith.constant 0 : index
    %6 = vector.load %arg4[%c0_5, %c0_6] : memref<2x64xf32, #tpu.memory_space<vmem>>, vector<2x64xf32>
    tpu.vector_store %arg4[%c0_5, %c0_6], %5 {strides = array<i32>} : memref<2x64xf32, #tpu.memory_space<vmem>>, vector<2x64xf32>,
    return
  }
  func.func @transform_0(%arg0: i32) -> (i32, i32) {
    %c0_i32 = arith.constant 0 : i32
    %c0_i32_0 = arith.constant 0 : i32
    return %arg0, %c0_i32 : i32, i32
  }
  func.func @transform_1(%arg0: i32) -> (i32, i32) {
    %c0_i32 = arith.constant 0 : i32
    %c0_i32_0 = arith.constant 0 : i32
    %c0_i32_1 = arith.constant 0 : i32
    return %c0_i32, %c0_i32_0 : i32, i32
  }
  func.func @transform_2(%arg0: i32) -> (i32, i32) {
    %c0_i32 = arith.constant 0 : i32
    %c0_i32_0 = arith.constant 0 : i32
    %c0_i32_1 = arith.constant 0 : i32
    return %c0_i32, %c0_i32_0 : i32, i32
  }
  func.func @transform_3(%arg0: i32) -> (i32, i32) {
    %c0_i32 = arith.constant 0 : i32
    %c0_i32_0 = arith.constant 0 : i32
    return %arg0, %c0_i32 : i32, i32
  }
}

module attributes {stable_mosaic.version = 11 : i64} {
  func.func @_mm_bias_act_kernel(%arg0: i32, %arg1: memref<2x64xbf16, #tpu.memory_space<vmem>>, %arg2: memref<64x1568xbf16, #tpu.memory_space<vmem>>, %arg3: memref<1x1568xf32, #tpu.memory_space<vmem>>, %arg4: memref<2x1568xf32, #tpu.memory_space<vmem>>) attributes {dimension_semantics = [#tpu.dimension_semantics<parallel>], iteration_bounds = array<i64: 1>, scalar_prefetch = 0 : i64, scratch_operands = 0 : i64, tpu.core_type = #tpu.core_type<tc>, window_params = [{transform_indices = @transform_0, window_bounds = array<i64: 2, 64>}, {pipeline_mode = #tpu.pipeline_mode<synchronous>, transform_indices = @transform_1, window_bounds = array<i64: 64, 1568>}, {pipeline_mode = #tpu.pipeline_mode<synchronous>, transform_indices = @transform_2, window_bounds = array<i64: 1, 1568>}, {transform_indices = @transform_3, window_bounds = array<i64: 2, 1568>}]} {
    %c0 = arith.constant 0 : index
    %c0_0 = arith.constant 0 : index
    %0 = vector.load %arg1[%c0, %c0_0] : memref<2x64xbf16, #tpu.memory_space<vmem>>, vector<2x64xbf16>
    %c0_1 = arith.constant 0 : index
    %c0_2 = arith.constant 0 : index
    %1 = vector.load %arg2[%c0_1, %c0_2] : memref<64x1568xbf16, #tpu.memory_space<vmem>>, vector<64x1568xbf16>
    %cst = arith.constant dense<0.000000e+00> : vector<2x1568xf32>
    %2 = tpu.matmul %0, %1, %cst {dimension_numbers = #tpu.dot_dimension_numbers<[1], [0], [0], [1], [0, 0, 1, 1], [], []>} : vector<2x64xbf16>, vector<64x1568xbf16>, vector<2x1568xf32> -> vector<2x1568xf32>
    %c0_3 = arith.constant 0 : index
    %c0_4 = arith.constant 0 : index
    %3 = vector.load %arg3[%c0_3, %c0_4] : memref<1x1568xf32, #tpu.memory_space<vmem>>, vector<1x1568xf32>
    %4 = vector.broadcast %3 : vector<1x1568xf32> to vector<2x1568xf32>
    %5 = arith.addf %2, %4 : vector<2x1568xf32>
    %cst_5 = arith.constant 0.000000e+00 : f32
    %6 = vector.broadcast %cst_5 : f32 to vector<2x1568xf32>
    %7 = arith.maximumf %5, %6 : vector<2x1568xf32>
    %c0_6 = arith.constant 0 : index
    %c0_7 = arith.constant 0 : index
    %8 = vector.load %arg4[%c0_6, %c0_7] : memref<2x1568xf32, #tpu.memory_space<vmem>>, vector<2x1568xf32>
    tpu.vector_store %arg4[%c0_6, %c0_7], %7 {strides = array<i32>} : memref<2x1568xf32, #tpu.memory_space<vmem>>, vector<2x1568xf32>,
    return
  }
  func.func @transform_0(%arg0: i32) -> (i32, i32) {
    %c0_i32 = arith.constant 0 : i32
    %c0_i32_0 = arith.constant 0 : i32
    return %arg0, %c0_i32 : i32, i32
  }
  func.func @transform_1(%arg0: i32) -> (i32, i32) {
    %c0_i32 = arith.constant 0 : i32
    %c0_i32_0 = arith.constant 0 : i32
    %c0_i32_1 = arith.constant 0 : i32
    return %c0_i32, %c0_i32_0 : i32, i32
  }
  func.func @transform_2(%arg0: i32) -> (i32, i32) {
    %c0_i32 = arith.constant 0 : i32
    %c0_i32_0 = arith.constant 0 : i32
    %c0_i32_1 = arith.constant 0 : i32
    return %c0_i32, %c0_i32_0 : i32, i32
  }
  func.func @transform_3(%arg0: i32) -> (i32, i32) {
    %c0_i32 = arith.constant 0 : i32
    %c0_i32_0 = arith.constant 0 : i32
    return %arg0, %c0_i32 : i32, i32
  }
}

module attributes {stable_mosaic.version = 11 : i64} {
  func.func @_mm_bias_act_kernel(%arg0: i32, %arg1: memref<392x288xbf16, #tpu.memory_space<vmem>>, %arg2: memref<288x16xbf16, #tpu.memory_space<vmem>>, %arg3: memref<1x16xf32, #tpu.memory_space<vmem>>, %arg4: memref<392x16xf32, #tpu.memory_space<vmem>>) attributes {dimension_semantics = [#tpu.dimension_semantics<parallel>], iteration_bounds = array<i64: 1>, scalar_prefetch = 0 : i64, scratch_operands = 0 : i64, tpu.core_type = #tpu.core_type<tc>, window_params = [{transform_indices = @transform_0, window_bounds = array<i64: 392, 288>}, {pipeline_mode = #tpu.pipeline_mode<synchronous>, transform_indices = @transform_1, window_bounds = array<i64: 288, 16>}, {pipeline_mode = #tpu.pipeline_mode<synchronous>, transform_indices = @transform_2, window_bounds = array<i64: 1, 16>}, {transform_indices = @transform_3, window_bounds = array<i64: 392, 16>}]} {
    %c0 = arith.constant 0 : index
    %c0_0 = arith.constant 0 : index
    %0 = vector.load %arg1[%c0, %c0_0] : memref<392x288xbf16, #tpu.memory_space<vmem>>, vector<392x288xbf16>
    %c0_1 = arith.constant 0 : index
    %c0_2 = arith.constant 0 : index
    %1 = vector.load %arg2[%c0_1, %c0_2] : memref<288x16xbf16, #tpu.memory_space<vmem>>, vector<288x16xbf16>
    %cst = arith.constant dense<0.000000e+00> : vector<392x16xf32>
    %2 = tpu.matmul %0, %1, %cst {dimension_numbers = #tpu.dot_dimension_numbers<[1], [0], [0], [1], [0, 0, 1, 1], [], []>} : vector<392x288xbf16>, vector<288x16xbf16>, vector<392x16xf32> -> vector<392x16xf32>
    %c0_3 = arith.constant 0 : index
    %c0_4 = arith.constant 0 : index
    %3 = vector.load %arg3[%c0_3, %c0_4] : memref<1x16xf32, #tpu.memory_space<vmem>>, vector<1x16xf32>
    %4 = vector.broadcast %3 : vector<1x16xf32> to vector<392x16xf32>
    %5 = arith.addf %2, %4 : vector<392x16xf32>
    %cst_5 = arith.constant 0.000000e+00 : f32
    %6 = vector.broadcast %cst_5 : f32 to vector<392x16xf32>
    %7 = arith.maximumf %5, %6 : vector<392x16xf32>
    %c0_6 = arith.constant 0 : index
    %c0_7 = arith.constant 0 : index
    %8 = vector.load %arg4[%c0_6, %c0_7] : memref<392x16xf32, #tpu.memory_space<vmem>>, vector<392x16xf32>
    tpu.vector_store %arg4[%c0_6, %c0_7], %7 {strides = array<i32>} : memref<392x16xf32, #tpu.memory_space<vmem>>, vector<392x16xf32>,
    return
  }
  func.func @transform_0(%arg0: i32) -> (i32, i32) {
    %c0_i32 = arith.constant 0 : i32
    %c0_i32_0 = arith.constant 0 : i32
    return %arg0, %c0_i32 : i32, i32
  }
  func.func @transform_1(%arg0: i32) -> (i32, i32) {
    %c0_i32 = arith.constant 0 : i32
    %c0_i32_0 = arith.constant 0 : i32
    %c0_i32_1 = arith.constant 0 : i32
    return %c0_i32, %c0_i32_0 : i32, i32
  }
  func.func @transform_2(%arg0: i32) -> (i32, i32) {
    %c0_i32 = arith.constant 0 : i32
    %c0_i32_0 = arith.constant 0 : i32
    %c0_i32_1 = arith.constant 0 : i32
    return %c0_i32, %c0_i32_0 : i32, i32
  }
  func.func @transform_3(%arg0: i32) -> (i32, i32) {
    %c0_i32 = arith.constant 0 : i32
    %c0_i32_0 = arith.constant 0 : i32
    return %arg0, %c0_i32 : i32, i32
  }
}

module attributes {stable_mosaic.version = 11 : i64} {
  func.func @_mm_bias_act_kernel(%arg0: i32, %arg1: memref<784x144xbf16, #tpu.memory_space<vmem>>, %arg2: memref<144x1xbf16, #tpu.memory_space<vmem>>, %arg3: memref<1x1xf32, #tpu.memory_space<vmem>>, %arg4: memref<784x1xf32, #tpu.memory_space<vmem>>) attributes {dimension_semantics = [#tpu.dimension_semantics<parallel>], iteration_bounds = array<i64: 2>, scalar_prefetch = 0 : i64, scratch_operands = 0 : i64, tpu.core_type = #tpu.core_type<tc>, window_params = [{transform_indices = @transform_0, window_bounds = array<i64: 784, 144>}, {pipeline_mode = #tpu.pipeline_mode<synchronous>, transform_indices = @transform_1, window_bounds = array<i64: 144, 1>}, {pipeline_mode = #tpu.pipeline_mode<synchronous>, transform_indices = @transform_2, window_bounds = array<i64: 1, 1>}, {transform_indices = @transform_3, window_bounds = array<i64: 784, 1>}]} {
    %c0 = arith.constant 0 : index
    %c0_0 = arith.constant 0 : index
    %0 = vector.load %arg1[%c0, %c0_0] : memref<784x144xbf16, #tpu.memory_space<vmem>>, vector<784x144xbf16>
    %c0_1 = arith.constant 0 : index
    %c0_2 = arith.constant 0 : index
    %1 = vector.load %arg2[%c0_1, %c0_2] : memref<144x1xbf16, #tpu.memory_space<vmem>>, vector<144x1xbf16>
    %cst = arith.constant dense<0.000000e+00> : vector<784x1xf32>
    %2 = tpu.matmul %0, %1, %cst {dimension_numbers = #tpu.dot_dimension_numbers<[1], [0], [0], [1], [0, 0, 1, 1], [], []>} : vector<784x144xbf16>, vector<144x1xbf16>, vector<784x1xf32> -> vector<784x1xf32>
    %c0_3 = arith.constant 0 : index
    %c0_4 = arith.constant 0 : index
    %3 = vector.load %arg3[%c0_3, %c0_4] : memref<1x1xf32, #tpu.memory_space<vmem>>, vector<1x1xf32>
    %4 = vector.broadcast %3 : vector<1x1xf32> to vector<784x1xf32>
    %5 = arith.addf %2, %4 : vector<784x1xf32>
    %cst_5 = arith.constant 5.000000e-01 : f32
    %6 = vector.broadcast %cst_5 : f32 to vector<784x1xf32>
    %7 = arith.mulf %6, %5 : vector<784x1xf32>
    %8 = math.tanh %7 : vector<784x1xf32>
    %cst_6 = arith.constant 1.000000e+00 : f32
    %9 = vector.broadcast %cst_6 : f32 to vector<784x1xf32>
    %10 = arith.addf %8, %9 : vector<784x1xf32>
    %cst_7 = arith.constant 5.000000e-01 : f32
    %11 = vector.broadcast %cst_7 : f32 to vector<784x1xf32>
    %12 = arith.mulf %11, %10 : vector<784x1xf32>
    %c0_8 = arith.constant 0 : index
    %c0_9 = arith.constant 0 : index
    %13 = vector.load %arg4[%c0_8, %c0_9] : memref<784x1xf32, #tpu.memory_space<vmem>>, vector<784x1xf32>
    tpu.vector_store %arg4[%c0_8, %c0_9], %12 {strides = array<i32>} : memref<784x1xf32, #tpu.memory_space<vmem>>, vector<784x1xf32>,
    return
  }
  func.func @transform_0(%arg0: i32) -> (i32, i32) {
    %c0_i32 = arith.constant 0 : i32
    %c0_i32_0 = arith.constant 0 : i32
    return %arg0, %c0_i32 : i32, i32
  }
  func.func @transform_1(%arg0: i32) -> (i32, i32) {
    %c0_i32 = arith.constant 0 : i32
    %c0_i32_0 = arith.constant 0 : i32
    %c0_i32_1 = arith.constant 0 : i32
    return %c0_i32, %c0_i32_0 : i32, i32
  }
  func.func @transform_2(%arg0: i32) -> (i32, i32) {
    %c0_i32 = arith.constant 0 : i32
    %c0_i32_0 = arith.constant 0 : i32
    %c0_i32_1 = arith.constant 0 : i32
    return %c0_i32, %c0_i32_0 : i32, i32
  }
  func.func @transform_3(%arg0: i32) -> (i32, i32) {
    %c0_i32 = arith.constant 0 : i32
    %c0_i32_0 = arith.constant 0 : i32
    return %arg0, %c0_i32 : i32, i32
  }
}

</mosaic_0001>

<bundles_post_ra>
// kernel: autoencoder_forward.6
= control target key start
LH: loop header
LB: loop body
LE: loop exit
PB: predicated region body
PF: predicated region fallthrough
CT: control target
= control target key end

     0   :  { %8 = vsyncpa [#allocation3], 0  ;;  %s1338_s0 = inlined_call_operand.vmem [shape: bf16[392,9], index: 0, kind: input, shape index: {}]   ;;  %s1339_s1 = inlined_call_operand.hbm [shape: bf16[9,16], index: 1, kind: input, shape index: {}]   ;;  %s1340_s2 = inlined_call_operand.hbm [shape: f32[1,16], index: 2, kind: input, shape index: {}]   ;;  %s1341_s3 = inlined_call_operand.vmem [shape: f32[392,16], index: 3, kind: output, shape index: {}]  }
   0x1   :  { %9 = vsyncpa [#allocation5], 0  ;;  %s906_s12 = smov [#allocation2]  }
   0x2   :  { %s17_s13 = sshll.u32 %s906_s12, 4  ;;  %s18_s13 = int_to_ptr.vmem [resolvable:$true] %s17_s13 }
   0x3   :  { %s870_s14 = scalar_lea.vmem %s18_s13, 128  ;;  %p875_p1 = scmp.lt.s32.totalorder %s18_s13, %s18_s13 }
   0x4   :  { %p871_p0 = scmp.ne.s32.totalorder %s18_s13, %s870_s14  ;;  %p876_p2 = scmp.lt.s32.totalorder %s870_s14, %s870_s14 }
   0x6   :  { %p877_p3 = por %p876_p2, %p875_p1 }
   0x8   :  { %p878_p4 = pnand %p877_p3, %p871_p0 }
   0xa   :  { %881 = shalt.err (!%p878_p4)
}
   0xb   :  { %s907_s15 = smov 64   ;;  %s908_s16 = smov 4  }
   0xc   :  { %23 = dma.hbm_to_vmem [thread:$0]  %s1339_s1, 128, %s18_s13, [#allocation3], %s907_s15, %s907_s15, %s908_s16  }
   0xd   :  { %s909_s19 = smov [#allocation4]  }
   0xe   :  { %s30_s20 = sshll.u32 %s909_s19, 4  ;;  %s31_s20 = int_to_ptr.vmem [resolvable:$true] %s30_s20 }
   0xf   :  { %s890_s21 = scalar_lea.vmem %s31_s20, 16  ;;  %s894_s22 = scalar_lea.vmem %s31_s20, 32 }
  0x10   :  { %p891_p5 = scmp.ne.s32.totalorder %s31_s20, %s890_s21  ;;  %p895_p6 = scmp.lt.s32.totalorder %s31_s20, %s31_s20 }
  0x11   :  { %p896_p7 = scmp.lt.s32.totalorder %s894_s22, %s890_s21 }
  0x13   :  { %p897_p8 = por %p896_p7, %p895_p6 }
  0x15   :  { %p898_p9 = pnand %p897_p8, %p891_p5 }
  0x17   :  { %901 = shalt.err (!%p898_p9)
}
  0x18   :  { %33 = dma.hbm_to_vmem [thread:$0]  %s1340_s2, 16, %s31_s20, [#allocation5]  }
  0x19   :  { %902 = dma.done.wait [#allocation3], 128  }
  0x1a   :  { %903 = vsyncadd [#allocation3], 4294967168 }
  0x1b   :  { %904 = dma.done.wait [#allocation5], 16  }
  0x1c   :  { %905 = vsyncadd [#allocation5], 4294967280  ;;  %vm303_vm0 = vcmask 1043456   ;;  %v910_v0 = vmov 0.0   ;;  %vm911_vm1 = vmmov 0   ;;  %vm304_vm2 = vcmask 1044480  }
  0x1d   :  { %725 = vmatprep.subr.bf16.mxu0 %v910_v0  ;;  %827 = vmatprep.subr.bf16.mxu1 %v910_v0  ;;  %v912_v1 = vmov 65535   ;;  %v836_v4 = vld [vmem:[#allocation2] sm:$0x1f]   ;;  %v838_v7 = vld [vmem:[%s1338_s0 + $0x68] sm:$0xff]   ;;  %vm227_vm3 = vcmask 72704   ;;  %v840_v9 = vld [vmem:[%s1338_s0 + $0x70] sm:$0xff]  }
  0x1e   :  { %727 = vmatprep.mubr.msk.bf16.mxu0 %vm911_vm1, %v910_v0  ;;  %779 = vmatprep.mubr.msk.bf16.mxu1 %vm911_vm1, %v910_v0  ;;  %v305_v2 = vsel %vm303_vm0, 4294967295, %v912_v1  ;;  %v837_v6 = vld [vmem:[%s1338_s0] sm:$0xff]   ;;  %v839_v8 = vld [vmem:[%s1338_s0 + $0x8] sm:$0xff]   ;;  %v841_v10 = vld [vmem:[%s1338_s0 + $0x10] sm:$0xff]   ;;  %vm591_vm4 = vcmask 130048  }
  0x1f   :  { %v306_v3 = vsel %vm304_vm2, %v305_v2, 0  ;;  %v842_v11 = vld [vmem:[%s1338_s0 + $0x78] sm:$0xff]   ;;  %v844_v13 = vld [vmem:[%s1338_s0 + $0x80] sm:$0xff]   ;;  %v846_v15 = vld [vmem:[%s1338_s0 + $0x88] sm:$0xff]  }
  0x20   :  { %v308_v5 = vand.u32 %v836_v4, %v306_v3  ;;  %v843_v12 = vld [vmem:[%s1338_s0 + $0x18] sm:$0xff]   ;;  %v845_v14 = vld [vmem:[%s1338_s0 + $0x20] sm:$0xff]   ;;  %v847_v16 = vld [vmem:[%s1338_s0 + $0x28] sm:$0xff]  }
  0x21   :  { %v848_v17 = vld [vmem:[%s1338_s0 + $0x90] sm:$0xff]   ;;  %v850_v19 = vld [vmem:[%s1338_s0 + $0x98] sm:$0xff]   ;;  %v852_v21 = vld [vmem:[%s1338_s0 + $0xa0] sm:$0xff]  }
  0x22   :  { %726 = vmatpush3.bf16.msra.mxu0 %v308_v5  ;;  %828 = vmatpush3.bf16.msra.mxu1 %v308_v5  ;;  %v849_v18 = vld [vmem:[%s1338_s0 + $0x30] sm:$0xff]   ;;  %v851_v20 = vld [vmem:[%s1338_s0 + $0x38] sm:$0xff]   ;;  %v853_v22 = vld [vmem:[%s1338_s0 + $0x40] sm:$0xff]  }
  0x23   :  { %v854_v23 = vld [vmem:[%s1338_s0 + $0xa8] sm:$0xff]   ;;  %v856_v25 = vld [vmem:[%s1338_s0 + $0xb0] sm:$0xff]   ;;  %v858_v27 = vld [vmem:[%s1338_s0 + $0xb8] sm:$0xff]  }
  0x24   :  { %v855_v24 = vld [vmem:[%s1338_s0 + $0x48] sm:$0xff]   ;;  %v857_v26 = vld [vmem:[%s1338_s0 + $0x50] sm:$0xff]   ;;  %v859_v28 = vld [vmem:[%s1338_s0 + $0x58] sm:$0xff]  }
  0x25   :  { %728 = vmatmul.mubr.msk.bf16.vlgmr.msra.gmra.mxu0 %vm227_vm3, %v837_v6  ;;  %780 = vmatmul.mubr.msk.bf16.vlgmr.msra.gmra.mxu1 %vm227_vm3, %v838_v7  ;;  %v860_v29 = vld [vmem:[%s1338_s0 + $0xc0] ss:$0 sps:$4 sm:$0xff]   ;;  %v1091_v31 = vld [vmem:[#allocation4] ss:$0 sm:$0xff] }
  0x26   :  { %731 = vmatprep.mubr.msk.bf16.mxu0 %vm911_vm1, %v910_v0  ;;  %783 = vmatprep.mubr.msk.bf16.mxu1 %vm911_vm1, %v910_v0  ;;  %v861_v30 = vld [vmem:[%s1338_s0 + $0x60] sm:$0xff]  }
  0x2d   :  { %732 = vmatmul.mubr.msk.bf16.gmra.mxu0 %vm227_vm3, %v839_v8  ;;  %784 = vmatmul.mubr.msk.bf16.gmra.mxu1 %vm227_vm3, %v840_v9 }
  0x2e   :  { %735 = vmatprep.mubr.msk.bf16.mxu0 %vm911_vm1, %v910_v0  ;;  %787 = vmatprep.mubr.msk.bf16.mxu1 %vm911_vm1, %v910_v0 }
  0x35   :  { %736 = vmatmul.mubr.msk.bf16.gmra.mxu0 %vm227_vm3, %v841_v10  ;;  %788 = vmatmul.mubr.msk.bf16.gmra.mxu1 %vm227_vm3, %v842_v11 }
  0x36   :  { %739 = vmatprep.mubr.msk.bf16.mxu0 %vm911_vm1, %v910_v0  ;;  %791 = vmatprep.mubr.msk.bf16.mxu1 %vm911_vm1, %v910_v0 }
  0x3d   :  { %740 = vmatmul.mubr.msk.bf16.gmra.mxu0 %vm227_vm3, %v843_v12  ;;  %792 = vmatmul.mubr.msk.bf16.gmra.mxu1 %vm227_vm3, %v844_v13 }
  0x3e   :  { %743 = vmatprep.mubr.msk.bf16.mxu0 %vm911_vm1, %v910_v0  ;;  %795 = vmatprep.mubr.msk.bf16.mxu1 %vm911_vm1, %v910_v0 }
  0x45   :  { %744 = vmatmul.mubr.msk.bf16.gmra.mxu0 %vm227_vm3, %v845_v14  ;;  %796 = vmatmul.mubr.msk.bf16.gmra.mxu1 %vm227_vm3, %v846_v15 }
  0x46   :  { %747 = vmatprep.mubr.msk.bf16.mxu0 %vm911_vm1, %v910_v0  ;;  %799 = vmatprep.mubr.msk.bf16.mxu1 %vm911_vm1, %v910_v0 }
  0x4d   :  { %748 = vmatmul.mubr.msk.bf16.gmra.mxu0 %vm227_vm3, %v847_v16  ;;  %800 = vmatmul.mubr.msk.bf16.gmra.mxu1 %vm227_vm3, %v848_v17 }
  0x4e   :  { %751 = vmatprep.mubr.msk.bf16.mxu0 %vm911_vm1, %v910_v0  ;;  %803 = vmatprep.mubr.msk.bf16.mxu1 %vm911_vm1, %v910_v0 }
  0x55   :  { %752 = vmatmul.mubr.msk.bf16.gmra.mxu0 %vm227_vm3, %v849_v18  ;;  %804 = vmatmul.mubr.msk.bf16.gmra.mxu1 %vm227_vm3, %v850_v19 }
  0x56   :  { %755 = vmatprep.mubr.msk.bf16.mxu0 %vm911_vm1, %v910_v0  ;;  %807 = vmatprep.mubr.msk.bf16.mxu1 %vm911_vm1, %v910_v0 }
  0x5d   :  { %756 = vmatmul.mubr.msk.bf16.gmra.mxu0 %vm227_vm3, %v851_v20  ;;  %808 = vmatmul.mubr.msk.bf16.gmra.mxu1 %vm227_vm3, %v852_v21 }
  0x5e   :  { %759 = vmatprep.mubr.msk.bf16.mxu0 %vm911_vm1, %v910_v0  ;;  %811 = vmatprep.mubr.msk.bf16.mxu1 %vm911_vm1, %v910_v0 }
  0x65   :  { %760 = vmatmul.mubr.msk.bf16.gmra.mxu0 %vm227_vm3, %v853_v22  ;;  %812 = vmatmul.mubr.msk.bf16.gmra.mxu1 %vm227_vm3, %v854_v23 }
  0x66   :  { %763 = vmatprep.mubr.msk.bf16.mxu0 %vm911_vm1, %v910_v0  ;;  %815 = vmatprep.mubr.msk.bf16.mxu1 %vm911_vm1, %v910_v0 }
  0x6d   :  { %764 = vmatmul.mubr.msk.bf16.gmra.mxu0 %vm227_vm3, %v855_v24  ;;  %816 = vmatmul.mubr.msk.bf16.gmra.mxu1 %vm227_vm3, %v856_v25 }
  0x6e   :  { %767 = vmatprep.mubr.msk.bf16.mxu0 %vm911_vm1, %v910_v0  ;;  %819 = vmatprep.mubr.msk.bf16.mxu1 %vm911_vm1, %v910_v0 }
  0x75   :  { %768 = vmatmul.mubr.msk.bf16.gmra.mxu0 %vm227_vm3, %v857_v26  ;;  %820 = vmatmul.mubr.msk.bf16.gmra.mxu1 %vm227_vm3, %v858_v27 }
  0x76   :  { %771 = vmatprep.mubr.msk.bf16.mxu0 %vm911_vm1, %v910_v0  ;;  %823 = vmatprep.mubr.msk.bf16.mxu1 %vm911_vm1, %v910_v0 }
  0x7d   :  { %772 = vmatmul.mubr.msk.bf16.gmra.mxu0 %vm227_vm3, %v859_v28  ;;  %824 = vmatmul.mubr.msk.bf16.gmra.mxu1 %vm227_vm3, %v860_v29 }
  0x7e   :  { %775 = vmatprep.mubr.msk.bf16.mxu0 %vm911_vm1, %v910_v0 }
  0x85   :  { %776 = vmatmul.mubr.msk.bf16.gmra.mxu0 %vm227_vm3, %v861_v30 }
  0xe5   :  { %v344_v32 = vpop.f32.mrf.mxu0  ;;  %v448_v33 = vpop.f32.mrf.mxu1 }
  0xe6   :  { %v345_v34 = vadd.f32 %v1091_v31, %v344_v32  ;;  %v449_v35 = vadd.f32 %v1091_v31, %v448_v33 }
  0xe7   :  { %v729_v36 = vpop.f32.mrf.mxu0  ;;  %v781_v37 = vpop.f32.mrf.mxu1 }
  0xe8   :  { %v542_v38 = vmax.f32 %v345_v34, 0.0  ;;  %v568_v39 = vmax.f32 %v449_v35, 0.0 }
  0xe9   :  { %v347_v40 = vpop.f32.mrf.mxu0  ;;  %v451_v41 = vpop.f32.mrf.mxu1 }
  0xea   :  { %592 = vst.msk [vmem:[%s1341_s3] sm:$0xff] %vm591_vm4, %v542_v38  ;;  %v348_v42 = vadd.f32 %v1091_v31, %v347_v40  ;;  %618 = vst.msk [vmem:[%s1341_s3 + $0xd0] sm:$0xff] %vm591_vm4, %v568_v39  ;;  %v452_v43 = vadd.f32 %v1091_v31, %v451_v41 }
  0xeb   :  { %v730_v44 = vpop.f32.mrf.mxu0  ;;  %v782_v45 = vpop.f32.mrf.mxu1 }
  0xec   :  { %v543_v46 = vmax.f32 %v348_v42, 0.0  ;;  %v569_v47 = vmax.f32 %v452_v43, 0.0 }
  0xed   :  { %v352_v48 = vpop.f32.mrf.mxu0  ;;  %v456_v49 = vpop.f32.mrf.mxu1 }
  0xee   :  { %593 = vst.msk [vmem:[%s1341_s3 + $0x8] sm:$0xff] %vm591_vm4, %v543_v46  ;;  %v353_v50 = vadd.f32 %v1091_v31, %v352_v48  ;;  %619 = vst.msk [vmem:[%s1341_s3 + $0xd8] sm:$0xff] %vm591_vm4, %v569_v47  ;;  %v457_v51 = vadd.f32 %v1091_v31, %v456_v49 }
  0xef   :  { %v733_v52 = vpop.f32.mrf.mxu0  ;;  %v785_v53 = vpop.f32.mrf.mxu1 }
  0xf0   :  { %v544_v54 = vmax.f32 %v353_v50, 0.0  ;;  %v570_v55 = vmax.f32 %v457_v51, 0.0 }
  0xf1   :  { %v355_v56 = vpop.f32.mrf.mxu0  ;;  %v459_v57 = vpop.f32.mrf.mxu1 }
  0xf2   :  { %594 = vst.msk [vmem:[%s1341_s3 + $0x10] sm:$0xff] %vm591_vm4, %v544_v54  ;;  %v356_v58 = vadd.f32 %v1091_v31, %v355_v56  ;;  %620 = vst.msk [vmem:[%s1341_s3 + $0xe0] sm:$0xff] %vm591_vm4, %v570_v55  ;;  %v460_v59 = vadd.f32 %v1091_v31, %v459_v57 }
  0xf3   :  { %v734_v60 = vpop.f32.mrf.mxu0  ;;  %v786_v61 = vpop.f32.mrf.mxu1 }
  0xf4   :  { %v545_v62 = vmax.f32 %v356_v58, 0.0  ;;  %v571_v63 = vmax.f32 %v460_v59, 0.0 }
  0xf5   :  { %v360_v0 = vpop.f32.mrf.mxu0  ;;  %v464_v1 = vpop.f32.mrf.mxu1 }
  0xf6   :  { %595 = vst.msk [vmem:[%s1341_s3 + $0x18] sm:$0xff] %vm591_vm4, %v545_v62  ;;  %v361_v2 = vadd.f32 %v1091_v31, %v360_v0  ;;  %621 = vst.msk [vmem:[%s1341_s3 + $0xe8] sm:$0xff] %vm591_vm4, %v571_v63  ;;  %v465_v3 = vadd.f32 %v1091_v31, %v464_v1 }
  0xf7   :  { %v737_v4 = vpop.f32.mrf.mxu0  ;;  %v789_v5 = vpop.f32.mrf.mxu1 }
  0xf8   :  { %v546_v6 = vmax.f32 %v361_v2, 0.0  ;;  %v572_v7 = vmax.f32 %v465_v3, 0.0 }
  0xf9   :  { %v363_v8 = vpop.f32.mrf.mxu0  ;;  %v467_v9 = vpop.f32.mrf.mxu1 }
  0xfa   :  { %596 = vst.msk [vmem:[%s1341_s3 + $0x20] sm:$0xff] %vm591_vm4, %v546_v6  ;;  %v364_v10 = vadd.f32 %v1091_v31, %v363_v8  ;;  %622 = vst.msk [vmem:[%s1341_s3 + $0xf0] sm:$0xff] %vm591_vm4, %v572_v7  ;;  %v468_v11 = vadd.f32 %v1091_v31, %v467_v9 }
  0xfb   :  { %v738_v12 = vpop.f32.mrf.mxu0  ;;  %v790_v13 = vpop.f32.mrf.mxu1 }
  0xfc   :  { %v547_v14 = vmax.f32 %v364_v10, 0.0  ;;  %v573_v15 = vmax.f32 %v468_v11, 0.0 }
  0xfd   :  { %v368_v16 = vpop.f32.mrf.mxu0  ;;  %v472_v17 = vpop.f32.mrf.mxu1 }
  0xfe   :  { %597 = vst.msk [vmem:[%s1341_s3 + $0x28] sm:$0xff] %vm591_vm4, %v547_v14  ;;  %v369_v18 = vadd.f32 %v1091_v31, %v368_v16  ;;  %623 = vst.msk [vmem:[%s1341_s3 + $0xf8] sm:$0xff] %vm591_vm4, %v573_v15  ;;  %v473_v19 = vadd.f32 %v1091_v31, %v472_v17 }
  0xff   :  { %v741_v20 = vpop.f32.mrf.mxu0  ;;  %v793_v21 = vpop.f32.mrf.mxu1 }
 0x100   :  { %v548_v22 = vmax.f32 %v369_v18, 0.0  ;;  %v574_v23 = vmax.f32 %v473_v19, 0.0 }
 0x101   :  { %v371_v24 = vpop.f32.mrf.mxu0  ;;  %v475_v25 = vpop.f32.mrf.mxu1 }
 0x102   :  { %598 = vst.msk [vmem:[%s1341_s3 + $0x30] sm:$0xff] %vm591_vm4, %v548_v22  ;;  %v372_v26 = vadd.f32 %v1091_v31, %v371_v24  ;;  %624 = vst.msk [vmem:[%s1341_s3 + $0x100] sm:$0xff] %vm591_vm4, %v574_v23  ;;  %v476_v27 = vadd.f32 %v1091_v31, %v475_v25 }
 0x103   :  { %v742_v28 = vpop.f32.mrf.mxu0  ;;  %v794_v29 = vpop.f32.mrf.mxu1 }
 0x104   :  { %v549_v30 = vmax.f32 %v372_v26, 0.0  ;;  %v575_v32 = vmax.f32 %v476_v27, 0.0 }
 0x105   :  { %v376_v33 = vpop.f32.mrf.mxu0  ;;  %v480_v34 = vpop.f32.mrf.mxu1 }
 0x106   :  { %599 = vst.msk [vmem:[%s1341_s3 + $0x38] sm:$0xff] %vm591_vm4, %v549_v30  ;;  %v377_v35 = vadd.f32 %v1091_v31, %v376_v33  ;;  %625 = vst.msk [vmem:[%s1341_s3 + $0x108] sm:$0xff] %vm591_vm4, %v575_v32  ;;  %v481_v36 = vadd.f32 %v1091_v31, %v480_v34 }
 0x107   :  { %v745_v37 = vpop.f32.mrf.mxu0  ;;  %v797_v38 = vpop.f32.mrf.mxu1 }
 0x108   :  { %v550_v39 = vmax.f32 %v377_v35, 0.0  ;;  %v576_v40 = vmax.f32 %v481_v36, 0.0 }
 0x109   :  { %v379_v41 = vpop.f32.mrf.mxu0  ;;  %v483_v42 = vpop.f32.mrf.mxu1 }
 0x10a   :  { %600 = vst.msk [vmem:[%s1341_s3 + $0x40] sm:$0xff] %vm591_vm4, %v550_v39  ;;  %v380_v43 = vadd.f32 %v1091_v31, %v379_v41  ;;  %626 = vst.msk [vmem:[%s1341_s3 + $0x110] sm:$0xff] %vm591_vm4, %v576_v40  ;;  %v484_v44 = vadd.f32 %v1091_v31, %v483_v42 }
 0x10b   :  { %v746_v45 = vpop.f32.mrf.mxu0  ;;  %v798_v46 = vpop.f32.mrf.mxu1 }
 0x10c   :  { %v551_v47 = vmax.f32 %v380_v43, 0.0  ;;  %v577_v48 = vmax.f32 %v484_v44, 0.0 }
 0x10d   :  { %v384_v49 = vpop.f32.mrf.mxu0  ;;  %v488_v50 = vpop.f32.mrf.mxu1 }
 0x10e   :  { %601 = vst.msk [vmem:[%s1341_s3 + $0x48] sm:$0xff] %vm591_vm4, %v551_v47  ;;  %v385_v51 = vadd.f32 %v1091_v31, %v384_v49  ;;  %627 = vst.msk [vmem:[%s1341_s3 + $0x118] sm:$0xff] %vm591_vm4, %v577_v48  ;;  %v489_v52 = vadd.f32 %v1091_v31, %v488_v50 }
 0x10f   :  { %v749_v53 = vpop.f32.mrf.mxu0  ;;  %v801_v54 = vpop.f32.mrf.mxu1 }
 0x110   :  { %v552_v55 = vmax.f32 %v385_v51, 0.0  ;;  %v578_v56 = vmax.f32 %v489_v52, 0.0 }
 0x111   :  { %v387_v57 = vpop.f32.mrf.mxu0  ;;  %v491_v58 = vpop.f32.mrf.mxu1 }
 0x112   :  { %602 = vst.msk [vmem:[%s1341_s3 + $0x50] sm:$0xff] %vm591_vm4, %v552_v55  ;;  %v388_v59 = vadd.f32 %v1091_v31, %v387_v57  ;;  %628 = vst.msk [vmem:[%s1341_s3 + $0x120] sm:$0xff] %vm591_vm4, %v578_v56  ;;  %v492_v60 = vadd.f32 %v1091_v31, %v491_v58 }
 0x113   :  { %v750_v61 = vpop.f32.mrf.mxu0  ;;  %v802_v62 = vpop.f32.mrf.mxu1 }
 0x114   :  { %v553_v63 = vmax.f32 %v388_v59, 0.0  ;;  %v579_v0 = vmax.f32 %v492_v60, 0.0 }
 0x115   :  { %v392_v1 = vpop.f32.mrf.mxu0  ;;  %v496_v2 = vpop.f32.mrf.mxu1 }
 0x116   :  { %603 = vst.msk [vmem:[%s1341_s3 + $0x58] sm:$0xff] %vm591_vm4, %v553_v63  ;;  %v393_v3 = vadd.f32 %v1091_v31, %v392_v1  ;;  %629 = vst.msk [vmem:[%s1341_s3 + $0x128] sm:$0xff] %vm591_vm4, %v579_v0  ;;  %v497_v4 = vadd.f32 %v1091_v31, %v496_v2 }
 0x117   :  { %v753_v5 = vpop.f32.mrf.mxu0  ;;  %v805_v6 = vpop.f32.mrf.mxu1 }
 0x118   :  { %v554_v7 = vmax.f32 %v393_v3, 0.0  ;;  %v580_v8 = vmax.f32 %v497_v4, 0.0 }
 0x119   :  { %v395_v9 = vpop.f32.mrf.mxu0  ;;  %v499_v10 = vpop.f32.mrf.mxu1 }
 0x11a   :  { %604 = vst.msk [vmem:[%s1341_s3 + $0x60] sm:$0xff] %vm591_vm4, %v554_v7  ;;  %v396_v11 = vadd.f32 %v1091_v31, %v395_v9  ;;  %630 = vst.msk [vmem:[%s1341_s3 + $0x130] sm:$0xff] %vm591_vm4, %v580_v8  ;;  %v500_v12 = vadd.f32 %v1091_v31, %v499_v10 }
 0x11b   :  { %v754_v13 = vpop.f32.mrf.mxu0  ;;  %v806_v14 = vpop.f32.mrf.mxu1 }
 0x11c   :  { %v555_v15 = vmax.f32 %v396_v11, 0.0  ;;  %v581_v16 = vmax.f32 %v500_v12, 0.0 }
 0x11d   :  { %v400_v17 = vpop.f32.mrf.mxu0  ;;  %v504_v18 = vpop.f32.mrf.mxu1 }
 0x11e   :  { %605 = vst.msk [vmem:[%s1341_s3 + $0x68] sm:$0xff] %vm591_vm4, %v555_v15  ;;  %v401_v19 = vadd.f32 %v1091_v31, %v400_v17  ;;  %631 = vst.msk [vmem:[%s1341_s3 + $0x138] sm:$0xff] %vm591_vm4, %v581_v16  ;;  %v505_v20 = vadd.f32 %v1091_v31, %v504_v18 }
 0x11f   :  { %v757_v21 = vpop.f32.mrf.mxu0  ;;  %v809_v22 = vpop.f32.mrf.mxu1 }
 0x120   :  { %v556_v23 = vmax.f32 %v401_v19, 0.0  ;;  %v582_v24 = vmax.f32 %v505_v20, 0.0 }
 0x121   :  { %v403_v25 = vpop.f32.mrf.mxu0  ;;  %v507_v26 = vpop.f32.mrf.mxu1 }
 0x122   :  { %606 = vst.msk [vmem:[%s1341_s3 + $0x70] sm:$0xff] %vm591_vm4, %v556_v23  ;;  %v404_v27 = vadd.f32 %v1091_v31, %v403_v25  ;;  %632 = vst.msk [vmem:[%s1341_s3 + $0x140] sm:$0xff] %vm591_vm4, %v582_v24  ;;  %v508_v28 = vadd.f32 %v1091_v31, %v507_v26 }
 0x123   :  { %v758_v29 = vpop.f32.mrf.mxu0  ;;  %v810_v30 = vpop.f32.mrf.mxu1 }
 0x124   :  { %v557_v32 = vmax.f32 %v404_v27, 0.0  ;;  %v583_v33 = vmax.f32 %v508_v28, 0.0 }
 0x125   :  { %v408_v34 = vpop.f32.mrf.mxu0  ;;  %v512_v35 = vpop.f32.mrf.mxu1 }
 0x126   :  { %607 = vst.msk [vmem:[%s1341_s3 + $0x78] sm:$0xff] %vm591_vm4, %v557_v32  ;;  %v409_v36 = vadd.f32 %v1091_v31, %v408_v34  ;;  %633 = vst.msk [vmem:[%s1341_s3 + $0x148] sm:$0xff] %vm591_vm4, %v583_v33  ;;  %v513_v37 = vadd.f32 %v1091_v31, %v512_v35 }
 0x127   :  { %v761_v38 = vpop.f32.mrf.mxu0  ;;  %v813_v39 = vpop.f32.mrf.mxu1 }
 0x128   :  { %v558_v40 = vmax.f32 %v409_v36, 0.0  ;;  %v584_v41 = vmax.f32 %v513_v37, 0.0 }
 0x129   :  { %v411_v42 = vpop.f32.mrf.mxu0  ;;  %v515_v43 = vpop.f32.mrf.mxu1 }
 0x12a   :  { %608 = vst.msk [vmem:[%s1341_s3 + $0x80] sm:$0xff] %vm591_vm4, %v558_v40  ;;  %v412_v44 = vadd.f32 %v1091_v31, %v411_v42  ;;  %634 = vst.msk [vmem:[%s1341_s3 + $0x150] sm:$0xff] %vm591_vm4, %v584_v41  ;;  %v516_v45 = vadd.f32 %v1091_v31, %v515_v43 }
 0x12b   :  { %v762_v46 = vpop.f32.mrf.mxu0  ;;  %v814_v47 = vpop.f32.mrf.mxu1 }
 0x12c   :  { %v559_v48 = vmax.f32 %v412_v44, 0.0  ;;  %v585_v49 = vmax.f32 %v516_v45, 0.0 }
 0x12d   :  { %v416_v50 = vpop.f32.mrf.mxu0  ;;  %v520_v51 = vpop.f32.mrf.mxu1 }
 0x12e   :  { %609 = vst.msk [vmem:[%s1341_s3 + $0x88] sm:$0xff] %vm591_vm4, %v559_v48  ;;  %v417_v52 = vadd.f32 %v1091_v31, %v416_v50  ;;  %635 = vst.msk [vmem:[%s1341_s3 + $0x158] sm:$0xff] %vm591_vm4, %v585_v49  ;;  %v521_v53 = vadd.f32 %v1091_v31, %v520_v51 }
 0x12f   :  { %v765_v54 = vpop.f32.mrf.mxu0  ;;  %v817_v55 = vpop.f32.mrf.mxu1 }
 0x130   :  { %v560_v56 = vmax.f32 %v417_v52, 0.0  ;;  %v586_v57 = vmax.f32 %v521_v53, 0.0 }
 0x131   :  { %v419_v58 = vpop.f32.mrf.mxu0  ;;  %v523_v59 = vpop.f32.mrf.mxu1 }
 0x132   :  { %610 = vst.msk [vmem:[%s1341_s3 + $0x90] sm:$0xff] %vm591_vm4, %v560_v56  ;;  %v420_v60 = vadd.f32 %v1091_v31, %v419_v58  ;;  %636 = vst.msk [vmem:[%s1341_s3 + $0x160] sm:$0xff] %vm591_vm4, %v586_v57  ;;  %v524_v61 = vadd.f32 %v1091_v31, %v523_v59 }
 0x133   :  { %v766_v62 = vpop.f32.mrf.mxu0  ;;  %v818_v63 = vpop.f32.mrf.mxu1 }
 0x134   :  { %v561_v0 = vmax.f32 %v420_v60, 0.0  ;;  %v587_v1 = vmax.f32 %v524_v61, 0.0 }
 0x135   :  { %v424_v2 = vpop.f32.mrf.mxu0  ;;  %v528_v3 = vpop.f32.mrf.mxu1 }
 0x136   :  { %611 = vst.msk [vmem:[%s1341_s3 + $0x98] sm:$0xff] %vm591_vm4, %v561_v0  ;;  %v425_v4 = vadd.f32 %v1091_v31, %v424_v2  ;;  %637 = vst.msk [vmem:[%s1341_s3 + $0x168] sm:$0xff] %vm591_vm4, %v587_v1  ;;  %v529_v5 = vadd.f32 %v1091_v31, %v528_v3 }
 0x137   :  { %v769_v6 = vpop.f32.mrf.mxu0  ;;  %v821_v7 = vpop.f32.mrf.mxu1 }
 0x138   :  { %v562_v8 = vmax.f32 %v425_v4, 0.0  ;;  %v588_v9 = vmax.f32 %v529_v5, 0.0 }
 0x139   :  { %v427_v10 = vpop.f32.mrf.mxu0  ;;  %v531_v11 = vpop.f32.mrf.mxu1 }
 0x13a   :  { %612 = vst.msk [vmem:[%s1341_s3 + $0xa0] sm:$0xff] %vm591_vm4, %v562_v8  ;;  %v428_v12 = vadd.f32 %v1091_v31, %v427_v10  ;;  %638 = vst.msk [vmem:[%s1341_s3 + $0x170] sm:$0xff] %vm591_vm4, %v588_v9  ;;  %v532_v13 = vadd.f32 %v1091_v31, %v531_v11 }
 0x13b   :  { %v770_v14 = vpop.f32.mrf.mxu0  ;;  %v822_v15 = vpop.f32.mrf.mxu1 }
 0x13c   :  { %v563_v16 = vmax.f32 %v428_v12, 0.0  ;;  %v589_v17 = vmax.f32 %v532_v13, 0.0 }
 0x13d   :  { %v432_v18 = vpop.f32.mrf.mxu0  ;;  %v536_v19 = vpop.f32.mrf.mxu1 }
 0x13e   :  { %613 = vst.msk [vmem:[%s1341_s3 + $0xa8] sm:$0xff] %vm591_vm4, %v563_v16  ;;  %v433_v20 = vadd.f32 %v1091_v31, %v432_v18  ;;  %639 = vst.msk [vmem:[%s1341_s3 + $0x178] sm:$0xff] %vm591_vm4, %v589_v17  ;;  %v537_v21 = vadd.f32 %v1091_v31, %v536_v19 }
 0x13f   :  { %v773_v22 = vpop.f32.mrf.mxu0  ;;  %v825_v23 = vpop.f32.mrf.mxu1 }
 0x140   :  { %v564_v24 = vmax.f32 %v433_v20, 0.0  ;;  %v590_v25 = vmax.f32 %v537_v21, 0.0 }
 0x141   :  { %v435_v26 = vpop.f32.mrf.mxu0  ;;  %v539_v27 = vpop.f32.mrf.mxu1 }
 0x142   :  { %614 = vst.msk [vmem:[%s1341_s3 + $0xb0] sm:$0xff] %vm591_vm4, %v564_v24  ;;  %v436_v28 = vadd.f32 %v1091_v31, %v435_v26  ;;  %640 = vst.msk [vmem:[%s1341_s3 + $0x180] sm:$0xff] %vm591_vm4, %v590_v25 }
 0x143   :  { %v774_v29 = vpop.f32.mrf.mxu0  ;;  %v826_v30 = vpop.f32.mrf.mxu1 }
 0x144   :  { %v565_v32 = vmax.f32 %v436_v28, 0.0 }
 0x145   :  { %v440_v33 = vpop.f32.mrf.mxu0 }
 0x146   :  { %615 = vst.msk [vmem:[%s1341_s3 + $0xb8] sm:$0xff] %vm591_vm4, %v565_v32  ;;  %v441_v34 = vadd.f32 %v1091_v31, %v440_v33 }
 0x147   :  { %v777_v35 = vpop.f32.mrf.mxu0 }
 0x148   :  { %v566_v36 = vmax.f32 %v441_v34, 0.0 }
 0x149   :  { %v443_v37 = vpop.f32.mrf.mxu0 }
 0x14a   :  { %616 = vst.msk [vmem:[%s1341_s3 + $0xc0] sm:$0xff] %vm591_vm4, %v566_v36  ;;  %v444_v38 = vadd.f32 %v1091_v31, %v443_v37 }
 0x14b   :  { %v778_v39 = vpop.f32.mrf.mxu0 }
 0x14c   :  { %v567_v40 = vmax.f32 %v444_v38, 0.0 }
 0x14e   :  { %617 = vst.msk [vmem:[%s1341_s3 + $0xc8] sm:$0xff] %vm591_vm4, %v567_v40 }
 0x14f   :  { %645 = vsyncpa [#allocation3], 1 }
 0x150   :  { %646 = vsyncpa [#allocation5], 1 }

// kernel: autoencoder_forward.7
= control target key start
LH: loop header
LB: loop body
LE: loop exit
PB: predicated region body
PF: predicated region fallthrough
CT: control target
= control target key end

     0   :  { %v388_v0 = vmov 0   ;;  %vm167_vm0 = vcmask 130048   ;;  %vm290_vm1 = vcmask 261120   ;;  %vm303_vm2 = vcmask 254976   ;;  %s551_s1 = inlined_call_operand.vmem [shape: bf16[144,32], index: 1, kind: input, shape index: {}]   ;;  %s552_s0 = inlined_call_operand.vmem [shape: bf16[98,144], index: 0, kind: input, shape index: {}]   ;;  %s553_s2 = inlined_call_operand.vmem [shape: f32[1,32], index: 2, kind: input, shape index: {}]   ;;  %s554_s3 = inlined_call_operand.vmem [shape: f32[98,32], index: 3, kind: output, shape index: {}]  }
   0x1   :  { %189 = vmatprep.subr.bf16.mxu0 %v388_v0  ;;  %v359_v1 = vld [vmem:[%s551_s1 + $0x38] sm:$0xff]   ;;  %340 = vmatprep.subr.bf16.mxu1 %v388_v0  ;;  %v360_v2 = vld [vmem:[%s551_s1 + $0x30] sm:$0xff]   ;;  %v361_v3 = vld [vmem:[%s551_s1 + $0x28] sm:$0xff]  }
   0x2   :  { %190 = vmatpush1.bf16.msra.mxu0 %v359_v1  ;;  %349 = vmatpush1.bf16.msra.mxu1 %v359_v1  ;;  %v362_v4 = vld [vmem:[%s551_s1 + $0x20] sm:$0xff]   ;;  %v363_v7 = vld [vmem:[%s551_s1 + $0x18] sm:$0xff]   ;;  %v364_v8 = vld [vmem:[%s551_s1 + $0x10] sm:$0xff]  }
   0x3   :  { %191 = vmatprep.subr.bf16.mxu0 %v388_v0  ;;  %341 = vmatprep.subr.bf16.mxu1 %v388_v0  ;;  %v370_v5 = vld [vmem:[%s552_s0 + $0x4] ss:$8 sps:$4 sm:$0xff]   ;;  %v368_v12 = vld [vmem:[%s552_s0] ss:$8 sps:$4 sm:$0xff]   ;;  %v374_v14 = vld [vmem:[%s552_s0 + $0x14] ss:$8 sps:$4 sm:$0xff]  }
   0x4   :  { %v373_v6 = vld [vmem:[%s552_s0 + $0x44] ss:$8 sps:$4 sm:$0xff]   ;;  %333 = vmatprep.mubr.msk.bf16.mxu0 %vm167_vm0, %v370_v5  ;;  %v371_v13 = vld [vmem:[%s552_s0 + $0x40] ss:$8 sps:$4 sm:$0xff]   ;;  %v377_v15 = vld [vmem:[%s552_s0 + $0x54] ss:$8 sps:$4 sm:$0xff]  }
   0x5   :  { %337 = vmatprep.mubr.msk.bf16.mxu1 %vm167_vm0, %v373_v6  ;;  %v365_v9 = vld [vmem:[%s551_s1 + $0x8] sm:$0xff]   ;;  %v366_v10 = vld [vmem:[%s551_s1] sm:$0xff]   ;;  %v376_v17 = vld [vmem:[%s552_s0 + $0x10] ss:$8 sps:$4 sm:$0xff]  }
   0x6   :  { %192 = vmatpush1.bf16.msra.mxu0 %v360_v2  ;;  %350 = vmatpush1.bf16.msra.mxu1 %v360_v2  ;;  %v367_v11 = vld [vmem:[%s551_s1 + $0x40] sm:$0xff]   ;;  %v379_v18 = vld [vmem:[%s552_s0 + $0x50] ss:$8 sps:$4 sm:$0xff]   ;;  %v385_v23 = vld [vmem:[%s552_s0 + $0x34] ss:$8 sps:$4 sm:$0xff]  }
   0x7   :  { %193 = vmatprep.subr.bf16.mxu0 %v388_v0  ;;  %342 = vmatprep.subr.bf16.mxu1 %v388_v0  ;;  %v27_v16 = vld [vmem:[%s552_s0 + $0x60] sm:$0x11]  ;;  %v387_v24 = vld [vmem:[%s552_s0 + $0x30] ss:$8 sps:$4 sm:$0xff]  }
   0x8   :  { %v380_v19 = vld [vmem:[%s552_s0 + $0x24] ss:$8 sps:$4 sm:$0xff]   ;;  %v323_v20 = vcombine.high %v27_v16, %v27_v16  ;;  %v382_v21 = vld [vmem:[%s552_s0 + $0x20] ss:$8 sps:$4 sm:$0xff]   ;;  %v322_v22 = vcombine.low %v27_v16, %v27_v16 }
   0x9   :  { %v485_v25 = vld [vmem:[%s553_s2] ss:$0 sm:$0xff] }
   0xa   :  { %194 = vmatpush1.bf16.msra.mxu0 %v361_v3  ;;  %351 = vmatpush1.bf16.msra.mxu1 %v361_v3 }
   0xb   :  { %195 = vmatprep.subr.bf16.mxu0 %v388_v0  ;;  %343 = vmatprep.subr.bf16.mxu1 %v388_v0 }
   0xe   :  { %196 = vmatpush1.bf16.msra.mxu0 %v362_v4  ;;  %352 = vmatpush1.bf16.msra.mxu1 %v362_v4 }
   0xf   :  { %197 = vmatprep.subr.bf16.mxu0 %v388_v0  ;;  %344 = vmatprep.subr.bf16.mxu1 %v388_v0 }
  0x12   :  { %198 = vmatpush1.bf16.msra.mxu0 %v363_v7  ;;  %353 = vmatpush1.bf16.msra.mxu1 %v363_v7 }
  0x13   :  { %199 = vmatprep.subr.bf16.mxu0 %v388_v0  ;;  %345 = vmatprep.subr.bf16.mxu1 %v388_v0 }
  0x16   :  { %200 = vmatpush1.bf16.msra.mxu0 %v364_v8  ;;  %354 = vmatpush1.bf16.msra.mxu1 %v364_v8 }
  0x17   :  { %201 = vmatprep.subr.bf16.mxu0 %v388_v0  ;;  %346 = vmatprep.subr.bf16.mxu1 %v388_v0 }
  0x1a   :  { %202 = vmatpush1.bf16.msra.mxu0 %v365_v9  ;;  %355 = vmatpush1.bf16.msra.mxu1 %v365_v9 }
  0x1b   :  { %203 = vmatprep.subr.bf16.mxu0 %v388_v0  ;;  %347 = vmatprep.subr.bf16.mxu1 %v388_v0 }
  0x1e   :  { %204 = vmatpush1.bf16.msra.mxu0 %v366_v10  ;;  %356 = vmatpush1.bf16.msra.mxu1 %v366_v10 }
  0x1f   :  { %219 = vmatprep.subr.bf16.mxu0 %v388_v0  ;;  %348 = vmatprep.subr.bf16.mxu1 %v388_v0 }
  0x22   :  { %220 = vmatpush2.bf16.msra.mxu0 %v367_v11  ;;  %357 = vmatpush2.bf16.msra.mxu1 %v367_v11 }
  0x25   :  { %222 = vmatmul.mubr.bf16.vlgmr.msra.gmra.mxu0 %v368_v12  ;;  %254 = vmatmul.mubr.bf16.vlgmr.msra.gmra.mxu1 %v371_v13 }
  0x26   :  { %334 = vmatprep.mubr.msk.bf16.mxu0 %vm167_vm0, %v374_v14  ;;  %338 = vmatprep.mubr.msk.bf16.mxu1 %vm167_vm0, %v377_v15 }
  0x2d   :  { %230 = vmatmul.mubr.bf16.gmra.mxu0 %v376_v17  ;;  %262 = vmatmul.mubr.bf16.gmra.mxu1 %v379_v18 }
  0x2e   :  { %335 = vmatprep.mubr.msk.bf16.mxu0 %vm167_vm0, %v380_v19  ;;  %339 = vmatprep.mubr.msk.bf16.mxu1 %vm167_vm0, %v323_v20 }
  0x35   :  { %238 = vmatmul.mubr.bf16.gmra.mxu0 %v382_v21  ;;  %270 = vmatmul.mubr.bf16.gmra.mxu1 %v322_v22 }
  0x36   :  { %336 = vmatprep.mubr.msk.bf16.mxu0 %vm167_vm0, %v385_v23 }
  0x3d   :  { %246 = vmatmul.mubr.bf16.gmra.mxu0 %v387_v24 }
  0xe5   :  { %v223_v26 = vpop.f32.mrf.mxu0  ;;  %v255_v27 = vpop.f32.mrf.mxu1 }
  0xe6   :  { %v224_v28 = vadd.f32 %v485_v25, %v223_v26  ;;  %v256_v29 = vadd.f32 %v485_v25, %v255_v27 }
  0xe7   :  { %v225_v30 = vpop.f32.mrf.mxu0  ;;  %v257_v31 = vpop.f32.mrf.mxu1 }
  0xe8   :  { %v277_v32 = vmax.f32 %v224_v28, 0.0  ;;  %v285_v33 = vmax.f32 %v256_v29, 0.0 }
  0xe9   :  { %v226_v34 = vpop.f32.mrf.mxu0  ;;  %v258_v35 = vpop.f32.mrf.mxu1 }
  0xea   :  { %291 = vst.msk [vmem:[%s554_s3] sm:$0xff] %vm290_vm1, %v277_v32  ;;  %v227_v36 = vadd.f32 %v485_v25, %v226_v34  ;;  %299 = vst.msk [vmem:[%s554_s3 + $0x40] sm:$0xff] %vm290_vm1, %v285_v33  ;;  %v259_v37 = vadd.f32 %v485_v25, %v258_v35 }
  0xeb   :  { %v228_v38 = vpop.f32.mrf.mxu0  ;;  %v260_v39 = vpop.f32.mrf.mxu1 }
  0xec   :  { %v278_v40 = vmax.f32 %v227_v36, 0.0  ;;  %v286_v41 = vmax.f32 %v259_v37, 0.0 }
  0xed   :  { %v231_v42 = vpop.f32.mrf.mxu0  ;;  %v263_v43 = vpop.f32.mrf.mxu1 }
  0xee   :  { %292 = vst.msk [vmem:[%s554_s3 + $0x8] sm:$0xff] %vm290_vm1, %v278_v40  ;;  %v232_v44 = vadd.f32 %v485_v25, %v231_v42  ;;  %300 = vst.msk [vmem:[%s554_s3 + $0x48] sm:$0xff] %vm290_vm1, %v286_v41  ;;  %v264_v45 = vadd.f32 %v485_v25, %v263_v43 }
  0xef   :  { %v233_v46 = vpop.f32.mrf.mxu0  ;;  %v265_v47 = vpop.f32.mrf.mxu1 }
  0xf0   :  { %v279_v48 = vmax.f32 %v232_v44, 0.0  ;;  %v287_v49 = vmax.f32 %v264_v45, 0.0 }
  0xf1   :  { %v234_v50 = vpop.f32.mrf.mxu0  ;;  %v266_v51 = vpop.f32.mrf.mxu1 }
  0xf2   :  { %293 = vst.msk [vmem:[%s554_s3 + $0x10] sm:$0xff] %vm290_vm1, %v279_v48  ;;  %v235_v52 = vadd.f32 %v485_v25, %v234_v50  ;;  %301 = vst.msk [vmem:[%s554_s3 + $0x50] sm:$0xff] %vm290_vm1, %v287_v49  ;;  %v267_v53 = vadd.f32 %v485_v25, %v266_v51 }
  0xf3   :  { %v236_v54 = vpop.f32.mrf.mxu0  ;;  %v268_v55 = vpop.f32.mrf.mxu1 }
  0xf4   :  { %v280_v56 = vmax.f32 %v235_v52, 0.0  ;;  %v288_v57 = vmax.f32 %v267_v53, 0.0 }
  0xf5   :  { %v239_v58 = vpop.f32.mrf.mxu0  ;;  %v271_v59 = vpop.f32.mrf.mxu1 }
  0xf6   :  { %294 = vst.msk [vmem:[%s554_s3 + $0x18] sm:$0xff] %vm290_vm1, %v280_v56  ;;  %v240_v60 = vadd.f32 %v485_v25, %v239_v58  ;;  %302 = vst.msk [vmem:[%s554_s3 + $0x58] sm:$0xff] %vm290_vm1, %v288_v57  ;;  %v272_v61 = vadd.f32 %v485_v25, %v271_v59 }
  0xf7   :  { %v241_v62 = vpop.f32.mrf.mxu0  ;;  %v273_v63 = vpop.f32.mrf.mxu1 }
  0xf8   :  { %v281_v0 = vmax.f32 %v240_v60, 0.0  ;;  %v289_v1 = vmax.f32 %v272_v61, 0.0 }
  0xf9   :  { %v242_v2 = vpop.f32.mrf.mxu0  ;;  %v274_v3 = vpop.f32.mrf.mxu1 }
  0xfa   :  { %295 = vst.msk [vmem:[%s554_s3 + $0x20] sm:$0xff] %vm290_vm1, %v281_v0  ;;  %v243_v4 = vadd.f32 %v485_v25, %v242_v2 }
  0xfb   :  { %304 = vst.msk [vmem:[%s554_s3 + $0x60] sm:$0x3] %vm303_vm2, %v289_v1  ;;  %v244_v5 = vpop.f32.mrf.mxu0  ;;  %v275_v6 = vpop.f32.mrf.mxu1 }
  0xfc   :  { %v282_v7 = vmax.f32 %v243_v4, 0.0 }
  0xfd   :  { %v247_v8 = vpop.f32.mrf.mxu0 }
  0xfe   :  { %296 = vst.msk [vmem:[%s554_s3 + $0x28] sm:$0xff] %vm290_vm1, %v282_v7  ;;  %v248_v9 = vadd.f32 %v485_v25, %v247_v8 }
  0xff   :  { %v249_v10 = vpop.f32.mrf.mxu0 }
 0x100   :  { %v283_v11 = vmax.f32 %v248_v9, 0.0 }
 0x101   :  { %v250_v12 = vpop.f32.mrf.mxu0 }
 0x102   :  { %297 = vst.msk [vmem:[%s554_s3 + $0x30] sm:$0xff] %vm290_vm1, %v283_v11  ;;  %v251_v13 = vadd.f32 %v485_v25, %v250_v12 }
 0x103   :  { %v252_v14 = vpop.f32.mrf.mxu0 }
 0x104   :  { %v284_v15 = vmax.f32 %v251_v13, 0.0 }
 0x106   :  { %298 = vst.msk [vmem:[%s554_s3 + $0x38] sm:$0xff] %vm290_vm1, %v284_v15 }

// kernel: autoencoder_forward.9
= control target key start
LH: loop header
LB: loop body
LE: loop exit
PB: predicated region body
PF: predicated region fallthrough
CT: control target
= control target key end

     0   :  { %v948_v1 = vmov 0   ;;  %vm405_vm0 = vcmask 523264   ;;  %v949_v51 = vmov 0.0   ;;  %vm950_vm1 = vmmov 0   ;;  %s1207_s1 = inlined_call_operand.vmem [shape: bf16[64,1568], index: 1, kind: input, shape index: {}]   ;;  %s1208_s0 = inlined_call_operand.vmem [shape: bf16[2,64], index: 0, kind: input, shape index: {}]   ;;  %s1209_s2 = inlined_call_operand.vmem [shape: f32[1,1568], index: 2, kind: input, shape index: {}]   ;;  %s1210_s3 = inlined_call_operand.vmem [shape: f32[2,1568], index: 3, kind: output, shape index: {}]  }
   0x1   :  { %v872_v0 = vld [vmem:[%s1207_s1 + $0x13c] ss:$52 sps:$4 sm:$0xff]   ;;  %441 = vmatprep.mubr.bf16.mxu0 %v948_v1  ;;  %482 = vmatprep.mubr.bf16.mxu1 %v948_v1  ;;  %v874_v2 = vld [vmem:[%s1207_s1 + $0x144] ss:$52 sps:$4 sm:$0xff]   ;;  %v877_v4 = vld [vmem:[%s1207_s1 + $0x140] ss:$52 sps:$4 sm:$0xff]   ;;  %v76_v55 = vlaneseq }
   0x2   :  { %417 = vmatprep.subr.bf16.mxu0 %v872_v0  ;;  %v876_v3 = vld [vmem:[%s1207_s1 + $0x138] ss:$52 sps:$4 sm:$0xff]   ;;  %458 = vmatprep.subr.bf16.mxu1 %v874_v2  ;;  %v878_v5 = vld [vmem:[%s1207_s1 + $0xd4] ss:$52 sps:$4 sm:$0xff]   ;;  %v880_v6 = vld [vmem:[%s1207_s1 + $0xdc] ss:$52 sps:$4 sm:$0xff]  }
   0x3   :  { %418 = vmatpush1.bf16.msra.mxu0 %v876_v3  ;;  %459 = vmatpush1.bf16.msra.mxu1 %v877_v4  ;;  %v882_v7 = vld [vmem:[%s1207_s1 + $0xd0] ss:$52 sps:$4 sm:$0xff]   ;;  %v883_v8 = vld [vmem:[%s1207_s1 + $0xd8] ss:$52 sps:$4 sm:$0xff]   ;;  %v886_v10 = vld [vmem:[%s1207_s1 + $0x74] ss:$52 sps:$4 sm:$0xff]  }
   0x4   :  { %419 = vmatprep.subr.bf16.mxu0 %v878_v5  ;;  %460 = vmatprep.subr.bf16.mxu1 %v880_v6  ;;  %v884_v9 = vld [vmem:[%s1207_s1 + $0x6c] ss:$52 sps:$4 sm:$0xff]   ;;  %v888_v11 = vld [vmem:[%s1207_s1 + $0x68] ss:$52 sps:$4 sm:$0xff]   ;;  %v889_v12 = vld [vmem:[%s1207_s1 + $0x70] ss:$52 sps:$4 sm:$0xff]  }
   0x5   :  { %v890_v13 = vld [vmem:[%s1207_s1 + $0x4] ss:$52 sps:$4 sm:$0xff]   ;;  %v892_v14 = vld [vmem:[%s1207_s1 + $0xc] ss:$52 sps:$4 sm:$0xff]   ;;  %v895_v16 = vld [vmem:[%s1207_s1 + $0x8] ss:$52 sps:$4 sm:$0xff]  }
   0x6   :  { %v894_v15 = vld [vmem:[%s1207_s1] ss:$52 sps:$4 sm:$0xff]   ;;  %v896_v20 = vld [vmem:[%s1207_s1 + $0x148] ss:$52 sps:$4 sm:$0xff]   ;;  %v899_v21 = vld [vmem:[%s1207_s1 + $0x150] ss:$52 sps:$4 sm:$0xff]  }
   0x7   :  { %420 = vmatpush1.bf16.msra.mxu0 %v882_v7  ;;  %461 = vmatpush1.bf16.msra.mxu1 %v883_v8  ;;  %v898_v17 = vld [vmem:[%s1207_s1 + $0x14c] ss:$52 sps:$4 sm:$0xff]   ;;  %v901_v18 = vld [vmem:[%s1207_s1 + $0x154] ss:$52 sps:$4 sm:$0xff]   ;;  %v904_v22 = vld [vmem:[%s1207_s1 + $0xe4] ss:$52 sps:$4 sm:$0xff]  }
   0x8   :  { %421 = vmatprep.subr.bf16.mxu0 %v884_v9  ;;  %462 = vmatprep.subr.bf16.mxu1 %v886_v10  ;;  %v1031_v19 = vld [vmem:[%s1208_s0] sm:$0x1]  ;;  %v905_v25 = vld [vmem:[%s1207_s1 + $0xe8] ss:$52 sps:$4 sm:$0xff]   ;;  %v913_v27 = vld [vmem:[%s1207_s1 + $0x84] ss:$52 sps:$4 sm:$0xff]  }
   0x9   :  { %v907_v23 = vld [vmem:[%s1207_s1 + $0xec] ss:$52 sps:$4 sm:$0xff]   ;;  %v910_v26 = vld [vmem:[%s1207_s1 + $0x7c] ss:$52 sps:$4 sm:$0xff]   ;;  %v916_v30 = vld [vmem:[%s1207_s1 + $0x14] ss:$52 sps:$4 sm:$0xff]  }
   0xa   :  { %v902_v24 = vld [vmem:[%s1207_s1 + $0xe0] ss:$52 sps:$4 sm:$0xff]   ;;  %v908_v28 = vld [vmem:[%s1207_s1 + $0x78] ss:$52 sps:$4 sm:$0xff]   ;;  %v919_v31 = vld [vmem:[%s1207_s1 + $0x1c] ss:$52 sps:$4 sm:$0xff]  }
   0xb   :  { %422 = vmatpush1.bf16.msra.mxu0 %v888_v11  ;;  %463 = vmatpush1.bf16.msra.mxu1 %v889_v12  ;;  %v911_v29 = vld [vmem:[%s1207_s1 + $0x80] ss:$52 sps:$4 sm:$0xff]   ;;  %v914_v32 = vld [vmem:[%s1207_s1 + $0x10] ss:$52 sps:$4 sm:$0xff]   ;;  %v917_v33 = vld [vmem:[%s1207_s1 + $0x18] ss:$52 sps:$4 sm:$0xff]  }
   0xc   :  { %423 = vmatprep.subr.bf16.mxu0 %v890_v13  ;;  %464 = vmatprep.subr.bf16.mxu1 %v892_v14  ;;  %v922_v34 = vld [vmem:[%s1207_s1 + $0x15c] ss:$52 sps:$4 sm:$0xff]   ;;  %v925_v35 = vld [vmem:[%s1207_s1 + $0x164] ss:$52 sps:$4 sm:$0xff]   ;;  %v923_v37 = vld [vmem:[%s1207_s1 + $0x160] ss:$52 sps:$4 sm:$0xff]  }
   0xd   :  { %v920_v36 = vld [vmem:[%s1207_s1 + $0x158] ss:$52 sps:$4 sm:$0xff]   ;;  %v928_v38 = vld [vmem:[%s1207_s1 + $0xf4] ss:$52 sps:$4 sm:$0xff]   ;;  %v931_v39 = vld [vmem:[%s1207_s1 + $0xfc] ss:$52 sps:$4 sm:$0xff]  }
   0xe   :  { %v926_v40 = vld [vmem:[%s1207_s1 + $0xf0] ss:$52 sps:$4 sm:$0xff]   ;;  %v929_v41 = vld [vmem:[%s1207_s1 + $0xf8] ss:$52 sps:$4 sm:$0xff]   ;;  %v937_v43 = vld [vmem:[%s1207_s1 + $0x94] ss:$52 sps:$4 sm:$0xff]  }
   0xf   :  { %424 = vmatpush1.bf16.msra.mxu0 %v894_v15  ;;  %465 = vmatpush1.bf16.msra.mxu1 %v895_v16  ;;  %v934_v42 = vld [vmem:[%s1207_s1 + $0x8c] ss:$52 sps:$4 sm:$0xff]   ;;  %v932_v44 = vld [vmem:[%s1207_s1 + $0x88] ss:$52 sps:$4 sm:$0xff]   ;;  %v935_v45 = vld [vmem:[%s1207_s1 + $0x90] ss:$52 sps:$4 sm:$0xff]  }
  0x10   :  { %499 = vmatprep.subr.bf16.mxu0 %v898_v17  ;;  %540 = vmatprep.subr.bf16.mxu1 %v901_v18  ;;  %v940_v46 = vld [vmem:[%s1207_s1 + $0x24] ss:$52 sps:$4 sm:$0xff]   ;;  %v943_v47 = vld [vmem:[%s1207_s1 + $0x2c] ss:$52 sps:$4 sm:$0xff]   ;;  %v941_v49 = vld [vmem:[%s1207_s1 + $0x28] ss:$52 sps:$4 sm:$0xff]  }
  0x11   :  { %v938_v48 = vld [vmem:[%s1207_s1 + $0x20] ss:$52 sps:$4 sm:$0xff]   ;;  %v944_v50 = vld [vmem:[%s1207_s1 + $0x168] ss:$52 sps:$4 sm:$0xff]   ;;  %v946_v53 = vld [vmem:[%s1207_s1 + $0x98] ss:$52 sps:$4 sm:$0xff]  }
  0x12   :  { %844 = vmatmul.mubr.msk.bf16.vlgmr.msra.gmra.mxu0 %vm405_vm0, %v1031_v19  ;;  %845 = vmatmul.mubr.msk.bf16.vlgmr.msra.gmra.mxu1 %vm405_vm0, %v1031_v19  ;;  %v945_v52 = vld [vmem:[%s1207_s1 + $0x100] ss:$52 sps:$4 sm:$0xff]   ;;  %v947_v54 = vld [vmem:[%s1207_s1 + $0x30] ss:$52 sps:$4 sm:$0xff]   ;;  %v1153_v56 = vshrl.u32 %v76_v55, 7  ;;  %vm786_vm2 = vcmask 254976  }
  0x13   :  { %500 = vmatpush1.bf16.msra.mxu0 %v896_v20  ;;  %541 = vmatpush1.bf16.msra.mxu1 %v899_v21  ;;  %v72_v59 = vld [vmem:[%s1209_s2] sm:$0xff]  ;;  %v951_v0 = vmov 1983009808   ;;  %v73_v55 = vld [vmem:[%s1209_s2 + $0x8] sm:$0x1f] }
  0x14   :  { %501 = vmatprep.subr.bf16.mxu0 %v904_v22  ;;  %542 = vmatprep.subr.bf16.mxu1 %v907_v23  ;;  %v78_v57 = vsub.s32 0, %v1153_v56  ;;  %v86_v58 = vsub.s32 2, %v1153_v56  ;;  %v82_v60 = vsub.s32 1, %v1153_v56  ;;  %v90_v61 = vsub.s32 3, %v1153_v56 }
  0x15   :  { %523 = vmatprep.mubr.bf16.mxu0 %v948_v1  ;;  %564 = vmatprep.mubr.bf16.mxu1 %v948_v1 }
  0x16   :  { %v79_v62 = vrot.slane %v72_v59, %v78_v57  ;;  %v87_v63 = vrot.slane %v72_v59, %v86_v58  ;;  %v83_v2 = vrot.slane %v72_v59, %v82_v60  ;;  %v91_v3 = vrot.slane %v72_v59, %v90_v61 }
  0x17   :  { %502 = vmatpush1.bf16.msra.mxu0 %v902_v24  ;;  %543 = vmatpush1.bf16.msra.mxu1 %v905_v25 }
  0x18   :  { %503 = vmatprep.subr.bf16.mxu0 %v910_v26  ;;  %544 = vmatprep.subr.bf16.mxu1 %v913_v27  ;;  %v94_v26 = vsub.s32 4, %v1153_v56  ;;  %v102_v27 = vsub.s32 6, %v1153_v56 }
  0x1b   :  { %504 = vmatpush1.bf16.msra.mxu0 %v908_v28  ;;  %545 = vmatpush1.bf16.msra.mxu1 %v911_v29  ;;  %v98_v29 = vsub.s32 5, %v1153_v56 }
  0x1c   :  { %505 = vmatprep.subr.bf16.mxu0 %v916_v30  ;;  %546 = vmatprep.subr.bf16.mxu1 %v919_v31  ;;  %v106_v30 = vsub.s32 7, %v1153_v56  ;;  %v95_v31 = vrot.slane %v72_v59, %v94_v26 }
  0x1f   :  { %506 = vmatpush1.bf16.msra.mxu0 %v914_v32  ;;  %547 = vmatpush1.bf16.msra.mxu1 %v917_v33  ;;  %v103_v32 = vrot.slane %v72_v59, %v102_v27  ;;  %v99_v33 = vrot.slane %v72_v59, %v98_v29 }
  0x20   :  { %581 = vmatprep.subr.bf16.mxu0 %v922_v34  ;;  %622 = vmatprep.subr.bf16.mxu1 %v925_v35  ;;  %v107_v34 = vrot.slane %v72_v59, %v106_v30 }
  0x22   :  { %846 = vmatmul.mubr.msk.bf16.vlgmr.msra.gmra.mxu0 %vm405_vm0, %v1031_v19  ;;  %847 = vmatmul.mubr.msk.bf16.vlgmr.msra.gmra.mxu1 %vm405_vm0, %v1031_v19 }
  0x23   :  { %582 = vmatpush1.bf16.msra.mxu0 %v920_v36  ;;  %623 = vmatpush1.bf16.msra.mxu1 %v923_v37 }
  0x24   :  { %583 = vmatprep.subr.bf16.mxu0 %v928_v38  ;;  %624 = vmatprep.subr.bf16.mxu1 %v931_v39 }
  0x25   :  { %605 = vmatprep.mubr.bf16.mxu0 %v948_v1  ;;  %646 = vmatprep.mubr.bf16.mxu1 %v948_v1  ;;  %v724_v1 = vunpack.c.l.s4 %v951_v0  ;;  %v115_v0 = vrot.slane %v73_v55, %v82_v60 }
  0x27   :  { %584 = vmatpush1.bf16.msra.mxu0 %v926_v40  ;;  %625 = vmatpush1.bf16.msra.mxu1 %v929_v41  ;;  %v725_v8 = vunpack.c.0.s8 %v724_v1  ;;  %v123_v1 = vrot.slane %v73_v55, %v90_v61 }
  0x28   :  { %585 = vmatprep.subr.bf16.mxu0 %v934_v42  ;;  %626 = vmatprep.subr.bf16.mxu1 %v937_v43 }
  0x29   :  { %v1171_v18 = vsub.s32 %v725_v8, %v1153_v56 }
  0x2b   :  { %586 = vmatpush1.bf16.msra.mxu0 %v932_v44  ;;  %627 = vmatpush1.bf16.msra.mxu1 %v935_v45 }
  0x2c   :  { %587 = vmatprep.subr.bf16.mxu0 %v940_v46  ;;  %628 = vmatprep.subr.bf16.mxu1 %v943_v47 }
  0x2f   :  { %588 = vmatpush1.bf16.msra.mxu0 %v938_v48  ;;  %629 = vmatpush1.bf16.msra.mxu1 %v941_v49 }
  0x30   :  { %856 = vmatprep.subr.bf16.mxu0 %v949_v51 }
  0x32   :  { %848 = vmatmul.mubr.msk.bf16.vlgmr.msra.gmra.mxu0 %vm405_vm0, %v1031_v19  ;;  %849 = vmatmul.mubr.msk.bf16.vlgmr.msra.gmra.mxu1 %vm405_vm0, %v1031_v19 }
  0x33   :  { %857 = vmatpush3.bf16.msra.mxu0 %v944_v50  ;;  %864 = vmatprep.mubr.msk.bf16.mxu0 %vm950_vm1, %v949_v51 }
  0x34   :  { %858 = vmatprep.subr.bf16.mxu0 %v949_v51 }
  0x37   :  { %859 = vmatpush3.bf16.msra.mxu0 %v945_v52 }
  0x38   :  { %860 = vmatprep.subr.bf16.mxu0 %v949_v51 }
  0x3b   :  { %861 = vmatpush3.bf16.msra.mxu0 %v946_v53 }
  0x3c   :  { %862 = vmatprep.subr.bf16.mxu0 %v949_v51 }
  0x3f   :  { %863 = vmatpush3.bf16.msra.mxu0 %v947_v54 }
  0x42   :  { %865 = vmatmul.mubr.msk.bf16.vlgmr.msra.gmra.mxu0 %vm405_vm0, %v1031_v19 }
  0xd2   :  { %v443_v4 = vpop.f32.mrf.mxu0  ;;  %v484_v5 = vpop.f32.mrf.mxu1 }
  0xd3   :  { %v444_v6 = vadd.f32 %v443_v4, %v79_v62  ;;  %v485_v7 = vadd.f32 %v484_v5, %v87_v63  ;;  %v111_v62 = vrot.slane %v73_v55, %v78_v57  ;;  %v119_v63 = vrot.slane %v73_v55, %v86_v58 }
  0xd4   :  { %v445_v9 = vpop.f32.mrf.mxu0  ;;  %v486_v10 = vpop.f32.mrf.mxu1 }
  0xd5   :  { %v695_v11 = vmax.f32 %v444_v6, 0.0  ;;  %v697_v12 = vmax.f32 %v485_v7, 0.0  ;;  %v446_v13 = vadd.f32 %v445_v9, %v83_v2  ;;  %v487_v14 = vadd.f32 %v486_v10, %v91_v3 }
  0xd6   :  { %v447_v15 = vpop.f32.mrf.mxu0  ;;  %v488_v16 = vpop.f32.mrf.mxu1 }
  0xd7   :  { %v696_v17 = vmax.f32 %v446_v13, 0.0  ;;  %v698_v19 = vmax.f32 %v487_v14, 0.0 }
  0xd8   :  { %v448_v20 = vpop.f32.mrf.mxu0  ;;  %v489_v21 = vpop.f32.mrf.mxu1 }
  0xd9   :  { %v721_v22 = vcombine.low %v695_v11, %v696_v17  ;;  %v722_v23 = vcombine.low %v697_v12, %v698_v19  ;;  %v127_v19 = vrot.slane %v73_v55, %v94_v26 }
  0xdb   :  { %v729_v24 = vrot.slane %v721_v22, %v1171_v18  ;;  %v736_v25 = vrot.slane %v722_v23, %v1171_v18 }
  0xdd   :  { %v737_v28 = vcombine.low %v729_v24, %v736_v25 }
  0xdf   :  { %783 = vst [vmem:[%s1210_s3] sm:$0xff] %v737_v28 }
  0xe2   :  { %v525_v35 = vpop.f32.mrf.mxu0  ;;  %v566_v36 = vpop.f32.mrf.mxu1 }
  0xe3   :  { %v526_v37 = vadd.f32 %v525_v35, %v95_v31  ;;  %v567_v38 = vadd.f32 %v566_v36, %v103_v32 }
  0xe4   :  { %v527_v39 = vpop.f32.mrf.mxu0  ;;  %v568_v40 = vpop.f32.mrf.mxu1 }
  0xe5   :  { %v699_v41 = vmax.f32 %v526_v37, 0.0  ;;  %v701_v42 = vmax.f32 %v567_v38, 0.0  ;;  %v528_v43 = vadd.f32 %v527_v39, %v99_v33  ;;  %v569_v44 = vadd.f32 %v568_v40, %v107_v34 }
  0xe6   :  { %v529_v45 = vpop.f32.mrf.mxu0  ;;  %v570_v46 = vpop.f32.mrf.mxu1 }
  0xe7   :  { %v700_v47 = vmax.f32 %v528_v43, 0.0  ;;  %v702_v48 = vmax.f32 %v569_v44, 0.0 }
  0xe8   :  { %v530_v49 = vpop.f32.mrf.mxu0  ;;  %v571_v50 = vpop.f32.mrf.mxu1 }
  0xe9   :  { %v738_v51 = vcombine.low %v699_v41, %v700_v47  ;;  %v739_v52 = vcombine.low %v701_v42, %v702_v48 }
  0xeb   :  { %v746_v53 = vrot.slane %v738_v51, %v1171_v18  ;;  %v753_v54 = vrot.slane %v739_v52, %v1171_v18 }
  0xed   :  { %v754_v59 = vcombine.low %v746_v53, %v753_v54 }
  0xef   :  { %784 = vst [vmem:[%s1210_s3 + $0x8] sm:$0xff] %v754_v59 }
  0xf2   :  { %v607_v2 = vpop.f32.mrf.mxu0  ;;  %v648_v3 = vpop.f32.mrf.mxu1 }
  0xf3   :  { %v608_v4 = vadd.f32 %v607_v2, %v111_v62  ;;  %v649_v5 = vadd.f32 %v648_v3, %v119_v63 }
  0xf4   :  { %v609_v6 = vpop.f32.mrf.mxu0  ;;  %v650_v7 = vpop.f32.mrf.mxu1 }
  0xf5   :  { %v703_v8 = vmax.f32 %v608_v4, 0.0  ;;  %v705_v9 = vmax.f32 %v649_v5, 0.0  ;;  %v610_v10 = vadd.f32 %v609_v6, %v115_v0  ;;  %v651_v11 = vadd.f32 %v650_v7, %v123_v1 }
  0xf6   :  { %v611_v57 = vpop.f32.mrf.mxu0  ;;  %v652_v12 = vpop.f32.mrf.mxu1 }
  0xf7   :  { %v704_v13 = vmax.f32 %v610_v10, 0.0  ;;  %v706_v58 = vmax.f32 %v651_v11, 0.0 }
  0xf8   :  { %v612_v14 = vpop.f32.mrf.mxu0  ;;  %v653_v15 = vpop.f32.mrf.mxu1 }
  0xf9   :  { %v755_v60 = vcombine.low %v703_v8, %v704_v13  ;;  %v756_v16 = vcombine.low %v705_v9, %v706_v58 }
  0xfb   :  { %v763_v56 = vrot.slane %v755_v60, %v1171_v18  ;;  %v770_v61 = vrot.slane %v756_v16, %v1171_v18 }
  0xfd   :  { %v771_v17 = vcombine.low %v763_v56, %v770_v61 }
  0xff   :  { %785 = vst [vmem:[%s1210_s3 + $0x10] sm:$0xff] %v771_v17 }
 0x102   :  { %v689_v20 = vpop.f32.mrf.mxu0 }
 0x103   :  { %v690_v21 = vadd.f32 %v689_v20, %v127_v19 }
 0x104   :  { %v866_v22 = vpop.f32.mrf.mxu0 }
 0x105   :  { %v707_v23 = vmax.f32 %v690_v21, 0.0 }
 0x106   :  { %v692_v24 = vpop.f32.mrf.mxu0 }
 0x107   :  { %v778_v25 = vrot.slane %v707_v23, %v1171_v18 }
 0x108   :  { %v867_v27 = vpop.f32.mrf.mxu0 }
 0x109   :  { %787 = vst.msk [vmem:[%s1210_s3 + $0x18] sm:$0x3] %vm786_vm2, %v778_v25 }

// kernel: autoencoder_forward.8
= control target key start
LH: loop header
LB: loop body
LE: loop exit
PB: predicated region body
PF: predicated region fallthrough
CT: control target
= control target key end

     0   :  { %v1546_v22 = vmov 1966171168   ;;  %v226_v24 = vlaneseq  ;;  %vm1548_vm0 = vmmov 0   ;;  %vm910_vm1 = vcmask 261120   ;;  %s1903_s1 = inlined_call_operand.vmem [shape: bf16[1568,64], index: 1, kind: input, shape index: {}]   ;;  %s1904_s0 = inlined_call_operand.vmem [shape: bf16[2,1568], index: 0, kind: input, shape index: {}]   ;;  %s1905_s2 = inlined_call_operand.vmem [shape: f32[1,64], index: 2, kind: input, shape index: {}]   ;;  %s1906_s3 = inlined_call_operand.vmem [shape: f32[2,64], index: 3, kind: output, shape index: {}]  }
   0x1   :  { %v1446_v0 = vld [vmem:[%s1903_s1 + $0x78] sm:$0xff]   ;;  %v1450_v4 = vld [vmem:[%s1903_s1 + $0x70] sm:$0xff]   ;;  %v1454_v8 = vld [vmem:[%s1903_s1 + $0x68] sm:$0xff]   ;;  %v224_v23 = vunpack.c.l.s4 %v1546_v22  ;;  %vm1194_vm2 = vcmask 517120  }
   0x2   :  { %v1447_v1 = vld [vmem:[%s1903_s1 + $0xf8] sm:$0xff]   ;;  %1300 = vmatprep.subr.bf16.mxu0 %v1446_v0  ;;  %v1451_v5 = vld [vmem:[%s1903_s1 + $0xf0] sm:$0xff]   ;;  %v1455_v9 = vld [vmem:[%s1903_s1 + $0xe8] sm:$0xff]   ;;  %v227_v30 = vshrl.u32 %v226_v24, 7 }
   0x3   :  { %v1448_v2 = vld [vmem:[%s1903_s1 + $0x38] sm:$0xff]   ;;  %1322 = vmatprep.subr.bf16.mxu1 %v1447_v1  ;;  %v1452_v6 = vld [vmem:[%s1903_s1 + $0x30] sm:$0xff]   ;;  %v1456_v10 = vld [vmem:[%s1903_s1 + $0x28] sm:$0xff]   ;;  %v225_v29 = vunpack.c.0.s8 %v224_v23 }
   0x4   :  { %v1449_v3 = vld [vmem:[%s1903_s1 + $0xb8] sm:$0xff]   ;;  %1301 = vmatpush3.bf16.msra.mxu0 %v1448_v2  ;;  %v1453_v7 = vld [vmem:[%s1903_s1 + $0xb0] sm:$0xff]   ;;  %v1457_v11 = vld [vmem:[%s1903_s1 + $0xa8] sm:$0xff]  }
   0x5   :  { %1323 = vmatpush3.bf16.msra.mxu1 %v1449_v3  ;;  %1302 = vmatprep.subr.bf16.mxu0 %v1450_v4  ;;  %v1458_v12 = vld [vmem:[%s1903_s1 + $0x60] sm:$0xff]   ;;  %v1462_v16 = vld [vmem:[%s1903_s1 + $0x58] sm:$0xff]   ;;  %v1466_v20 = vld [vmem:[%s1903_s1 + $0x50] sm:$0xff]   ;;  %v1659_v35 = vsub.s32 %v225_v29, %v227_v30 }
   0x6   :  { %1324 = vmatprep.subr.bf16.mxu1 %v1451_v5  ;;  %v1459_v13 = vld [vmem:[%s1903_s1 + $0xe0] sm:$0xff]   ;;  %v1463_v17 = vld [vmem:[%s1903_s1 + $0xd8] sm:$0xff]   ;;  %v1467_v21 = vld [vmem:[%s1903_s1 + $0xd0] sm:$0xff]  }
   0x7   :  { %v1460_v14 = vld [vmem:[%s1903_s1 + $0x20] sm:$0xff]   ;;  %v1464_v18 = vld [vmem:[%s1903_s1 + $0x18] sm:$0xff]   ;;  %v1468_v25 = vld [vmem:[%s1903_s1 + $0x10] sm:$0xff]  }
   0x8   :  { %1303 = vmatpush3.bf16.msra.mxu0 %v1452_v6  ;;  %v1461_v15 = vld [vmem:[%s1903_s1 + $0xa0] sm:$0xff]   ;;  %v1465_v19 = vld [vmem:[%s1903_s1 + $0x98] sm:$0xff]   ;;  %v1469_v26 = vld [vmem:[%s1903_s1 + $0x90] sm:$0xff]  }
   0x9   :  { %1325 = vmatpush3.bf16.msra.mxu1 %v1453_v7  ;;  %1304 = vmatprep.subr.bf16.mxu0 %v1454_v8  ;;  %v1470_v27 = vld [vmem:[%s1903_s1 + $0x48] sm:$0xff]   ;;  %v1474_v33 = vld [vmem:[%s1903_s1 + $0x40] sm:$0xff]   ;;  %v1480_v41 = vld [vmem:[%s1903_s1 + $0x178] sm:$0xff]  }
   0xa   :  { %1326 = vmatprep.subr.bf16.mxu1 %v1455_v9  ;;  %v1471_v28 = vld [vmem:[%s1903_s1 + $0xc8] sm:$0xff]   ;;  %v1475_v34 = vld [vmem:[%s1903_s1 + $0xc0] sm:$0xff]   ;;  %v1481_v42 = vld [vmem:[%s1903_s1 + $0x1f8] sm:$0xff]  }
   0xb   :  { %v1472_v31 = vld [vmem:[%s1903_s1 + $0x8] sm:$0xff]   ;;  %v1476_v36 = vld [vmem:[%s1903_s1] sm:$0xff]   ;;  %v1482_v47 = vld [vmem:[%s1903_s1 + $0x138] sm:$0xff]  }
   0xc   :  { %1305 = vmatpush3.bf16.msra.mxu0 %v1456_v10  ;;  %v1473_v32 = vld [vmem:[%s1903_s1 + $0x88] sm:$0xff]   ;;  %v1477_v37 = vld [vmem:[%s1903_s1 + $0x80] sm:$0xff]   ;;  %v1484_v50 = vld [vmem:[%s1903_s1 + $0x170] sm:$0xff]  }
   0xd   :  { %1327 = vmatpush3.bf16.msra.mxu1 %v1457_v11  ;;  %1306 = vmatprep.subr.bf16.mxu0 %v1458_v12  ;;  %v15_v38 = vld [vmem:[%s1904_s0] sm:$0xff]  ;;  %v1483_v52 = vld [vmem:[%s1903_s1 + $0x1b8] sm:$0xff]   ;;  %v1485_v54 = vld [vmem:[%s1903_s1 + $0x1f0] sm:$0xff]  }
   0xe   :  { %1328 = vmatprep.subr.bf16.mxu1 %v1459_v13  ;;  %v222_v39 = vcombine.high %v15_v38, %v15_v38  ;;  %v229_v40 = vrot.slane %v15_v38, %v1659_v35  ;;  %v1486_v55 = vld [vmem:[%s1903_s1 + $0x130] sm:$0xff]   ;;  %v1488_v57 = vld [vmem:[%s1903_s1 + $0x168] sm:$0xff]   ;;  %v1492_v61 = vld [vmem:[%s1903_s1 + $0x160] sm:$0xff]  }
   0xf   :  { %v1487_v58 = vld [vmem:[%s1903_s1 + $0x1b0] sm:$0xff]   ;;  %v1489_v59 = vld [vmem:[%s1903_s1 + $0x1e8] sm:$0xff]   ;;  %v1493_v63 = vld [vmem:[%s1903_s1 + $0x1e0] sm:$0xff]  }
  0x10   :  { %1307 = vmatpush3.bf16.msra.mxu0 %v1460_v14  ;;  %v237_v43 = vcombine.high %v229_v40, %v229_v40  ;;  %v245_v44 = vrot.slane %v229_v40, %v1659_v35  ;;  %v1679_v45 = vrot.slane %v222_v39, %v1659_v35  ;;  %v1490_v60 = vld [vmem:[%s1903_s1 + $0x128] sm:$0xff]   ;;  %v1494_v0 = vld [vmem:[%s1903_s1 + $0x120] sm:$0xff]   ;;  %v1496_v1 = vld [vmem:[%s1903_s1 + $0x158] sm:$0xff]  }
  0x11   :  { %1329 = vmatpush3.bf16.msra.mxu1 %v1461_v15  ;;  %1308 = vmatprep.subr.bf16.mxu0 %v1462_v16  ;;  %v1491_v62 = vld [vmem:[%s1903_s1 + $0x1a8] sm:$0xff]   ;;  %v1495_v2 = vld [vmem:[%s1903_s1 + $0x1a0] sm:$0xff]   ;;  %v1497_v3 = vld [vmem:[%s1903_s1 + $0x1d8] sm:$0xff]  }
  0x12   :  { %1330 = vmatprep.subr.bf16.mxu1 %v1463_v17  ;;  %v259_v46 = vrot.slane %v237_v43, %v1659_v35  ;;  %v238_v48 = vcombine.high %v1679_v45, %v1679_v45  ;;  %v267_v49 = vcombine.high %v245_v44, %v245_v44  ;;  %v1498_v4 = vld [vmem:[%s1903_s1 + $0x118] sm:$0xff]   ;;  %v1739_v5 = vld [vmem:[%s1904_s0 + $0x8] sm:$0x1f]  ;;  %v1500_v6 = vld [vmem:[%s1903_s1 + $0x150] sm:$0xff]  }
  0x13   :  { %v1499_v7 = vld [vmem:[%s1903_s1 + $0x198] sm:$0xff]   ;;  %v1501_v8 = vld [vmem:[%s1903_s1 + $0x1d0] sm:$0xff]   ;;  %v1504_v10 = vld [vmem:[%s1903_s1 + $0x148] sm:$0xff]   ;;  %v1761_v12 = vrot.slane %v1739_v5, %v1659_v35 }
  0x14   :  { %1309 = vmatpush3.bf16.msra.mxu0 %v1464_v18  ;;  %946 = vmatprep.mubr.bf16.mxu0 %v259_v46  ;;  %v269_v51 = vcombine.high %v259_v46, %v259_v46  ;;  %v266_v53 = vrot.slane %v238_v48, %v1659_v35  ;;  %v1502_v9 = vld [vmem:[%s1903_s1 + $0x110] sm:$0xff]   ;;  %v1505_v13 = vld [vmem:[%s1903_s1 + $0x1c8] sm:$0xff]   ;;  %v1508_v15 = vld [vmem:[%s1903_s1 + $0x140] sm:$0xff]  }
  0x15   :  { %1331 = vmatpush3.bf16.msra.mxu1 %v1465_v19  ;;  %1310 = vmatprep.subr.bf16.mxu0 %v1466_v20  ;;  %v1503_v11 = vld [vmem:[%s1903_s1 + $0x190] sm:$0xff]   ;;  %v1506_v14 = vld [vmem:[%s1903_s1 + $0x108] sm:$0xff]   ;;  %v286_v17 = vcombine.high %v1761_v12, %v1761_v12  ;;  %v1509_v18 = vld [vmem:[%s1903_s1 + $0x1c0] sm:$0xff]   ;;  %v252_v20 = vrot.slane %v1679_v45, %v1659_v35 }
  0x16   :  { %1332 = vmatprep.subr.bf16.mxu1 %v1467_v21  ;;  %986 = vmatprep.mubr.bf16.mxu1 %v269_v51  ;;  %v270_v56 = vcombine.high %v266_v53, %v266_v53  ;;  %v1507_v16 = vld [vmem:[%s1903_s1 + $0x188] sm:$0xff]   ;;  %v1510_v19 = vld [vmem:[%s1903_s1 + $0x100] sm:$0xff]   ;;  %v1512_v21 = vld [vmem:[%s1903_s1 + $0x278] sm:$0xff]  }
  0x17   :  { %v1511_v22 = vld [vmem:[%s1903_s1 + $0x180] sm:$0xff]   ;;  %v307_v23 = vrot.slane %v286_v17, %v1659_v35  ;;  %v1513_v24 = vld [vmem:[%s1903_s1 + $0x2f8] sm:$0xff]   ;;  %v1517_v30 = vld [vmem:[%s1903_s1 + $0x2f0] sm:$0xff]  }
  0x18   :  { %1311 = vmatpush3.bf16.msra.mxu0 %v1468_v25  ;;  %v1514_v25 = vld [vmem:[%s1903_s1 + $0x238] sm:$0xff]   ;;  %v1523_v38 = vld [vmem:[%s1903_s1 + $0x2a8] sm:$0xff]   ;;  %v1525_v39 = vld [vmem:[%s1903_s1 + $0x2e0] sm:$0xff]  }
  0x19   :  { %1333 = vmatpush3.bf16.msra.mxu1 %v1469_v26  ;;  %1312 = vmatprep.subr.bf16.mxu0 %v1470_v27  ;;  %v268_v26 = vcombine.high %v252_v20, %v252_v20  ;;  %v1516_v27 = vld [vmem:[%s1903_s1 + $0x270] sm:$0xff]   ;;  %v309_v29 = vcombine.high %v307_v23, %v307_v23  ;;  %v1526_v40 = vld [vmem:[%s1903_s1 + $0x220] sm:$0xff]   ;;  %v1529_v43 = vld [vmem:[%s1903_s1 + $0x2d8] sm:$0xff]  }
  0x1a   :  { %1334 = vmatprep.subr.bf16.mxu1 %v1471_v28  ;;  %v1515_v28 = vld [vmem:[%s1903_s1 + $0x2b8] sm:$0xff]   ;;  %v1532_v45 = vld [vmem:[%s1903_s1 + $0x250] sm:$0xff]   ;;  %v1537_v51 = vld [vmem:[%s1903_s1 + $0x2c8] sm:$0xff]  }
  0x1b   :  { %v1531_v46 = vld [vmem:[%s1903_s1 + $0x298] sm:$0xff]   ;;  %v1534_v48 = vld [vmem:[%s1903_s1 + $0x210] sm:$0xff]  }
  0x1c   :  { %1313 = vmatpush3.bf16.msra.mxu0 %v1472_v31  ;;  %v1518_v31 = vld [vmem:[%s1903_s1 + $0x230] sm:$0xff]  }
  0x1d   :  { %1335 = vmatpush3.bf16.msra.mxu1 %v1473_v32  ;;  %1314 = vmatprep.subr.bf16.mxu0 %v1474_v33  ;;  %v1520_v32 = vld [vmem:[%s1903_s1 + $0x268] sm:$0xff]   ;;  %v1519_v33 = vld [vmem:[%s1903_s1 + $0x2b0] sm:$0xff]  }
  0x1e   :  { %1336 = vmatprep.subr.bf16.mxu1 %v1475_v34  ;;  %v1521_v34 = vld [vmem:[%s1903_s1 + $0x2e8] sm:$0xff]  }
  0x20   :  { %1315 = vmatpush3.bf16.msra.mxu0 %v1476_v36  ;;  %v1522_v36 = vld [vmem:[%s1903_s1 + $0x228] sm:$0xff]  }
  0x21   :  { %1337 = vmatpush3.bf16.msra.mxu1 %v1477_v37  ;;  %1344 = vmatprep.subr.bf16.mxu0 %v1480_v41  ;;  %v1524_v37 = vld [vmem:[%s1903_s1 + $0x260] sm:$0xff]   ;;  %v1528_v41 = vld [vmem:[%s1903_s1 + $0x258] sm:$0xff]  }
  0x22   :  { %1366 = vmatprep.subr.bf16.mxu1 %v1481_v42  ;;  %v1527_v42 = vld [vmem:[%s1903_s1 + $0x2a0] sm:$0xff]  }
  0x23   :  { %947 = vmatmul.mubr.bf16.vlgmr.msra.gmra.mxu0 %v245_v44  ;;  %v1530_v44 = vld [vmem:[%s1903_s1 + $0x218] sm:$0xff]  }
  0x24   :  { %1345 = vmatpush3.bf16.msra.mxu0 %v1482_v47  ;;  %987 = vmatmul.mubr.bf16.vlgmr.msra.gmra.mxu1 %v267_v49  ;;  %v1533_v47 = vld [vmem:[%s1903_s1 + $0x2d0] sm:$0xff]   ;;  %v1536_v49 = vld [vmem:[%s1903_s1 + $0x248] sm:$0xff]  }
  0x25   :  { %1346 = vmatprep.subr.bf16.mxu0 %v1484_v50  ;;  %1367 = vmatpush3.bf16.msra.mxu1 %v1483_v52  ;;  %v1535_v50 = vld [vmem:[%s1903_s1 + $0x290] sm:$0xff]   ;;  %v1538_v52 = vld [vmem:[%s1903_s1 + $0x208] sm:$0xff]  }
  0x26   :  { %1026 = vmatprep.mubr.bf16.mxu0 %v266_v53  ;;  %1368 = vmatprep.subr.bf16.mxu1 %v1485_v54  ;;  %v1540_v53 = vld [vmem:[%s1903_s1 + $0x240] sm:$0xff]   ;;  %v1539_v54 = vld [vmem:[%s1903_s1 + $0x288] sm:$0xff]  }
  0x27   :  { %1066 = vmatprep.mubr.bf16.mxu1 %v270_v56  ;;  %v1542_v56 = vld [vmem:[%s1903_s1 + $0x200] sm:$0xff]  }
  0x28   :  { %1347 = vmatpush3.bf16.msra.mxu0 %v1486_v55  ;;  %v1541_v55 = vld [vmem:[%s1903_s1 + $0x2c0] sm:$0xff]  }
  0x29   :  { %1348 = vmatprep.subr.bf16.mxu0 %v1488_v57  ;;  %1369 = vmatpush3.bf16.msra.mxu1 %v1487_v58  ;;  %v293_v57 = vrot.slane %v1761_v12, %v1659_v35  ;;  %v1543_v58 = vld [vmem:[%s1903_s1 + $0x280] sm:$0xff]  }
  0x2a   :  { %1370 = vmatprep.subr.bf16.mxu1 %v1489_v59  ;;  %v271_v59 = vcombine.high %v1739_v5, %v1739_v5 }
  0x2c   :  { %1349 = vmatpush3.bf16.msra.mxu0 %v1490_v60  ;;  %v1544_v60 = vld [vmem:[%s1903_s1 + $0x308] sm:$0xff]  }
  0x2d   :  { %1350 = vmatprep.subr.bf16.mxu0 %v1492_v61  ;;  %1371 = vmatpush3.bf16.msra.mxu1 %v1491_v62  ;;  %v308_v61 = vcombine.high %v293_v57, %v293_v57  ;;  %v1547_v62 = vmov 0.0  }
  0x2e   :  { %1372 = vmatprep.subr.bf16.mxu1 %v1493_v63  ;;  %v285_v63 = vrot.slane %v271_v59, %v1659_v35 }
  0x30   :  { %1351 = vmatpush3.bf16.msra.mxu0 %v1494_v0  ;;  %v1545_v0 = vld [vmem:[%s1903_s1 + $0x300] sm:$0xff]  }
  0x31   :  { %1352 = vmatprep.subr.bf16.mxu0 %v1496_v1  ;;  %1373 = vmatpush3.bf16.msra.mxu1 %v1495_v2  ;;  %v300_v1 = vrot.slane %v285_v63, %v1659_v35 }
  0x32   :  { %1374 = vmatprep.subr.bf16.mxu1 %v1497_v3 }
  0x34   :  { %1353 = vmatpush3.bf16.msra.mxu0 %v1498_v4 }
  0x35   :  { %1354 = vmatprep.subr.bf16.mxu0 %v1500_v6  ;;  %1375 = vmatpush3.bf16.msra.mxu1 %v1499_v7 }
  0x36   :  { %1376 = vmatprep.subr.bf16.mxu1 %v1501_v8 }
  0x38   :  { %1355 = vmatpush3.bf16.msra.mxu0 %v1502_v9 }
  0x39   :  { %1356 = vmatprep.subr.bf16.mxu0 %v1504_v10  ;;  %1377 = vmatpush3.bf16.msra.mxu1 %v1503_v11 }
  0x3a   :  { %1378 = vmatprep.subr.bf16.mxu1 %v1505_v13 }
  0x3c   :  { %1357 = vmatpush3.bf16.msra.mxu0 %v1506_v14 }
  0x3d   :  { %1358 = vmatprep.subr.bf16.mxu0 %v1508_v15  ;;  %1379 = vmatpush3.bf16.msra.mxu1 %v1507_v16 }
  0x3e   :  { %1380 = vmatprep.subr.bf16.mxu1 %v1509_v18  ;;  %v1200_v18 = vld [vmem:[%s1905_s2] ss:$0 sm:$0xff] }
  0x40   :  { %1359 = vmatpush3.bf16.msra.mxu0 %v1510_v19 }
  0x41   :  { %1388 = vmatprep.subr.bf16.mxu0 %v1512_v21  ;;  %1381 = vmatpush3.bf16.msra.mxu1 %v1511_v22 }
  0x42   :  { %1410 = vmatprep.subr.bf16.mxu1 %v1513_v24 }
  0x43   :  { %1027 = vmatmul.mubr.bf16.vlgmr.msra.gmra.mxu0 %v252_v20 }
  0x44   :  { %1389 = vmatpush3.bf16.msra.mxu0 %v1514_v25  ;;  %1106 = vmatprep.mubr.bf16.mxu0 %v307_v23 }
  0x45   :  { %1067 = vmatmul.mubr.bf16.vlgmr.msra.gmra.mxu1 %v268_v26  ;;  %1390 = vmatprep.subr.bf16.mxu0 %v1516_v27 }
  0x46   :  { %1411 = vmatpush3.bf16.msra.mxu1 %v1515_v28  ;;  %1146 = vmatprep.mubr.bf16.mxu1 %v309_v29 }
  0x47   :  { %1412 = vmatprep.subr.bf16.mxu1 %v1517_v30 }
  0x48   :  { %1391 = vmatpush3.bf16.msra.mxu0 %v1518_v31 }
  0x49   :  { %1392 = vmatprep.subr.bf16.mxu0 %v1520_v32 }
  0x4a   :  { %1413 = vmatpush3.bf16.msra.mxu1 %v1519_v33 }
  0x4b   :  { %1414 = vmatprep.subr.bf16.mxu1 %v1521_v34 }
  0x4c   :  { %1393 = vmatpush3.bf16.msra.mxu0 %v1522_v36 }
  0x4d   :  { %1394 = vmatprep.subr.bf16.mxu0 %v1524_v37 }
  0x4e   :  { %1415 = vmatpush3.bf16.msra.mxu1 %v1523_v38 }
  0x4f   :  { %1416 = vmatprep.subr.bf16.mxu1 %v1525_v39 }
  0x50   :  { %1395 = vmatpush3.bf16.msra.mxu0 %v1526_v40 }
  0x51   :  { %1396 = vmatprep.subr.bf16.mxu0 %v1528_v41 }
  0x52   :  { %1417 = vmatpush3.bf16.msra.mxu1 %v1527_v42 }
  0x53   :  { %1418 = vmatprep.subr.bf16.mxu1 %v1529_v43 }
  0x54   :  { %1397 = vmatpush3.bf16.msra.mxu0 %v1530_v44 }
  0x55   :  { %1398 = vmatprep.subr.bf16.mxu0 %v1532_v45 }
  0x56   :  { %1419 = vmatpush3.bf16.msra.mxu1 %v1531_v46 }
  0x57   :  { %1420 = vmatprep.subr.bf16.mxu1 %v1533_v47 }
  0x58   :  { %1399 = vmatpush3.bf16.msra.mxu0 %v1534_v48 }
  0x59   :  { %1400 = vmatprep.subr.bf16.mxu0 %v1536_v49 }
  0x5a   :  { %1421 = vmatpush3.bf16.msra.mxu1 %v1535_v50 }
  0x5b   :  { %1422 = vmatprep.subr.bf16.mxu1 %v1537_v51 }
  0x5c   :  { %1401 = vmatpush3.bf16.msra.mxu0 %v1538_v52 }
  0x5d   :  { %1402 = vmatprep.subr.bf16.mxu0 %v1540_v53 }
  0x5e   :  { %1423 = vmatpush3.bf16.msra.mxu1 %v1539_v54 }
  0x5f   :  { %1424 = vmatprep.subr.bf16.mxu1 %v1541_v55 }
  0x60   :  { %1403 = vmatpush3.bf16.msra.mxu0 %v1542_v56 }
  0x61   :  { %1435 = vmatprep.subr.bf16.mxu0 %v1547_v62 }
  0x62   :  { %1425 = vmatpush3.bf16.msra.mxu1 %v1543_v58 }
  0x63   :  { %1107 = vmatmul.mubr.bf16.vlgmr.msra.gmra.mxu0 %v293_v57 }
  0x64   :  { %1436 = vmatpush3.bf16.msra.mxu0 %v1544_v60  ;;  %1439 = vmatprep.mubr.msk.bf16.mxu0 %vm1548_vm0, %v1547_v62 }
  0x65   :  { %1147 = vmatmul.mubr.bf16.vlgmr.msra.gmra.mxu1 %v308_v61  ;;  %1437 = vmatprep.subr.bf16.mxu0 %v1547_v62 }
  0x68   :  { %1438 = vmatpush3.bf16.msra.mxu0 %v1545_v0 }
  0x6b   :  { %1440 = vmatmul.mubr.msk.bf16.vlgmr.msra.gmra.mxu0 %vm910_vm1, %v300_v1 }
  0xe3   :  { %v1316_v2 = vpop.f32.mrf.mxu0 }
  0xe4   :  { %v1338_v3 = vpop.f32.mrf.mxu1 }
  0xe5   :  { %v1317_v4 = vpop.f32.mrf.mxu0 }
  0xe6   :  { %v1339_v5 = vpop.f32.mrf.mxu1  ;;  %v1318_v35 = vadd.f32 %v1317_v4, %v1316_v2 }
  0xe7   :  { %v1319_v6 = vpop.f32.mrf.mxu0  ;;  %v1340_v20 = vadd.f32 %v1339_v5, %v1338_v3 }
  0xe8   :  { %v1341_v7 = vpop.f32.mrf.mxu1  ;;  %v949_v19 = vadd.f32 %v1318_v35, %v1200_v18 }
  0xe9   :  { %v1320_v8 = vpop.f32.mrf.mxu0 }
  0xea   :  { %v1342_v9 = vpop.f32.mrf.mxu1  ;;  %v989_v22 = vadd.f32 %v1340_v20, %v949_v19 }
 0x103   :  { %v1360_v10 = vpop.f32.mrf.mxu0 }
 0x105   :  { %v1382_v11 = vpop.f32.mrf.mxu1  ;;  %v1361_v12 = vpop.f32.mrf.mxu0 }
 0x106   :  { %v1362_v21 = vadd.f32 %v1361_v12, %v1360_v10 }
 0x107   :  { %v1383_v13 = vpop.f32.mrf.mxu1  ;;  %v1363_v14 = vpop.f32.mrf.mxu0 }
 0x108   :  { %v1029_v23 = vadd.f32 %v1362_v21, %v989_v22  ;;  %v1384_v24 = vadd.f32 %v1383_v13, %v1382_v11 }
 0x109   :  { %v1385_v15 = vpop.f32.mrf.mxu1  ;;  %v1364_v16 = vpop.f32.mrf.mxu0 }
 0x10a   :  { %v1069_v28 = vadd.f32 %v1384_v24, %v1029_v23 }
 0x10b   :  { %v1386_v17 = vpop.f32.mrf.mxu1 }
 0x123   :  { %v1404_v25 = vpop.f32.mrf.mxu0 }
 0x125   :  { %v1426_v26 = vpop.f32.mrf.mxu1  ;;  %v1405_v27 = vpop.f32.mrf.mxu0 }
 0x126   :  { %v1406_v29 = vadd.f32 %v1405_v27, %v1404_v25 }
 0x127   :  { %v1427_v30 = vpop.f32.mrf.mxu1  ;;  %v1407_v31 = vpop.f32.mrf.mxu0 }
 0x128   :  { %v1109_v32 = vadd.f32 %v1406_v29, %v1069_v28  ;;  %v1428_v33 = vadd.f32 %v1427_v30, %v1426_v26 }
 0x129   :  { %v1429_v34 = vpop.f32.mrf.mxu1  ;;  %v1408_v36 = vpop.f32.mrf.mxu0 }
 0x12a   :  { %v1149_v37 = vadd.f32 %v1428_v33, %v1109_v32 }
 0x12b   :  { %v1430_v38 = vpop.f32.mrf.mxu1  ;;  %v1188_v39 = vpop.f32.mrf.mxu0 }
 0x12c   :  { %v1189_v40 = vadd.f32 %v1188_v39, %v1149_v37 }
 0x12d   :  { %v1441_v41 = vpop.f32.mrf.mxu0 }
 0x12e   :  { %1195 = vst.msk [vmem:[%s1906_s3] sm:$0x3] %vm1194_vm2, %v1189_v40 }
 0x12f   :  { %v1191_v42 = vpop.f32.mrf.mxu0 }
 0x131   :  { %v1442_v43 = vpop.f32.mrf.mxu0 }

// kernel: autoencoder_forward.10
= control target key start
LH: loop header
LB: loop body
LE: loop exit
PB: predicated region body
PF: predicated region fallthrough
CT: control target
= control target key end

     0   :  { %v1646_v0 = vmov 0   ;;  %v1647_v2 = vmov 0.0   ;;  %vm1648_vm0 = vmmov 0   ;;  %vm634_vm1 = vcmask 261120   ;;  %s2426_s1 = inlined_call_operand.vmem [shape: bf16[288,16], index: 1, kind: input, shape index: {}]   ;;  %s2427_s0 = inlined_call_operand.vmem [shape: bf16[392,288], index: 0, kind: input, shape index: {}]   ;;  %s2428_s2 = inlined_call_operand.vmem [shape: f32[1,16], index: 2, kind: input, shape index: {}]   ;;  %s2429_s3 = inlined_call_operand.vmem [shape: f32[392,16], index: 3, kind: output, shape index: {}]  }
   0x1   :  { %710 = vmatprep.subr.bf16.mxu0 %v1646_v0  ;;  %v1530_v1 = vld [vmem:[%s2426_s1 + $0x38] sm:$0xff]   ;;  %1423 = vmatprep.subr.bf16.mxu1 %v1647_v2  ;;  %v1531_v3 = vld [vmem:[%s2426_s1 + $0x30] sm:$0xff]   ;;  %v1532_v4 = vld [vmem:[%s2426_s1 + $0x28] sm:$0xff]   ;;  %vm1223_vm2 = vcmask 130048  }
   0x2   :  { %1427 = vmatprep.mubr.msk.bf16.mxu1 %vm1648_vm0, %v1647_v2  ;;  %711 = vmatpush1.bf16.msra.mxu0 %v1530_v1  ;;  %v1533_v5 = vld [vmem:[%s2426_s1 + $0x20] sm:$0xff]   ;;  %v1543_v6 = vld [vmem:[%s2426_s1 + $0x88] sm:$0xff]   ;;  %v1534_v7 = vld [vmem:[%s2426_s1 + $0x18] sm:$0xff]  }
   0x3   :  { %712 = vmatprep.subr.bf16.mxu0 %v1646_v0  ;;  %1424 = vmatpush3.bf16.msra.mxu1 %v1543_v6  ;;  %v1545_v8 = vld [vmem:[%s2426_s1 + $0x80] sm:$0xff]   ;;  %v1535_v9 = vld [vmem:[%s2426_s1 + $0x10] sm:$0xff]   ;;  %v1536_v12 = vld [vmem:[%s2426_s1 + $0x8] sm:$0xff]  }
   0x4   :  { %1425 = vmatprep.subr.bf16.mxu1 %v1647_v2  ;;  %v1547_v10 = vld [vmem:[%s2427_s0 + $0x8] ss:$12 sps:$4 sm:$0xff]   ;;  %v1551_v11 = vld [vmem:[%s2427_s0 + $0x4] ss:$12 sps:$4 sm:$0xff]   ;;  %v1552_v14 = vld [vmem:[%s2427_s0 + $0x20] ss:$12 sps:$4 sm:$0xff]  }
   0x5   :  { %742 = vmatprep.mubr.bf16.mxu0 %v1551_v11  ;;  %v1537_v13 = vld [vmem:[%s2426_s1] sm:$0xff]   ;;  %v1538_v15 = vld [vmem:[%s2426_s1 + $0x78] sm:$0xff]   ;;  %v1539_v16 = vld [vmem:[%s2426_s1 + $0x70] sm:$0xff]  }
   0x6   :  { %713 = vmatpush1.bf16.msra.mxu0 %v1531_v3  ;;  %v1556_v17 = vld [vmem:[%s2427_s0 + $0x38] ss:$12 sps:$4 sm:$0xff]   ;;  %v1540_v18 = vld [vmem:[%s2426_s1 + $0x68] sm:$0xff]   ;;  %v1560_v20 = vld [vmem:[%s2427_s0 + $0x50] ss:$12 sps:$4 sm:$0xff]  }
   0x7   :  { %714 = vmatprep.subr.bf16.mxu0 %v1646_v0  ;;  %1426 = vmatpush3.bf16.msra.mxu1 %v1545_v8  ;;  %v1541_v19 = vld [vmem:[%s2426_s1 + $0x60] sm:$0xff]   ;;  %v1542_v21 = vld [vmem:[%s2426_s1 + $0x58] sm:$0xff]   ;;  %v1544_v22 = vld [vmem:[%s2426_s1 + $0x50] sm:$0xff]  }
   0x8   :  { %v1564_v23 = vld [vmem:[%s2427_s0 + $0x68] ss:$12 sps:$4 sm:$0xff]   ;;  %v1548_v25 = vld [vmem:[%s2426_s1 + $0x40] sm:$0xff]   ;;  %v1576_v32 = vld [vmem:[%s2427_s0 + $0xb0] ss:$12 sps:$4 sm:$0xff]  }
   0x9   :  { %v1546_v24 = vld [vmem:[%s2426_s1 + $0x48] sm:$0xff]   ;;  %v1572_v29 = vld [vmem:[%s2427_s0 + $0x98] ss:$12 sps:$4 sm:$0xff]   ;;  %v1557_v31 = vld [vmem:[%s2427_s0 + $0x34] ss:$12 sps:$4 sm:$0xff]  }
   0xa   :  { %715 = vmatpush1.bf16.msra.mxu0 %v1532_v4  ;;  %1428 = vmatmul.mubr.msk.bf16.vlgmr.msra.gmra.mxu1 %vm634_vm1, %v1547_v10  ;;  %v1568_v26 = vld [vmem:[%s2427_s0 + $0x80] ss:$12 sps:$4 sm:$0xff]   ;;  %v1553_v28 = vld [vmem:[%s2427_s0 + $0x1c] ss:$12 sps:$4 sm:$0xff]   ;;  %v1555_v30 = vld [vmem:[%s2427_s0 + $0x18] ss:$12 sps:$4 sm:$0xff]  }
   0xb   :  { %716 = vmatprep.subr.bf16.mxu0 %v1646_v0  ;;  %1431 = vmatprep.mubr.msk.bf16.mxu1 %vm1648_vm0, %v1647_v2  ;;  %v1549_v27 = vld [vmem:[%s2427_s0] ss:$12 sps:$4 sm:$0xff]   ;;  %v1559_v33 = vld [vmem:[%s2427_s0 + $0x30] ss:$12 sps:$4 sm:$0xff]   ;;  %v1580_v35 = vld [vmem:[%s2427_s0 + $0xc8] ss:$12 sps:$4 sm:$0xff]  }
   0xc   :  { %v1561_v34 = vld [vmem:[%s2427_s0 + $0x4c] ss:$12 sps:$4 sm:$0xff]   ;;  %v1563_v36 = vld [vmem:[%s2427_s0 + $0x48] ss:$12 sps:$4 sm:$0xff]   ;;  %v1565_v37 = vld [vmem:[%s2427_s0 + $0x64] ss:$12 sps:$4 sm:$0xff]  }
   0xd   :  { %v1584_v38 = vld [vmem:[%s2427_s0 + $0xe0] ss:$12 sps:$4 sm:$0xff]   ;;  %v1569_v40 = vld [vmem:[%s2427_s0 + $0x7c] ss:$12 sps:$4 sm:$0xff]   ;;  %v1588_v41 = vld [vmem:[%s2427_s0 + $0xf8] ss:$12 sps:$4 sm:$0xff]  }
   0xe   :  { %717 = vmatpush1.bf16.msra.mxu0 %v1533_v5  ;;  %v1567_v39 = vld [vmem:[%s2427_s0 + $0x60] ss:$12 sps:$4 sm:$0xff]   ;;  %v1571_v42 = vld [vmem:[%s2427_s0 + $0x78] ss:$12 sps:$4 sm:$0xff]   ;;  %v1592_v44 = vld [vmem:[%s2427_s0 + $0x110] ss:$12 sps:$4 sm:$0xff]  }
   0xf   :  { %718 = vmatprep.subr.bf16.mxu0 %v1646_v0  ;;  %v1573_v43 = vld [vmem:[%s2427_s0 + $0x94] ss:$12 sps:$4 sm:$0xff]   ;;  %v1575_v45 = vld [vmem:[%s2427_s0 + $0x90] ss:$12 sps:$4 sm:$0xff]   ;;  %v1577_v46 = vld [vmem:[%s2427_s0 + $0xac] ss:$12 sps:$4 sm:$0xff]  }
  0x10   :  { %v1596_v47 = vld [vmem:[%s2427_s0 + $0x128] ss:$12 sps:$4 sm:$0xff]   ;;  %v1581_v49 = vld [vmem:[%s2427_s0 + $0xc4] ss:$12 sps:$4 sm:$0xff]   ;;  %v1600_v50 = vld [vmem:[%s2427_s0 + $0x140] ss:$12 sps:$4 sm:$0xff]  }
  0x11   :  { %v1579_v48 = vld [vmem:[%s2427_s0 + $0xa8] ss:$12 sps:$4 sm:$0xff]   ;;  %v1583_v51 = vld [vmem:[%s2427_s0 + $0xc0] ss:$12 sps:$4 sm:$0xff]   ;;  %v1604_v53 = vld [vmem:[%s2427_s0 + $0x158] ss:$12 sps:$4 sm:$0xff]  }
  0x12   :  { %719 = vmatpush1.bf16.msra.mxu0 %v1534_v7  ;;  %1432 = vmatmul.mubr.msk.bf16.gmra.mxu1 %vm634_vm1, %v1552_v14  ;;  %v1585_v52 = vld [vmem:[%s2427_s0 + $0xdc] ss:$12 sps:$4 sm:$0xff]   ;;  %v1587_v54 = vld [vmem:[%s2427_s0 + $0xd8] ss:$12 sps:$4 sm:$0xff]   ;;  %v1589_v55 = vld [vmem:[%s2427_s0 + $0xf4] ss:$12 sps:$4 sm:$0xff]  }
  0x13   :  { %720 = vmatprep.subr.bf16.mxu0 %v1646_v0  ;;  %1435 = vmatprep.mubr.msk.bf16.mxu1 %vm1648_vm0, %v1647_v2  ;;  %v1608_v56 = vld [vmem:[%s2427_s0 + $0x170] ss:$12 sps:$4 sm:$0xff]   ;;  %v1593_v58 = vld [vmem:[%s2427_s0 + $0x10c] ss:$12 sps:$4 sm:$0xff]   ;;  %v1612_v59 = vld [vmem:[%s2427_s0 + $0x188] ss:$12 sps:$4 sm:$0xff]  }
  0x14   :  { %v1591_v57 = vld [vmem:[%s2427_s0 + $0xf0] ss:$12 sps:$4 sm:$0xff]   ;;  %v1595_v60 = vld [vmem:[%s2427_s0 + $0x108] ss:$12 sps:$4 sm:$0xff]   ;;  %v1616_v62 = vld [vmem:[%s2427_s0 + $0x1a0] ss:$12 sps:$4 sm:$0xff]  }
  0x15   :  { %v1597_v61 = vld [vmem:[%s2427_s0 + $0x124] ss:$12 sps:$4 sm:$0xff]   ;;  %v1599_v63 = vld [vmem:[%s2427_s0 + $0x120] ss:$12 sps:$4 sm:$0xff]   ;;  %v1628_v8 = vld [vmem:[%s2427_s0 + $0x1e8] ss:$12 sps:$4 sm:$0xff]  }
  0x16   :  { %721 = vmatpush1.bf16.msra.mxu0 %v1535_v9  ;;  %v1620_v1 = vld [vmem:[%s2427_s0 + $0x1b8] ss:$12 sps:$4 sm:$0xff]   ;;  %v1605_v4 = vld [vmem:[%s2427_s0 + $0x154] ss:$12 sps:$4 sm:$0xff]   ;;  %v1624_v5 = vld [vmem:[%s2427_s0 + $0x1d0] ss:$12 sps:$4 sm:$0xff]  }
  0x17   :  { %722 = vmatprep.subr.bf16.mxu0 %v1646_v0  ;;  %v1603_v3 = vld [vmem:[%s2427_s0 + $0x138] ss:$12 sps:$4 sm:$0xff]   ;;  %v1607_v6 = vld [vmem:[%s2427_s0 + $0x150] ss:$12 sps:$4 sm:$0xff]   ;;  %v1611_v9 = vld [vmem:[%s2427_s0 + $0x168] ss:$12 sps:$4 sm:$0xff]  }
  0x18   :  { %v1609_v7 = vld [vmem:[%s2427_s0 + $0x16c] ss:$12 sps:$4 sm:$0xff]   ;;  %v1613_v10 = vld [vmem:[%s2427_s0 + $0x184] ss:$12 sps:$4 sm:$0xff]  }
  0x19   :  { %v1632_v11 = vld [vmem:[%s2427_s0 + $0x200] ss:$12 sps:$4 sm:$0xff]   ;;  %v1636_v14 = vld [vmem:[%s2427_s0 + $0x218] ss:$12 sps:$4 sm:$0xff]  }
  0x1a   :  { %723 = vmatpush1.bf16.msra.mxu0 %v1536_v12  ;;  %1436 = vmatmul.mubr.msk.bf16.gmra.mxu1 %vm634_vm1, %v1556_v17  ;;  %v1615_v12 = vld [vmem:[%s2427_s0 + $0x180] ss:$12 sps:$4 sm:$0xff]   ;;  %v1640_v17 = vld [vmem:[%s2427_s0 + $0x230] ss:$12 sps:$4 sm:$0xff]  }
  0x1b   :  { %724 = vmatprep.subr.bf16.mxu0 %v1646_v0  ;;  %1439 = vmatprep.mubr.msk.bf16.mxu1 %vm1648_vm0, %v1647_v2 }
  0x1e   :  { %725 = vmatpush1.bf16.msra.mxu0 %v1537_v13  ;;  %v1617_v13 = vld [vmem:[%s2427_s0 + $0x19c] ss:$12 sps:$4 sm:$0xff]  }
  0x1f   :  { %726 = vmatprep.subr.bf16.mxu0 %v1646_v0 }
  0x22   :  { %727 = vmatpush2.bf16.msra.mxu0 %v1538_v15  ;;  %1440 = vmatmul.mubr.msk.bf16.gmra.mxu1 %vm634_vm1, %v1560_v20  ;;  %v1619_v15 = vld [vmem:[%s2427_s0 + $0x198] ss:$12 sps:$4 sm:$0xff]   ;;  %v1644_v20 = vld [vmem:[%s2427_s0 + $0x248] ss:$0 sps:$4 sm:$0xff]  }
  0x23   :  { %728 = vmatprep.subr.bf16.mxu0 %v1646_v0  ;;  %1443 = vmatprep.mubr.msk.bf16.mxu1 %vm1648_vm0, %v1647_v2 }
  0x26   :  { %729 = vmatpush2.bf16.msra.mxu0 %v1539_v16  ;;  %v1621_v16 = vld [vmem:[%s2427_s0 + $0x1b4] ss:$12 sps:$4 sm:$0xff]  }
  0x27   :  { %730 = vmatprep.subr.bf16.mxu0 %v1646_v0 }
  0x2a   :  { %731 = vmatpush2.bf16.msra.mxu0 %v1540_v18  ;;  %1444 = vmatmul.mubr.msk.bf16.gmra.mxu1 %vm634_vm1, %v1564_v23  ;;  %v1623_v18 = vld [vmem:[%s2427_s0 + $0x1b0] ss:$12 sps:$4 sm:$0xff]  }
  0x2b   :  { %732 = vmatprep.subr.bf16.mxu0 %v1646_v0  ;;  %1447 = vmatprep.mubr.msk.bf16.mxu1 %vm1648_vm0, %v1647_v2 }
  0x2e   :  { %733 = vmatpush2.bf16.msra.mxu0 %v1541_v19  ;;  %v1625_v19 = vld [vmem:[%s2427_s0 + $0x1cc] ss:$12 sps:$4 sm:$0xff]  }
  0x2f   :  { %734 = vmatprep.subr.bf16.mxu0 %v1646_v0 }
  0x32   :  { %735 = vmatpush2.bf16.msra.mxu0 %v1542_v21  ;;  %1448 = vmatmul.mubr.msk.bf16.gmra.mxu1 %vm634_vm1, %v1568_v26  ;;  %v1627_v21 = vld [vmem:[%s2427_s0 + $0x1c8] ss:$12 sps:$4 sm:$0xff]   ;;  %v1631_v26 = vld [vmem:[%s2427_s0 + $0x1e0] ss:$12 sps:$4 sm:$0xff]  }
  0x33   :  { %736 = vmatprep.subr.bf16.mxu0 %v1646_v0  ;;  %1451 = vmatprep.mubr.msk.bf16.mxu1 %vm1648_vm0, %v1647_v2 }
  0x36   :  { %737 = vmatpush2.bf16.msra.mxu0 %v1544_v22  ;;  %v1629_v22 = vld [vmem:[%s2427_s0 + $0x1e4] ss:$12 sps:$4 sm:$0xff]  }
  0x37   :  { %738 = vmatprep.subr.bf16.mxu0 %v1646_v0 }
  0x3a   :  { %739 = vmatpush2.bf16.msra.mxu0 %v1546_v24  ;;  %1452 = vmatmul.mubr.msk.bf16.gmra.mxu1 %vm634_vm1, %v1572_v29 }
  0x3b   :  { %740 = vmatprep.subr.bf16.mxu0 %v1646_v0  ;;  %1455 = vmatprep.mubr.msk.bf16.mxu1 %vm1648_vm0, %v1647_v2  ;;  %v1601_v0 = vld [vmem:[%s2427_s0 + $0x13c] ss:$12 sps:$4 sm:$0xff]  }
  0x3e   :  { %741 = vmatpush2.bf16.msra.mxu0 %v1548_v25 }
  0x41   :  { %743 = vmatmul.mubr.bf16.vlgmr.msra.gmra.mxu0 %v1549_v27  ;;  %v1633_v27 = vld [vmem:[%s2427_s0 + $0x1fc] ss:$12 sps:$4 sm:$0xff]  }
  0x42   :  { %750 = vmatprep.mubr.bf16.mxu0 %v1553_v28  ;;  %1456 = vmatmul.mubr.msk.bf16.gmra.mxu1 %vm634_vm1, %v1576_v32  ;;  %v1635_v32 = vld [vmem:[%s2427_s0 + $0x1f8] ss:$12 sps:$4 sm:$0xff]  }
  0x43   :  { %1459 = vmatprep.mubr.msk.bf16.mxu1 %vm1648_vm0, %v1647_v2 }
  0x49   :  { %751 = vmatmul.mubr.bf16.gmra.mxu0 %v1555_v30 }
  0x4a   :  { %758 = vmatprep.mubr.bf16.mxu0 %v1557_v31  ;;  %1460 = vmatmul.mubr.msk.bf16.gmra.mxu1 %vm634_vm1, %v1580_v35 }
  0x4b   :  { %1463 = vmatprep.mubr.msk.bf16.mxu1 %vm1648_vm0, %v1647_v2 }
  0x51   :  { %759 = vmatmul.mubr.bf16.gmra.mxu0 %v1559_v33  ;;  %v1637_v33 = vld [vmem:[%s2427_s0 + $0x214] ss:$12 sps:$4 sm:$0xff]  }
  0x52   :  { %766 = vmatprep.mubr.bf16.mxu0 %v1561_v34  ;;  %1464 = vmatmul.mubr.msk.bf16.gmra.mxu1 %vm634_vm1, %v1584_v38  ;;  %v1639_v38 = vld [vmem:[%s2427_s0 + $0x210] ss:$12 sps:$4 sm:$0xff]  }
  0x53   :  { %1467 = vmatprep.mubr.msk.bf16.mxu1 %vm1648_vm0, %v1647_v2 }
  0x59   :  { %767 = vmatmul.mubr.bf16.gmra.mxu0 %v1563_v36 }
  0x5a   :  { %774 = vmatprep.mubr.bf16.mxu0 %v1565_v37  ;;  %1468 = vmatmul.mubr.msk.bf16.gmra.mxu1 %vm634_vm1, %v1588_v41 }
  0x5b   :  { %1471 = vmatprep.mubr.msk.bf16.mxu1 %vm1648_vm0, %v1647_v2 }
  0x61   :  { %775 = vmatmul.mubr.bf16.gmra.mxu0 %v1567_v39  ;;  %v1641_v39 = vld [vmem:[%s2427_s0 + $0x22c] ss:$12 sps:$4 sm:$0xff]  }
  0x62   :  { %782 = vmatprep.mubr.bf16.mxu0 %v1569_v40  ;;  %1472 = vmatmul.mubr.msk.bf16.gmra.mxu1 %vm634_vm1, %v1592_v44 }
  0x63   :  { %1475 = vmatprep.mubr.msk.bf16.mxu1 %vm1648_vm0, %v1647_v2 }
  0x69   :  { %783 = vmatmul.mubr.bf16.gmra.mxu0 %v1571_v42 }
  0x6a   :  { %790 = vmatprep.mubr.bf16.mxu0 %v1573_v43  ;;  %1476 = vmatmul.mubr.msk.bf16.gmra.mxu1 %vm634_vm1, %v1596_v47  ;;  %v111_v43 = vld [vmem:[%s2427_s0 + $0x240] sm:$0xff] }
  0x6b   :  { %1479 = vmatprep.mubr.msk.bf16.mxu1 %vm1648_vm0, %v1647_v2 }
  0x71   :  { %791 = vmatmul.mubr.bf16.gmra.mxu0 %v1575_v45  ;;  %v1643_v45 = vld [vmem:[%s2427_s0 + $0x228] ss:$12 sps:$4 sm:$0xff]  }
  0x72   :  { %798 = vmatprep.mubr.bf16.mxu0 %v1577_v46  ;;  %1480 = vmatmul.mubr.msk.bf16.gmra.mxu1 %vm634_vm1, %v1600_v50  ;;  %v1351_v46 = vcombine.high %v111_v43, %v111_v43 }
  0x73   :  { %1483 = vmatprep.mubr.msk.bf16.mxu1 %vm1648_vm0, %v1647_v2 }
  0x79   :  { %799 = vmatmul.mubr.bf16.gmra.mxu0 %v1579_v48 }
  0x7a   :  { %806 = vmatprep.mubr.bf16.mxu0 %v1581_v49  ;;  %1484 = vmatmul.mubr.msk.bf16.gmra.mxu1 %vm634_vm1, %v1604_v53  ;;  %v2057_v53 = vld [vmem:[%s2428_s2] ss:$0 sm:$0xff] }
  0x7b   :  { %1487 = vmatprep.mubr.msk.bf16.mxu1 %vm1648_vm0, %v1647_v2 }
  0x81   :  { %807 = vmatmul.mubr.bf16.gmra.mxu0 %v1583_v51  ;;  %v1350_v51 = vcombine.low %v111_v43, %v111_v43 }
  0x82   :  { %814 = vmatprep.mubr.bf16.mxu0 %v1585_v52  ;;  %1488 = vmatmul.mubr.msk.bf16.gmra.mxu1 %vm634_vm1, %v1608_v56 }
  0x83   :  { %1491 = vmatprep.mubr.msk.bf16.mxu1 %vm1648_vm0, %v1647_v2 }
  0x89   :  { %815 = vmatmul.mubr.bf16.gmra.mxu0 %v1587_v54 }
  0x8a   :  { %822 = vmatprep.mubr.bf16.mxu0 %v1589_v55  ;;  %1492 = vmatmul.mubr.msk.bf16.gmra.mxu1 %vm634_vm1, %v1612_v59 }
  0x8b   :  { %1495 = vmatprep.mubr.msk.bf16.mxu1 %vm1648_vm0, %v1647_v2 }
  0x91   :  { %823 = vmatmul.mubr.bf16.gmra.mxu0 %v1591_v57 }
  0x92   :  { %830 = vmatprep.mubr.bf16.mxu0 %v1593_v58  ;;  %1496 = vmatmul.mubr.msk.bf16.gmra.mxu1 %vm634_vm1, %v1616_v62 }
  0x93   :  { %1499 = vmatprep.mubr.msk.bf16.mxu1 %vm1648_vm0, %v1647_v2 }
  0x99   :  { %831 = vmatmul.mubr.bf16.gmra.mxu0 %v1595_v60 }
  0x9a   :  { %838 = vmatprep.mubr.bf16.mxu0 %v1597_v61  ;;  %1500 = vmatmul.mubr.msk.bf16.gmra.mxu1 %vm634_vm1, %v1620_v1 }
  0x9b   :  { %1503 = vmatprep.mubr.msk.bf16.mxu1 %vm1648_vm0, %v1647_v2 }
  0xa1   :  { %839 = vmatmul.mubr.bf16.gmra.mxu0 %v1599_v63 }
  0xa2   :  { %846 = vmatprep.mubr.bf16.mxu0 %v1601_v0  ;;  %1504 = vmatmul.mubr.msk.bf16.gmra.mxu1 %vm634_vm1, %v1624_v5 }
  0xa3   :  { %1507 = vmatprep.mubr.msk.bf16.mxu1 %vm1648_vm0, %v1647_v2 }
  0xa9   :  { %847 = vmatmul.mubr.bf16.gmra.mxu0 %v1603_v3 }
  0xaa   :  { %854 = vmatprep.mubr.bf16.mxu0 %v1605_v4  ;;  %1508 = vmatmul.mubr.msk.bf16.gmra.mxu1 %vm634_vm1, %v1628_v8 }
  0xab   :  { %1511 = vmatprep.mubr.msk.bf16.mxu1 %vm1648_vm0, %v1647_v2 }
  0xb1   :  { %855 = vmatmul.mubr.bf16.gmra.mxu0 %v1607_v6 }
  0xb2   :  { %862 = vmatprep.mubr.bf16.mxu0 %v1609_v7  ;;  %1512 = vmatmul.mubr.msk.bf16.gmra.mxu1 %vm634_vm1, %v1632_v11 }
  0xb3   :  { %1515 = vmatprep.mubr.msk.bf16.mxu1 %vm1648_vm0, %v1647_v2 }
  0xb9   :  { %863 = vmatmul.mubr.bf16.gmra.mxu0 %v1611_v9 }
  0xba   :  { %870 = vmatprep.mubr.bf16.mxu0 %v1613_v10  ;;  %1516 = vmatmul.mubr.msk.bf16.gmra.mxu1 %vm634_vm1, %v1636_v14 }
  0xbb   :  { %1519 = vmatprep.mubr.msk.bf16.mxu1 %vm1648_vm0, %v1647_v2 }
  0xc1   :  { %871 = vmatmul.mubr.bf16.gmra.mxu0 %v1615_v12 }
  0xc2   :  { %878 = vmatprep.mubr.bf16.mxu0 %v1617_v13  ;;  %1520 = vmatmul.mubr.msk.bf16.gmra.mxu1 %vm634_vm1, %v1640_v17 }
  0xc3   :  { %1523 = vmatprep.mubr.msk.bf16.mxu1 %vm1648_vm0, %v1647_v2 }
  0xc9   :  { %879 = vmatmul.mubr.bf16.gmra.mxu0 %v1619_v15 }
  0xca   :  { %886 = vmatprep.mubr.bf16.mxu0 %v1621_v16  ;;  %v976_v23 = vpop.f32.mrf.mxu1  ;;  %1524 = vmatmul.mubr.msk.bf16.gmra.mxu1 %vm634_vm1, %v1644_v20 }
  0xcc   :  { %v1429_v24 = vpop.f32.mrf.mxu1 }
  0xce   :  { %v979_v2 = vpop.f32.mrf.mxu1 }
  0xd0   :  { %v1430_v25 = vpop.f32.mrf.mxu1 }
  0xd1   :  { %887 = vmatmul.mubr.bf16.gmra.mxu0 %v1623_v18 }
  0xd2   :  { %894 = vmatprep.mubr.bf16.mxu0 %v1625_v19  ;;  %v984_v28 = vpop.f32.mrf.mxu1 }
  0xd4   :  { %v1433_v29 = vpop.f32.mrf.mxu1 }
  0xd6   :  { %v2020_v30 = vpop.f32.mrf.mxu1 }
  0xd8   :  { %v1434_v31 = vpop.f32.mrf.mxu1 }
  0xd9   :  { %895 = vmatmul.mubr.bf16.gmra.mxu0 %v1627_v21 }
  0xda   :  { %902 = vmatprep.mubr.bf16.mxu0 %v1629_v22  ;;  %v2028_v34 = vpop.f32.mrf.mxu1 }
  0xdc   :  { %v1437_v35 = vpop.f32.mrf.mxu1 }
  0xde   :  { %v2030_v36 = vpop.f32.mrf.mxu1 }
  0xe0   :  { %v1438_v37 = vpop.f32.mrf.mxu1 }
  0xe1   :  { %903 = vmatmul.mubr.bf16.gmra.mxu0 %v1631_v26 }
  0xe2   :  { %910 = vmatprep.mubr.bf16.mxu0 %v1633_v27  ;;  %v2038_v40 = vpop.f32.mrf.mxu1 }
  0xe4   :  { %v1441_v41 = vpop.f32.mrf.mxu1 }
  0xe6   :  { %v2040_v42 = vpop.f32.mrf.mxu1 }
  0xe8   :  { %v1442_v44 = vpop.f32.mrf.mxu1 }
  0xe9   :  { %911 = vmatmul.mubr.bf16.gmra.mxu0 %v1635_v32 }
  0xea   :  { %918 = vmatprep.mubr.bf16.mxu0 %v1637_v33  ;;  %v2048_v47 = vpop.f32.mrf.mxu1 }
  0xec   :  { %v1445_v48 = vpop.f32.mrf.mxu1 }
  0xee   :  { %v2050_v49 = vpop.f32.mrf.mxu1 }
  0xf0   :  { %v1446_v50 = vpop.f32.mrf.mxu1 }
  0xf1   :  { %919 = vmatmul.mubr.bf16.gmra.mxu0 %v1639_v38 }
  0xf2   :  { %926 = vmatprep.mubr.bf16.mxu0 %v1641_v39  ;;  %v2052_v52 = vpop.f32.mrf.mxu1 }
  0xf4   :  { %v1449_v54 = vpop.f32.mrf.mxu1 }
  0xf6   :  { %v2060_v57 = vpop.f32.mrf.mxu1 }
  0xf8   :  { %v1450_v60 = vpop.f32.mrf.mxu1 }
  0xf9   :  { %927 = vmatmul.mubr.bf16.gmra.mxu0 %v1643_v45 }
  0xfa   :  { %934 = vmatprep.mubr.bf16.mxu0 %v1351_v46  ;;  %v2063_v0 = vpop.f32.mrf.mxu1 }
  0xfc   :  { %v1453_v4 = vpop.f32.mrf.mxu1 }
  0xfe   :  { %v2070_v8 = vpop.f32.mrf.mxu1 }
 0x100   :  { %v1454_v11 = vpop.f32.mrf.mxu1 }
 0x101   :  { %v744_v55 = vpop.f32.mrf.mxu0  ;;  %935 = vmatmul.mubr.bf16.gmra.mxu0 %v1350_v51 }
 0x102   :  { %v745_v56 = vadd.f32 %v2057_v53, %v744_v55  ;;  %v2077_v15 = vpop.f32.mrf.mxu1 }
 0x103   :  { %v746_v58 = vpop.f32.mrf.mxu0 }
 0x104   :  { %v977_v59 = vadd.f32 %v976_v23, %v745_v56  ;;  %v1457_v18 = vpop.f32.mrf.mxu1 }
 0x105   :  { %v747_v61 = vpop.f32.mrf.mxu0 }
 0x106   :  { %v1174_v62 = vmax.f32 %v977_v59, 0.0  ;;  %v748_v63 = vadd.f32 %v2057_v53, %v747_v61  ;;  %v2085_v22 = vpop.f32.mrf.mxu1 }
 0x107   :  { %v749_v1 = vpop.f32.mrf.mxu0 }
 0x108   :  { %1224 = vst.msk [vmem:[%s2429_s3] sm:$0xff] %vm1223_vm2, %v1174_v62  ;;  %v980_v3 = vadd.f32 %v979_v2, %v748_v63  ;;  %v1458_v2 = vpop.f32.mrf.mxu1 }
 0x109   :  { %v752_v5 = vpop.f32.mrf.mxu0 }
 0x10a   :  { %v1175_v6 = vmax.f32 %v980_v3, 0.0  ;;  %v753_v7 = vadd.f32 %v2057_v53, %v752_v5 }
 0x10b   :  { %v754_v9 = vpop.f32.mrf.mxu0 }
 0x10c   :  { %1225 = vst.msk [vmem:[%s2429_s3 + $0x8] sm:$0xff] %vm1223_vm2, %v1175_v6  ;;  %v985_v10 = vadd.f32 %v984_v28, %v753_v7  ;;  %v2093_v28 = vpop.f32.mrf.mxu1 }
 0x10d   :  { %v755_v12 = vpop.f32.mrf.mxu0 }
 0x10e   :  { %v1176_v13 = vmax.f32 %v985_v10, 0.0  ;;  %v756_v14 = vadd.f32 %v2057_v53, %v755_v12  ;;  %v1461_v31 = vpop.f32.mrf.mxu1 }
 0x10f   :  { %v757_v16 = vpop.f32.mrf.mxu0 }
 0x110   :  { %1226 = vst.msk [vmem:[%s2429_s3 + $0x10] sm:$0xff] %vm1223_vm2, %v1176_v13  ;;  %v988_v17 = vadd.f32 %v2020_v30, %v756_v14  ;;  %v2101_v35 = vpop.f32.mrf.mxu1 }
 0x111   :  { %v760_v19 = vpop.f32.mrf.mxu0 }
 0x112   :  { %v1177_v20 = vmax.f32 %v988_v17, 0.0  ;;  %v761_v21 = vadd.f32 %v2057_v53, %v760_v19  ;;  %v1462_v39 = vpop.f32.mrf.mxu1 }
 0x113   :  { %v762_v23 = vpop.f32.mrf.mxu0 }
 0x114   :  { %1227 = vst.msk [vmem:[%s2429_s3 + $0x18] sm:$0xff] %vm1223_vm2, %v1177_v20  ;;  %v993_v24 = vadd.f32 %v2028_v34, %v761_v21  ;;  %v2109_v44 = vpop.f32.mrf.mxu1 }
 0x115   :  { %v763_v25 = vpop.f32.mrf.mxu0 }
 0x116   :  { %v1178_v26 = vmax.f32 %v993_v24, 0.0  ;;  %v764_v27 = vadd.f32 %v2057_v53, %v763_v25  ;;  %v1465_v48 = vpop.f32.mrf.mxu1 }
 0x117   :  { %v765_v29 = vpop.f32.mrf.mxu0 }
 0x118   :  { %1228 = vst.msk [vmem:[%s2429_s3 + $0x20] sm:$0xff] %vm1223_vm2, %v1178_v26  ;;  %v996_v30 = vadd.f32 %v2030_v36, %v764_v27  ;;  %v2117_v54 = vpop.f32.mrf.mxu1 }
 0x119   :  { %v768_v32 = vpop.f32.mrf.mxu0 }
 0x11a   :  { %v1179_v33 = vmax.f32 %v996_v30, 0.0  ;;  %v769_v34 = vadd.f32 %v2057_v53, %v768_v32  ;;  %v1466_v58 = vpop.f32.mrf.mxu1 }
 0x11b   :  { %v770_v37 = vpop.f32.mrf.mxu0 }
 0x11c   :  { %1229 = vst.msk [vmem:[%s2429_s3 + $0x28] sm:$0xff] %vm1223_vm2, %v1179_v33  ;;  %v1001_v38 = vadd.f32 %v2038_v40, %v769_v34  ;;  %v2125_v61 = vpop.f32.mrf.mxu1 }
 0x11d   :  { %v771_v41 = vpop.f32.mrf.mxu0 }
 0x11e   :  { %v1180_v43 = vmax.f32 %v1001_v38, 0.0  ;;  %v772_v36 = vadd.f32 %v2057_v53, %v771_v41  ;;  %v1469_v1 = vpop.f32.mrf.mxu1 }
 0x11f   :  { %v773_v45 = vpop.f32.mrf.mxu0 }
 0x120   :  { %1230 = vst.msk [vmem:[%s2429_s3 + $0x30] sm:$0xff] %vm1223_vm2, %v1180_v43  ;;  %v1004_v46 = vadd.f32 %v2040_v42, %v772_v36  ;;  %v2133_v5 = vpop.f32.mrf.mxu1 }
 0x121   :  { %v776_v50 = vpop.f32.mrf.mxu0 }
 0x122   :  { %v1181_v51 = vmax.f32 %v1004_v46, 0.0  ;;  %v777_v40 = vadd.f32 %v2057_v53, %v776_v50  ;;  %v1470_v9 = vpop.f32.mrf.mxu1 }
 0x123   :  { %v778_v55 = vpop.f32.mrf.mxu0 }
 0x124   :  { %1231 = vst.msk [vmem:[%s2429_s3 + $0x38] sm:$0xff] %vm1223_vm2, %v1181_v51  ;;  %v1009_v56 = vadd.f32 %v2048_v47, %v777_v40  ;;  %v2141_v12 = vpop.f32.mrf.mxu1 }
 0x125   :  { %v779_v59 = vpop.f32.mrf.mxu0 }
 0x126   :  { %v1182_v60 = vmax.f32 %v1009_v56, 0.0  ;;  %v780_v42 = vadd.f32 %v2057_v53, %v779_v59  ;;  %v1473_v16 = vpop.f32.mrf.mxu1 }
 0x127   :  { %v781_v62 = vpop.f32.mrf.mxu0 }
 0x128   :  { %1232 = vst.msk [vmem:[%s2429_s3 + $0x40] sm:$0xff] %vm1223_vm2, %v1182_v60  ;;  %v1012_v63 = vadd.f32 %v2050_v49, %v780_v42  ;;  %v2149_v19 = vpop.f32.mrf.mxu1 }
 0x129   :  { %v784_v3 = vpop.f32.mrf.mxu0 }
 0x12a   :  { %v1183_v4 = vmax.f32 %v1012_v63, 0.0  ;;  %v785_v47 = vadd.f32 %v2057_v53, %v784_v3  ;;  %v1474_v23 = vpop.f32.mrf.mxu1 }
 0x12b   :  { %v786_v6 = vpop.f32.mrf.mxu0 }
 0x12c   :  { %1233 = vst.msk [vmem:[%s2429_s3 + $0x48] sm:$0xff] %vm1223_vm2, %v1183_v4  ;;  %v1017_v7 = vadd.f32 %v2052_v52, %v785_v47  ;;  %v2157_v25 = vpop.f32.mrf.mxu1 }
 0x12d   :  { %v787_v10 = vpop.f32.mrf.mxu0 }
 0x12e   :  { %v1184_v11 = vmax.f32 %v1017_v7, 0.0  ;;  %v788_v49 = vadd.f32 %v2057_v53, %v787_v10  ;;  %v1477_v29 = vpop.f32.mrf.mxu1 }
 0x12f   :  { %v789_v13 = vpop.f32.mrf.mxu0 }
 0x130   :  { %1234 = vst.msk [vmem:[%s2429_s3 + $0x50] sm:$0xff] %vm1223_vm2, %v1184_v11  ;;  %v1020_v14 = vadd.f32 %v2060_v57, %v788_v49  ;;  %v2165_v32 = vpop.f32.mrf.mxu1 }
 0x131   :  { %v792_v17 = vpop.f32.mrf.mxu0 }
 0x132   :  { %v1185_v18 = vmax.f32 %v1020_v14, 0.0  ;;  %v793_v52 = vadd.f32 %v2057_v53, %v792_v17  ;;  %v1478_v37 = vpop.f32.mrf.mxu1 }
 0x133   :  { %v794_v20 = vpop.f32.mrf.mxu0 }
 0x134   :  { %1235 = vst.msk [vmem:[%s2429_s3 + $0x58] sm:$0xff] %vm1223_vm2, %v1185_v18  ;;  %v1025_v21 = vadd.f32 %v2063_v0, %v793_v52  ;;  %v2173_v41 = vpop.f32.mrf.mxu1 }
 0x135   :  { %v795_v24 = vpop.f32.mrf.mxu0 }
 0x136   :  { %v1186_v2 = vmax.f32 %v1025_v21, 0.0  ;;  %v796_v57 = vadd.f32 %v2057_v53, %v795_v24  ;;  %v1481_v45 = vpop.f32.mrf.mxu1 }
 0x137   :  { %v797_v26 = vpop.f32.mrf.mxu0 }
 0x138   :  { %1236 = vst.msk [vmem:[%s2429_s3 + $0x60] sm:$0xff] %vm1223_vm2, %v1186_v2  ;;  %v1028_v27 = vadd.f32 %v2070_v8, %v796_v57  ;;  %v2181_v50 = vpop.f32.mrf.mxu1 }
 0x139   :  { %v800_v30 = vpop.f32.mrf.mxu0 }
 0x13a   :  { %v1187_v31 = vmax.f32 %v1028_v27, 0.0  ;;  %v801_v0 = vadd.f32 %v2057_v53, %v800_v30  ;;  %v1482_v55 = vpop.f32.mrf.mxu1 }
 0x13b   :  { %v802_v33 = vpop.f32.mrf.mxu0 }
 0x13c   :  { %1237 = vst.msk [vmem:[%s2429_s3 + $0x68] sm:$0xff] %vm1223_vm2, %v1187_v31  ;;  %v1033_v34 = vadd.f32 %v2077_v15, %v801_v0  ;;  %v2189_v59 = vpop.f32.mrf.mxu1 }
 0x13d   :  { %v803_v38 = vpop.f32.mrf.mxu0 }
 0x13e   :  { %v1188_v39 = vmax.f32 %v1033_v34, 0.0  ;;  %v804_v8 = vadd.f32 %v2057_v53, %v803_v38  ;;  %v1485_v62 = vpop.f32.mrf.mxu1 }
 0x13f   :  { %v805_v43 = vpop.f32.mrf.mxu0 }
 0x140   :  { %1238 = vst.msk [vmem:[%s2429_s3 + $0x70] sm:$0xff] %vm1223_vm2, %v1188_v39  ;;  %v1036_v36 = vadd.f32 %v2085_v22, %v804_v8  ;;  %v2197_v3 = vpop.f32.mrf.mxu1 }
 0x141   :  { %v808_v46 = vpop.f32.mrf.mxu0 }
 0x142   :  { %v1189_v48 = vmax.f32 %v1036_v36, 0.0  ;;  %v809_v15 = vadd.f32 %v2057_v53, %v808_v46  ;;  %v1486_v6 = vpop.f32.mrf.mxu1 }
 0x143   :  { %v810_v51 = vpop.f32.mrf.mxu0 }
 0x144   :  { %1239 = vst.msk [vmem:[%s2429_s3 + $0x78] sm:$0xff] %vm1223_vm2, %v1189_v48  ;;  %v1041_v40 = vadd.f32 %v2093_v28, %v809_v15  ;;  %v2205_v10 = vpop.f32.mrf.mxu1 }
 0x145   :  { %v811_v56 = vpop.f32.mrf.mxu0 }
 0x146   :  { %v1190_v58 = vmax.f32 %v1041_v40, 0.0  ;;  %v812_v22 = vadd.f32 %v2057_v53, %v811_v56  ;;  %v1489_v13 = vpop.f32.mrf.mxu1 }
 0x147   :  { %v813_v60 = vpop.f32.mrf.mxu0 }
 0x148   :  { %1240 = vst.msk [vmem:[%s2429_s3 + $0x80] sm:$0xff] %vm1223_vm2, %v1190_v58  ;;  %v1044_v42 = vadd.f32 %v2101_v35, %v812_v22  ;;  %v2213_v17 = vpop.f32.mrf.mxu1 }
 0x149   :  { %v816_v63 = vpop.f32.mrf.mxu0 }
 0x14a   :  { %v1191_v1 = vmax.f32 %v1044_v42, 0.0  ;;  %v817_v28 = vadd.f32 %v2057_v53, %v816_v63  ;;  %v1490_v20 = vpop.f32.mrf.mxu1 }
 0x14b   :  { %v818_v4 = vpop.f32.mrf.mxu0 }
 0x14c   :  { %1241 = vst.msk [vmem:[%s2429_s3 + $0x88] sm:$0xff] %vm1223_vm2, %v1191_v1  ;;  %v1049_v47 = vadd.f32 %v2109_v44, %v817_v28  ;;  %v2221_v24 = vpop.f32.mrf.mxu1 }
 0x14d   :  { %v819_v7 = vpop.f32.mrf.mxu0 }
 0x14e   :  { %v1192_v9 = vmax.f32 %v1049_v47, 0.0  ;;  %v820_v35 = vadd.f32 %v2057_v53, %v819_v7  ;;  %v1493_v26 = vpop.f32.mrf.mxu1 }
 0x14f   :  { %v821_v11 = vpop.f32.mrf.mxu0 }
 0x150   :  { %1242 = vst.msk [vmem:[%s2429_s3 + $0x90] sm:$0xff] %vm1223_vm2, %v1192_v9  ;;  %v1052_v49 = vadd.f32 %v2117_v54, %v820_v35  ;;  %v2229_v30 = vpop.f32.mrf.mxu1 }
 0x151   :  { %v824_v14 = vpop.f32.mrf.mxu0 }
 0x152   :  { %v1193_v16 = vmax.f32 %v1052_v49, 0.0  ;;  %v825_v44 = vadd.f32 %v2057_v53, %v824_v14  ;;  %v1494_v33 = vpop.f32.mrf.mxu1 }
 0x153   :  { %v826_v18 = vpop.f32.mrf.mxu0 }
 0x154   :  { %1243 = vst.msk [vmem:[%s2429_s3 + $0x98] sm:$0xff] %vm1223_vm2, %v1193_v16  ;;  %v1057_v52 = vadd.f32 %v2125_v61, %v825_v44  ;;  %v2237_v38 = vpop.f32.mrf.mxu1 }
 0x155   :  { %v827_v21 = vpop.f32.mrf.mxu0 }
 0x156   :  { %v1194_v23 = vmax.f32 %v1057_v52, 0.0  ;;  %v828_v54 = vadd.f32 %v2057_v53, %v827_v21  ;;  %v1497_v43 = vpop.f32.mrf.mxu1 }
 0x157   :  { %v829_v2 = vpop.f32.mrf.mxu0 }
 0x158   :  { %1244 = vst.msk [vmem:[%s2429_s3 + $0xa0] sm:$0xff] %vm1223_vm2, %v1194_v23  ;;  %v1060_v57 = vadd.f32 %v2133_v5, %v828_v54  ;;  %v2245_v46 = vpop.f32.mrf.mxu1 }
 0x159   :  { %v832_v27 = vpop.f32.mrf.mxu0 }
 0x15a   :  { %v1195_v29 = vmax.f32 %v1060_v57, 0.0  ;;  %v833_v61 = vadd.f32 %v2057_v53, %v832_v27  ;;  %v1498_v51 = vpop.f32.mrf.mxu1 }
 0x15b   :  { %v834_v31 = vpop.f32.mrf.mxu0 }
 0x15c   :  { %1245 = vst.msk [vmem:[%s2429_s3 + $0xa8] sm:$0xff] %vm1223_vm2, %v1195_v29  ;;  %v1065_v0 = vadd.f32 %v2141_v12, %v833_v61  ;;  %v2253_v56 = vpop.f32.mrf.mxu1 }
 0x15d   :  { %v835_v34 = vpop.f32.mrf.mxu0 }
 0x15e   :  { %v1196_v37 = vmax.f32 %v1065_v0, 0.0  ;;  %v836_v5 = vadd.f32 %v2057_v53, %v835_v34  ;;  %v1501_v60 = vpop.f32.mrf.mxu1 }
 0x15f   :  { %v837_v39 = vpop.f32.mrf.mxu0 }
 0x160   :  { %1246 = vst.msk [vmem:[%s2429_s3 + $0xb0] sm:$0xff] %vm1223_vm2, %v1196_v37  ;;  %v1068_v8 = vadd.f32 %v2149_v19, %v836_v5  ;;  %v2261_v63 = vpop.f32.mrf.mxu1 }
 0x161   :  { %v840_v36 = vpop.f32.mrf.mxu0 }
 0x162   :  { %v1197_v45 = vmax.f32 %v1068_v8, 0.0  ;;  %v841_v12 = vadd.f32 %v2057_v53, %v840_v36  ;;  %v1502_v4 = vpop.f32.mrf.mxu1 }
 0x163   :  { %v842_v48 = vpop.f32.mrf.mxu0 }
 0x164   :  { %1247 = vst.msk [vmem:[%s2429_s3 + $0xb8] sm:$0xff] %vm1223_vm2, %v1197_v45  ;;  %v1073_v15 = vadd.f32 %v2157_v25, %v841_v12  ;;  %v2269_v7 = vpop.f32.mrf.mxu1 }
 0x165   :  { %v843_v40 = vpop.f32.mrf.mxu0 }
 0x166   :  { %v1198_v55 = vmax.f32 %v1073_v15, 0.0  ;;  %v844_v19 = vadd.f32 %v2057_v53, %v843_v40  ;;  %v1505_v11 = vpop.f32.mrf.mxu1 }
 0x167   :  { %v845_v58 = vpop.f32.mrf.mxu0 }
 0x168   :  { %1248 = vst.msk [vmem:[%s2429_s3 + $0xc0] sm:$0xff] %vm1223_vm2, %v1198_v55  ;;  %v1076_v22 = vadd.f32 %v2165_v32, %v844_v19  ;;  %v2277_v14 = vpop.f32.mrf.mxu1 }
 0x169   :  { %v848_v42 = vpop.f32.mrf.mxu0 }
 0x16a   :  { %v1199_v62 = vmax.f32 %v1076_v22, 0.0  ;;  %v849_v25 = vadd.f32 %v2057_v53, %v848_v42  ;;  %v1506_v18 = vpop.f32.mrf.mxu1 }
 0x16b   :  { %v850_v1 = vpop.f32.mrf.mxu0 }
 0x16c   :  { %1249 = vst.msk [vmem:[%s2429_s3 + $0xc8] sm:$0xff] %vm1223_vm2, %v1199_v62  ;;  %v1081_v28 = vadd.f32 %v2173_v41, %v849_v25  ;;  %v2285_v21 = vpop.f32.mrf.mxu1 }
 0x16d   :  { %v851_v47 = vpop.f32.mrf.mxu0 }
 0x16e   :  { %v1200_v6 = vmax.f32 %v1081_v28, 0.0  ;;  %v852_v32 = vadd.f32 %v2057_v53, %v851_v47  ;;  %v1509_v2 = vpop.f32.mrf.mxu1 }
 0x16f   :  { %v853_v9 = vpop.f32.mrf.mxu0 }
 0x170   :  { %1250 = vst.msk [vmem:[%s2429_s3 + $0xd0] sm:$0xff] %vm1223_vm2, %v1200_v6  ;;  %v1084_v35 = vadd.f32 %v2181_v50, %v852_v32  ;;  %v2293_v27 = vpop.f32.mrf.mxu1 }
 0x171   :  { %v856_v49 = vpop.f32.mrf.mxu0 }
 0x172   :  { %v1201_v13 = vmax.f32 %v1084_v35, 0.0  ;;  %v857_v41 = vadd.f32 %v2057_v53, %v856_v49  ;;  %v1510_v31 = vpop.f32.mrf.mxu1 }
 0x173   :  { %v858_v16 = vpop.f32.mrf.mxu0 }
 0x174   :  { %1251 = vst.msk [vmem:[%s2429_s3 + $0xd8] sm:$0xff] %vm1223_vm2, %v1201_v13  ;;  %v1089_v44 = vadd.f32 %v2189_v59, %v857_v41  ;;  %v2301_v34 = vpop.f32.mrf.mxu1 }
 0x175   :  { %v859_v52 = vpop.f32.mrf.mxu0 }
 0x176   :  { %v1202_v20 = vmax.f32 %v1089_v44, 0.0  ;;  %v860_v50 = vadd.f32 %v2057_v53, %v859_v52  ;;  %v1513_v39 = vpop.f32.mrf.mxu1 }
 0x177   :  { %v861_v23 = vpop.f32.mrf.mxu0 }
 0x178   :  { %1252 = vst.msk [vmem:[%s2429_s3 + $0xe0] sm:$0xff] %vm1223_vm2, %v1202_v20  ;;  %v1092_v54 = vadd.f32 %v2197_v3, %v860_v50  ;;  %v2309_v36 = vpop.f32.mrf.mxu1 }
 0x179   :  { %v864_v57 = vpop.f32.mrf.mxu0 }
 0x17a   :  { %v1203_v26 = vmax.f32 %v1092_v54, 0.0  ;;  %v865_v59 = vadd.f32 %v2057_v53, %v864_v57  ;;  %v1514_v48 = vpop.f32.mrf.mxu1 }
 0x17b   :  { %v866_v29 = vpop.f32.mrf.mxu0 }
 0x17c   :  { %1253 = vst.msk [vmem:[%s2429_s3 + $0xe8] sm:$0xff] %vm1223_vm2, %v1203_v26  ;;  %v1097_v61 = vadd.f32 %v2205_v10, %v865_v59  ;;  %v2317_v40 = vpop.f32.mrf.mxu1 }
 0x17d   :  { %v867_v0 = vpop.f32.mrf.mxu0 }
 0x17e   :  { %v1204_v33 = vmax.f32 %v1097_v61, 0.0  ;;  %v868_v3 = vadd.f32 %v2057_v53, %v867_v0  ;;  %v1517_v58 = vpop.f32.mrf.mxu1 }
 0x17f   :  { %v869_v37 = vpop.f32.mrf.mxu0 }
 0x180   :  { %1254 = vst.msk [vmem:[%s2429_s3 + $0xf0] sm:$0xff] %vm1223_vm2, %v1204_v33  ;;  %v1100_v5 = vadd.f32 %v2213_v17, %v868_v3  ;;  %v2325_v42 = vpop.f32.mrf.mxu1 }
 0x181   :  { %v872_v8 = vpop.f32.mrf.mxu0 }
 0x182   :  { %v1205_v43 = vmax.f32 %v1100_v5, 0.0  ;;  %v873_v10 = vadd.f32 %v2057_v53, %v872_v8  ;;  %v1518_v1 = vpop.f32.mrf.mxu1 }
 0x183   :  { %v874_v45 = vpop.f32.mrf.mxu0 }
 0x184   :  { %1255 = vst.msk [vmem:[%s2429_s3 + $0xf8] sm:$0xff] %vm1223_vm2, %v1205_v43  ;;  %v1105_v12 = vadd.f32 %v2221_v24, %v873_v10  ;;  %v2333_v47 = vpop.f32.mrf.mxu1 }
 0x185   :  { %v875_v15 = vpop.f32.mrf.mxu0 }
 0x186   :  { %v1206_v51 = vmax.f32 %v1105_v12, 0.0  ;;  %v876_v17 = vadd.f32 %v2057_v53, %v875_v15  ;;  %v1521_v9 = vpop.f32.mrf.mxu1 }
 0x187   :  { %v877_v55 = vpop.f32.mrf.mxu0 }
 0x188   :  { %1256 = vst.msk [vmem:[%s2429_s3 + $0x100] sm:$0xff] %vm1223_vm2, %v1206_v51  ;;  %v1108_v19 = vadd.f32 %v2229_v30, %v876_v17  ;;  %v2341_v49 = vpop.f32.mrf.mxu1 }
 0x189   :  { %v880_v22 = vpop.f32.mrf.mxu0 }
 0x18a   :  { %v1207_v60 = vmax.f32 %v1108_v19, 0.0  ;;  %v881_v24 = vadd.f32 %v2057_v53, %v880_v22  ;;  %v1522_v16 = vpop.f32.mrf.mxu1 }
 0x18b   :  { %v882_v62 = vpop.f32.mrf.mxu0 }
 0x18c   :  { %1257 = vst.msk [vmem:[%s2429_s3 + $0x108] sm:$0xff] %vm1223_vm2, %v1207_v60  ;;  %v1113_v25 = vadd.f32 %v2237_v38, %v881_v24  ;;  %v2349_v52 = vpop.f32.mrf.mxu1 }
 0x18d   :  { %v883_v28 = vpop.f32.mrf.mxu0 }
 0x18e   :  { %v1208_v4 = vmax.f32 %v1113_v25, 0.0  ;;  %v884_v30 = vadd.f32 %v2057_v53, %v883_v28  ;;  %v1525_v23 = vpop.f32.mrf.mxu1 }
 0x18f   :  { %v885_v6 = vpop.f32.mrf.mxu0 }
 0x190   :  { %1258 = vst.msk [vmem:[%s2429_s3 + $0x110] sm:$0xff] %vm1223_vm2, %v1208_v4  ;;  %v1116_v32 = vadd.f32 %v2245_v46, %v884_v30  ;;  %v1171_v57 = vpop.f32.mrf.mxu1 }
 0x191   :  { %v888_v35 = vpop.f32.mrf.mxu0 }
 0x192   :  { %v1209_v11 = vmax.f32 %v1116_v32, 0.0  ;;  %v889_v38 = vadd.f32 %v2057_v53, %v888_v35  ;;  %v1526_v29 = vpop.f32.mrf.mxu1 }
 0x193   :  { %v890_v13 = vpop.f32.mrf.mxu0 }
 0x194   :  { %1259 = vst.msk [vmem:[%s2429_s3 + $0x118] sm:$0xff] %vm1223_vm2, %v1209_v11  ;;  %v1121_v41 = vadd.f32 %v2253_v56, %v889_v38 }
 0x195   :  { %v891_v44 = vpop.f32.mrf.mxu0 }
 0x196   :  { %v1210_v18 = vmax.f32 %v1121_v41, 0.0  ;;  %v892_v46 = vadd.f32 %v2057_v53, %v891_v44 }
 0x197   :  { %v893_v20 = vpop.f32.mrf.mxu0 }
 0x198   :  { %1260 = vst.msk [vmem:[%s2429_s3 + $0x120] sm:$0xff] %vm1223_vm2, %v1210_v18  ;;  %v1124_v50 = vadd.f32 %v2261_v63, %v892_v46 }
 0x199   :  { %v896_v54 = vpop.f32.mrf.mxu0 }
 0x19a   :  { %v1211_v2 = vmax.f32 %v1124_v50, 0.0  ;;  %v897_v56 = vadd.f32 %v2057_v53, %v896_v54 }
 0x19b   :  { %v898_v26 = vpop.f32.mrf.mxu0 }
 0x19c   :  { %1261 = vst.msk [vmem:[%s2429_s3 + $0x128] sm:$0xff] %vm1223_vm2, %v1211_v2  ;;  %v1129_v59 = vadd.f32 %v2269_v7, %v897_v56 }
 0x19d   :  { %v899_v61 = vpop.f32.mrf.mxu0 }
 0x19e   :  { %v1212_v31 = vmax.f32 %v1129_v59, 0.0  ;;  %v900_v0 = vadd.f32 %v2057_v53, %v899_v61 }
 0x19f   :  { %v901_v63 = vpop.f32.mrf.mxu0 }
 0x1a0   :  { %1262 = vst.msk [vmem:[%s2429_s3 + $0x130] sm:$0xff] %vm1223_vm2, %v1212_v31  ;;  %v1132_v33 = vadd.f32 %v2277_v14, %v900_v0 }
 0x1a1   :  { %v904_v3 = vpop.f32.mrf.mxu0 }
 0x1a2   :  { %v1213_v37 = vmax.f32 %v1132_v33, 0.0  ;;  %v905_v5 = vadd.f32 %v2057_v53, %v904_v3 }
 0x1a3   :  { %v906_v39 = vpop.f32.mrf.mxu0 }
 0x1a4   :  { %1263 = vst.msk [vmem:[%s2429_s3 + $0x138] sm:$0xff] %vm1223_vm2, %v1213_v37  ;;  %v1137_v7 = vadd.f32 %v2285_v21, %v905_v5 }
 0x1a5   :  { %v907_v8 = vpop.f32.mrf.mxu0 }
 0x1a6   :  { %v1214_v43 = vmax.f32 %v1137_v7, 0.0  ;;  %v908_v10 = vadd.f32 %v2057_v53, %v907_v8 }
 0x1a7   :  { %v909_v45 = vpop.f32.mrf.mxu0 }
 0x1a8   :  { %1264 = vst.msk [vmem:[%s2429_s3 + $0x140] sm:$0xff] %vm1223_vm2, %v1214_v43  ;;  %v1140_v14 = vadd.f32 %v2293_v27, %v908_v10 }
 0x1a9   :  { %v912_v12 = vpop.f32.mrf.mxu0 }
 0x1aa   :  { %v1215_v48 = vmax.f32 %v1140_v14, 0.0  ;;  %v913_v15 = vadd.f32 %v2057_v53, %v912_v12 }
 0x1ab   :  { %v914_v51 = vpop.f32.mrf.mxu0 }
 0x1ac   :  { %1265 = vst.msk [vmem:[%s2429_s3 + $0x148] sm:$0xff] %vm1223_vm2, %v1215_v48  ;;  %v1145_v21 = vadd.f32 %v2301_v34, %v913_v15 }
 0x1ad   :  { %v915_v17 = vpop.f32.mrf.mxu0 }
 0x1ae   :  { %v1216_v55 = vmax.f32 %v1145_v21, 0.0  ;;  %v916_v19 = vadd.f32 %v2057_v53, %v915_v17 }
 0x1af   :  { %v917_v58 = vpop.f32.mrf.mxu0 }
 0x1b0   :  { %1266 = vst.msk [vmem:[%s2429_s3 + $0x150] sm:$0xff] %vm1223_vm2, %v1216_v55  ;;  %v1148_v27 = vadd.f32 %v2309_v36, %v916_v19 }
 0x1b1   :  { %v920_v22 = vpop.f32.mrf.mxu0 }
 0x1b2   :  { %v1217_v60 = vmax.f32 %v1148_v27, 0.0  ;;  %v921_v24 = vadd.f32 %v2057_v53, %v920_v22 }
 0x1b3   :  { %v922_v62 = vpop.f32.mrf.mxu0 }
 0x1b4   :  { %1267 = vst.msk [vmem:[%s2429_s3 + $0x158] sm:$0xff] %vm1223_vm2, %v1217_v60  ;;  %v1153_v34 = vadd.f32 %v2317_v40, %v921_v24 }
 0x1b5   :  { %v923_v25 = vpop.f32.mrf.mxu0 }
 0x1b6   :  { %v1218_v1 = vmax.f32 %v1153_v34, 0.0  ;;  %v924_v28 = vadd.f32 %v2057_v53, %v923_v25 }
 0x1b7   :  { %v925_v4 = vpop.f32.mrf.mxu0 }
 0x1b8   :  { %1268 = vst.msk [vmem:[%s2429_s3 + $0x160] sm:$0xff] %vm1223_vm2, %v1218_v1  ;;  %v1156_v36 = vadd.f32 %v2325_v42, %v924_v28 }
 0x1b9   :  { %v928_v30 = vpop.f32.mrf.mxu0 }
 0x1ba   :  { %v1219_v6 = vmax.f32 %v1156_v36, 0.0  ;;  %v929_v32 = vadd.f32 %v2057_v53, %v928_v30 }
 0x1bb   :  { %v930_v9 = vpop.f32.mrf.mxu0 }
 0x1bc   :  { %1269 = vst.msk [vmem:[%s2429_s3 + $0x168] sm:$0xff] %vm1223_vm2, %v1219_v6  ;;  %v1161_v40 = vadd.f32 %v2333_v47, %v929_v32 }
 0x1bd   :  { %v931_v35 = vpop.f32.mrf.mxu0 }
 0x1be   :  { %v1220_v11 = vmax.f32 %v1161_v40, 0.0  ;;  %v932_v38 = vadd.f32 %v2057_v53, %v931_v35 }
 0x1bf   :  { %v933_v13 = vpop.f32.mrf.mxu0 }
 0x1c0   :  { %1270 = vst.msk [vmem:[%s2429_s3 + $0x170] sm:$0xff] %vm1223_vm2, %v1220_v11  ;;  %v1164_v42 = vadd.f32 %v2341_v49, %v932_v38 }
 0x1c1   :  { %v936_v41 = vpop.f32.mrf.mxu0 }
 0x1c2   :  { %v1221_v16 = vmax.f32 %v1164_v42, 0.0  ;;  %v937_v44 = vadd.f32 %v2057_v53, %v936_v41 }
 0x1c3   :  { %v938_v18 = vpop.f32.mrf.mxu0 }
 0x1c4   :  { %1271 = vst.msk [vmem:[%s2429_s3 + $0x178] sm:$0xff] %vm1223_vm2, %v1221_v16  ;;  %v1169_v47 = vadd.f32 %v2349_v52, %v937_v44 }
 0x1c5   :  { %v939_v46 = vpop.f32.mrf.mxu0 }
 0x1c6   :  { %v1222_v20 = vmax.f32 %v1169_v47, 0.0 }
 0x1c7   :  { %v940_v50 = vpop.f32.mrf.mxu0 }
 0x1c8   :  { %1272 = vst.msk [vmem:[%s2429_s3 + $0x180] sm:$0xff] %vm1223_vm2, %v1222_v20 }

// kernel: autoencoder_forward.11
= control target key start
LH: loop header
LB: loop body
LE: loop exit
PB: predicated region body
PF: predicated region fallthrough
CT: control target
= control target key end

     0   :  { %s2497_s14 = smov 0   ;;  %s2998_s0 = inlined_call_operand.vmem [shape: bf16[1568,144], index: 0, kind: input, shape index: {}]   ;;  %s2999_s1 = inlined_call_operand.vmem [shape: bf16[144,1], index: 1, kind: input, shape index: {}]   ;;  %s3000_s2 = inlined_call_operand.<no memory space> [shape: f32[1,1], index: 2, kind: input, shape index: {}]   ;;  %s3001_s3 = inlined_call_operand.vmem [shape: f32[1568,1], index: 3, kind: output, shape index: {}]  }
   0x1   :  { %v8_v0 = vstv %s3000_s2 }
   0x2   :  { %9 = vst [vmem:[#allocation2] sm:$0x1] %v8_v0 }
   0x3 LB: > { %s1918_s15 = sadd.s32 4294967295, %s2471_s14   ;;  %p1922_p0 = scmp.ge.s32.totalorder %s2471_s14, 1  ;;  %s2471_s14 = sphi %s2497_s14, %s15_s14  }
   0x4   : > { %p141_p1 = scmp.lt.s32.totalorder %s2471_s14, 3 }
   0x6   : > { %p142_p2 = pnand %p1922_p0, %p141_p1 }
   0x7   : > { %s166_s2 = smul.u32 (!%p142_p2), 98, %s1918_s15 }
   0x8   : > { %145 = sbr.rel (%p142_p2) target bundleno = 462 (0x1ce), region = 32 }
   0x9   : > { %p167_p3 = scmp.lt.s32.totalorder (!%p142_p2), %s166_s2, 195 }
   0xd   : > { %v2113_v1 = vld [vmem:[%s2999_s1 + $0x38] sm:$0xff]   ;;  %v2473_v2 = vmov 0   ;;  %v2114_v3 = vld [vmem:[%s2999_s1 + $0x30] sm:$0xff]   ;;  %s3003_s2 = smov (!%p167_p3, %s166_s2), 195  ;;  %v2115_v4 = vld [vmem:[%s2999_s1 + $0x28] sm:$0xff]   ;;  %vm798_vm0 = vcmask 130048  }
   0xe   : > { %946 = vmatprep.subr.bf16.mxu0 %v2473_v2  ;;  %2086 = vmatprep.subr.bf16.mxu1 %v2473_v2  ;;  %s2085_s22 = sshll.u32 %s3003_s2, 3  ;;  %v2116_v5 = vld [vmem:[%s2999_s1 + $0x20] sm:$0xff]   ;;  %v2117_v8 = vld [vmem:[%s2999_s1 + $0x18] sm:$0xff]   ;;  %v2118_v9 = vld [vmem:[%s2999_s1 + $0x10] sm:$0xff]   ;;  %vm1763_vm1 = vcmask 7168  }
   0xf   : > { %947 = vmatpush1.bf16.msra.mxu0 %v2113_v1  ;;  %2095 = vmatpush1.bf16.msra.mxu1 %v2113_v1  ;;  %s2522_s25 = scalar_lea.vmem %s2998_s0, %s2085_s22  ;;  %v2119_v10 = vld [vmem:[%s2999_s1 + $0x8] sm:$0xff]   ;;  %v2120_v11 = vld [vmem:[%s2999_s1] sm:$0xff]   ;;  %s2707_s13 = scalar_lea.vmem %s3001_s3, %s2085_s22 }
  0x10   : > { %948 = vmatprep.subr.bf16.mxu0 %v2473_v2  ;;  %2087 = vmatprep.subr.bf16.mxu1 %v2473_v2  ;;  %v2124_v6 = vld [vmem:[%s2522_s25 + $0x4] ss:$8 sps:$4 sm:$0xff]   ;;  %v2127_v7 = vld [vmem:[%s2522_s25 + $0x194] ss:$8 sps:$4 sm:$0xff]   ;;  %v2122_v13 = vld [vmem:[%s2522_s25] ss:$8 sps:$4 sm:$0xff]  }
  0x11   : > { %2034 = vmatprep.mubr.msk.bf16.mxu0 %vm798_vm0, %v2124_v6  ;;  %2059 = vmatprep.mubr.msk.bf16.mxu1 %vm798_vm0, %v2127_v7  ;;  %v2121_v12 = vld [vmem:[%s2999_s1 + $0x40] sm:$0xff]   ;;  %v2125_v14 = vld [vmem:[%s2522_s25 + $0x190] ss:$8 sps:$4 sm:$0xff]   ;;  %v2128_v15 = vld [vmem:[%s2522_s25 + $0x14] ss:$8 sps:$4 sm:$0xff]  }
  0x12   : > { %v2131_v16 = vld [vmem:[%s2522_s25 + $0x1a4] ss:$8 sps:$4 sm:$0xff]   ;;  %v2130_v17 = vld [vmem:[%s2522_s25 + $0x10] ss:$8 sps:$4 sm:$0xff]   ;;  %v2133_v18 = vld [vmem:[%s2522_s25 + $0x1a0] ss:$8 sps:$4 sm:$0xff]  }
  0x13   : > { %949 = vmatpush1.bf16.msra.mxu0 %v2114_v3  ;;  %2096 = vmatpush1.bf16.msra.mxu1 %v2114_v3  ;;  %v2134_v19 = vld [vmem:[%s2522_s25 + $0x24] ss:$8 sps:$4 sm:$0xff]   ;;  %v2137_v20 = vld [vmem:[%s2522_s25 + $0x1b4] ss:$8 sps:$4 sm:$0xff]   ;;  %v2136_v21 = vld [vmem:[%s2522_s25 + $0x20] ss:$8 sps:$4 sm:$0xff]  }
  0x14   : > { %950 = vmatprep.subr.bf16.mxu0 %v2473_v2  ;;  %2088 = vmatprep.subr.bf16.mxu1 %v2473_v2  ;;  %v2139_v22 = vld [vmem:[%s2522_s25 + $0x1b0] ss:$8 sps:$4 sm:$0xff]   ;;  %v2140_v23 = vld [vmem:[%s2522_s25 + $0x34] ss:$8 sps:$4 sm:$0xff]   ;;  %v2143_v24 = vld [vmem:[%s2522_s25 + $0x1c4] ss:$8 sps:$4 sm:$0xff]  }
  0x15   : > { %v2142_v25 = vld [vmem:[%s2522_s25 + $0x30] ss:$8 sps:$4 sm:$0xff]   ;;  %v2145_v26 = vld [vmem:[%s2522_s25 + $0x1c0] ss:$8 sps:$4 sm:$0xff]   ;;  %v2146_v27 = vld [vmem:[%s2522_s25 + $0x44] ss:$8 sps:$4 sm:$0xff]  }
  0x16   : > { %v2149_v28 = vld [vmem:[%s2522_s25 + $0x1d4] ss:$8 sps:$4 sm:$0xff]   ;;  %v2148_v29 = vld [vmem:[%s2522_s25 + $0x40] ss:$8 sps:$4 sm:$0xff]   ;;  %v2151_v30 = vld [vmem:[%s2522_s25 + $0x1d0] ss:$8 sps:$4 sm:$0xff]  }
  0x17   : > { %951 = vmatpush1.bf16.msra.mxu0 %v2115_v4  ;;  %2097 = vmatpush1.bf16.msra.mxu1 %v2115_v4  ;;  %v2152_v31 = vld [vmem:[%s2522_s25 + $0x54] ss:$8 sps:$4 sm:$0xff]   ;;  %v2155_v32 = vld [vmem:[%s2522_s25 + $0x1e4] ss:$8 sps:$4 sm:$0xff]   ;;  %v2154_v33 = vld [vmem:[%s2522_s25 + $0x50] ss:$8 sps:$4 sm:$0xff]  }
  0x18   : > { %952 = vmatprep.subr.bf16.mxu0 %v2473_v2  ;;  %2089 = vmatprep.subr.bf16.mxu1 %v2473_v2  ;;  %v2157_v34 = vld [vmem:[%s2522_s25 + $0x1e0] ss:$8 sps:$4 sm:$0xff]   ;;  %v2158_v35 = vld [vmem:[%s2522_s25 + $0x64] ss:$8 sps:$4 sm:$0xff]   ;;  %v2161_v36 = vld [vmem:[%s2522_s25 + $0x1f4] ss:$8 sps:$4 sm:$0xff]  }
  0x19   : > { %v2160_v37 = vld [vmem:[%s2522_s25 + $0x60] ss:$8 sps:$4 sm:$0xff]   ;;  %v2163_v38 = vld [vmem:[%s2522_s25 + $0x1f0] ss:$8 sps:$4 sm:$0xff]   ;;  %v2164_v39 = vld [vmem:[%s2522_s25 + $0x74] ss:$8 sps:$4 sm:$0xff]  }
  0x1a   : > { %v2167_v40 = vld [vmem:[%s2522_s25 + $0x204] ss:$8 sps:$4 sm:$0xff]   ;;  %v2166_v41 = vld [vmem:[%s2522_s25 + $0x70] ss:$8 sps:$4 sm:$0xff]   ;;  %v2169_v42 = vld [vmem:[%s2522_s25 + $0x200] ss:$8 sps:$4 sm:$0xff]  }
  0x1b   : > { %953 = vmatpush1.bf16.msra.mxu0 %v2116_v5  ;;  %2098 = vmatpush1.bf16.msra.mxu1 %v2116_v5  ;;  %v2170_v43 = vld [vmem:[%s2522_s25 + $0x84] ss:$8 sps:$4 sm:$0xff]   ;;  %v2173_v44 = vld [vmem:[%s2522_s25 + $0x214] ss:$8 sps:$4 sm:$0xff]   ;;  %v2172_v45 = vld [vmem:[%s2522_s25 + $0x80] ss:$8 sps:$4 sm:$0xff]  }
  0x1c   : > { %954 = vmatprep.subr.bf16.mxu0 %v2473_v2  ;;  %2090 = vmatprep.subr.bf16.mxu1 %v2473_v2  ;;  %v2175_v46 = vld [vmem:[%s2522_s25 + $0x210] ss:$8 sps:$4 sm:$0xff]   ;;  %v2176_v47 = vld [vmem:[%s2522_s25 + $0x94] ss:$8 sps:$4 sm:$0xff]   ;;  %v2179_v48 = vld [vmem:[%s2522_s25 + $0x224] ss:$8 sps:$4 sm:$0xff]  }
  0x1d   : > { %v2178_v49 = vld [vmem:[%s2522_s25 + $0x90] ss:$8 sps:$4 sm:$0xff]   ;;  %v2181_v50 = vld [vmem:[%s2522_s25 + $0x220] ss:$8 sps:$4 sm:$0xff]   ;;  %v2182_v51 = vld [vmem:[%s2522_s25 + $0xa4] ss:$8 sps:$4 sm:$0xff]  }
  0x1e   : > { %v2185_v52 = vld [vmem:[%s2522_s25 + $0x234] ss:$8 sps:$4 sm:$0xff]   ;;  %v2184_v53 = vld [vmem:[%s2522_s25 + $0xa0] ss:$8 sps:$4 sm:$0xff]   ;;  %v2187_v54 = vld [vmem:[%s2522_s25 + $0x230] ss:$8 sps:$4 sm:$0xff]  }
  0x1f   : > { %955 = vmatpush1.bf16.msra.mxu0 %v2117_v8  ;;  %2099 = vmatpush1.bf16.msra.mxu1 %v2117_v8  ;;  %v2188_v55 = vld [vmem:[%s2522_s25 + $0xb4] ss:$8 sps:$4 sm:$0xff]   ;;  %v2191_v56 = vld [vmem:[%s2522_s25 + $0x244] ss:$8 sps:$4 sm:$0xff]   ;;  %v2190_v57 = vld [vmem:[%s2522_s25 + $0xb0] ss:$8 sps:$4 sm:$0xff]  }
  0x20   : > { %956 = vmatprep.subr.bf16.mxu0 %v2473_v2  ;;  %2091 = vmatprep.subr.bf16.mxu1 %v2473_v2  ;;  %v2193_v58 = vld [vmem:[%s2522_s25 + $0x240] ss:$8 sps:$4 sm:$0xff]   ;;  %v2194_v59 = vld [vmem:[%s2522_s25 + $0xc4] ss:$8 sps:$4 sm:$0xff]   ;;  %v2197_v60 = vld [vmem:[%s2522_s25 + $0x254] ss:$8 sps:$4 sm:$0xff]  }
  0x21   : > { %v2196_v61 = vld [vmem:[%s2522_s25 + $0xc0] ss:$8 sps:$4 sm:$0xff]   ;;  %v2199_v62 = vld [vmem:[%s2522_s25 + $0x250] ss:$8 sps:$4 sm:$0xff]   ;;  %v2200_v63 = vld [vmem:[%s2522_s25 + $0xd4] ss:$8 sps:$4 sm:$0xff]  }
  0x22   : > { %v2203_v0 = vld [vmem:[%s2522_s25 + $0x264] ss:$8 sps:$4 sm:$0xff]   ;;  %v2202_v1 = vld [vmem:[%s2522_s25 + $0xd0] ss:$8 sps:$4 sm:$0xff]   ;;  %v2209_v4 = vld [vmem:[%s2522_s25 + $0x274] ss:$8 sps:$4 sm:$0xff]  }
  0x23   : > { %957 = vmatpush1.bf16.msra.mxu0 %v2118_v9  ;;  %2100 = vmatpush1.bf16.msra.mxu1 %v2118_v9  ;;  %v2206_v3 = vld [vmem:[%s2522_s25 + $0xe4] ss:$8 sps:$4 sm:$0xff]   ;;  %v2208_v5 = vld [vmem:[%s2522_s25 + $0xe0] ss:$8 sps:$4 sm:$0xff]   ;;  %v2211_v6 = vld [vmem:[%s2522_s25 + $0x270] ss:$8 sps:$4 sm:$0xff]  }
  0x24   : > { %958 = vmatprep.subr.bf16.mxu0 %v2473_v2  ;;  %2092 = vmatprep.subr.bf16.mxu1 %v2473_v2  ;;  %v2212_v7 = vld [vmem:[%s2522_s25 + $0xf4] ss:$8 sps:$4 sm:$0xff]   ;;  %v2215_v8 = vld [vmem:[%s2522_s25 + $0x284] ss:$8 sps:$4 sm:$0xff]   ;;  %v2214_v9 = vld [vmem:[%s2522_s25 + $0xf0] ss:$8 sps:$4 sm:$0xff]  }
  0x27   : > { %959 = vmatpush1.bf16.msra.mxu0 %v2119_v10  ;;  %2101 = vmatpush1.bf16.msra.mxu1 %v2119_v10  ;;  %v2217_v10 = vld [vmem:[%s2522_s25 + $0x280] ss:$8 sps:$4 sm:$0xff]  }
  0x28   : > { %960 = vmatprep.subr.bf16.mxu0 %v2473_v2  ;;  %2093 = vmatprep.subr.bf16.mxu1 %v2473_v2 }
  0x2b   : > { %961 = vmatpush1.bf16.msra.mxu0 %v2120_v11  ;;  %2102 = vmatpush1.bf16.msra.mxu1 %v2120_v11  ;;  %v2218_v11 = vld [vmem:[%s2522_s25 + $0x104] ss:$8 sps:$4 sm:$0xff]  }
  0x2c   : > { %976 = vmatprep.subr.bf16.mxu0 %v2473_v2  ;;  %2094 = vmatprep.subr.bf16.mxu1 %v2473_v2  ;;  %v2205_v2 = vld [vmem:[%s2522_s25 + $0x260] ss:$8 sps:$4 sm:$0xff]  }
  0x2f   : > { %977 = vmatpush2.bf16.msra.mxu0 %v2121_v12  ;;  %2103 = vmatpush2.bf16.msra.mxu1 %v2121_v12  ;;  %v2221_v12 = vld [vmem:[%s2522_s25 + $0x294] ss:$8 sps:$4 sm:$0xff]  }
  0x32   : > { %979 = vmatmul.mubr.bf16.vlgmr.msra.gmra.mxu0 %v2122_v13  ;;  %1179 = vmatmul.mubr.bf16.vlgmr.msra.gmra.mxu1 %v2125_v14  ;;  %v2220_v13 = vld [vmem:[%s2522_s25 + $0x100] ss:$8 sps:$4 sm:$0xff]   ;;  %v2223_v14 = vld [vmem:[%s2522_s25 + $0x290] ss:$8 sps:$4 sm:$0xff]  }
  0x33   : > { %2035 = vmatprep.mubr.msk.bf16.mxu0 %vm798_vm0, %v2128_v15  ;;  %2060 = vmatprep.mubr.msk.bf16.mxu1 %vm798_vm0, %v2131_v16  ;;  %v2224_v15 = vld [vmem:[%s2522_s25 + $0x114] ss:$8 sps:$4 sm:$0xff]   ;;  %v2227_v16 = vld [vmem:[%s2522_s25 + $0x2a4] ss:$8 sps:$4 sm:$0xff]  }
  0x3a   : > { %987 = vmatmul.mubr.bf16.gmra.mxu0 %v2130_v17  ;;  %1187 = vmatmul.mubr.bf16.gmra.mxu1 %v2133_v18  ;;  %v2226_v17 = vld [vmem:[%s2522_s25 + $0x110] ss:$8 sps:$4 sm:$0xff]   ;;  %v2229_v18 = vld [vmem:[%s2522_s25 + $0x2a0] ss:$8 sps:$4 sm:$0xff]  }
  0x3b   : > { %2036 = vmatprep.mubr.msk.bf16.mxu0 %vm798_vm0, %v2134_v19  ;;  %2061 = vmatprep.mubr.msk.bf16.mxu1 %vm798_vm0, %v2137_v20  ;;  %v2230_v19 = vld [vmem:[%s2522_s25 + $0x124] ss:$8 sps:$4 sm:$0xff]   ;;  %v2233_v20 = vld [vmem:[%s2522_s25 + $0x2b4] ss:$8 sps:$4 sm:$0xff]  }
  0x42   : > { %995 = vmatmul.mubr.bf16.gmra.mxu0 %v2136_v21  ;;  %1195 = vmatmul.mubr.bf16.gmra.mxu1 %v2139_v22  ;;  %v2232_v21 = vld [vmem:[%s2522_s25 + $0x120] ss:$8 sps:$4 sm:$0xff]   ;;  %v2235_v22 = vld [vmem:[%s2522_s25 + $0x2b0] ss:$8 sps:$4 sm:$0xff]  }
  0x43   : > { %2037 = vmatprep.mubr.msk.bf16.mxu0 %vm798_vm0, %v2140_v23  ;;  %2062 = vmatprep.mubr.msk.bf16.mxu1 %vm798_vm0, %v2143_v24  ;;  %v2236_v23 = vld [vmem:[%s2522_s25 + $0x134] ss:$8 sps:$4 sm:$0xff]   ;;  %v2239_v24 = vld [vmem:[%s2522_s25 + $0x2c4] ss:$8 sps:$4 sm:$0xff]  }
  0x4a   : > { %1003 = vmatmul.mubr.bf16.gmra.mxu0 %v2142_v25  ;;  %1203 = vmatmul.mubr.bf16.gmra.mxu1 %v2145_v26  ;;  %v2238_v25 = vld [vmem:[%s2522_s25 + $0x130] ss:$8 sps:$4 sm:$0xff]   ;;  %v2241_v26 = vld [vmem:[%s2522_s25 + $0x2c0] ss:$8 sps:$4 sm:$0xff]  }
  0x4b   : > { %2038 = vmatprep.mubr.msk.bf16.mxu0 %vm798_vm0, %v2146_v27  ;;  %2063 = vmatprep.mubr.msk.bf16.mxu1 %vm798_vm0, %v2149_v28  ;;  %v2242_v27 = vld [vmem:[%s2522_s25 + $0x144] ss:$8 sps:$4 sm:$0xff]   ;;  %v2245_v28 = vld [vmem:[%s2522_s25 + $0x2d4] ss:$8 sps:$4 sm:$0xff]  }
  0x52   : > { %1011 = vmatmul.mubr.bf16.gmra.mxu0 %v2148_v29  ;;  %1211 = vmatmul.mubr.bf16.gmra.mxu1 %v2151_v30  ;;  %v2244_v29 = vld [vmem:[%s2522_s25 + $0x140] ss:$8 sps:$4 sm:$0xff]   ;;  %v2247_v30 = vld [vmem:[%s2522_s25 + $0x2d0] ss:$8 sps:$4 sm:$0xff]  }
  0x53   : > { %2039 = vmatprep.mubr.msk.bf16.mxu0 %vm798_vm0, %v2152_v31  ;;  %2064 = vmatprep.mubr.msk.bf16.mxu1 %vm798_vm0, %v2155_v32  ;;  %v2248_v31 = vld [vmem:[%s2522_s25 + $0x154] ss:$8 sps:$4 sm:$0xff]   ;;  %v2251_v32 = vld [vmem:[%s2522_s25 + $0x2e4] ss:$8 sps:$4 sm:$0xff]  }
  0x5a   : > { %1019 = vmatmul.mubr.bf16.gmra.mxu0 %v2154_v33  ;;  %1219 = vmatmul.mubr.bf16.gmra.mxu1 %v2157_v34  ;;  %v2250_v33 = vld [vmem:[%s2522_s25 + $0x150] ss:$8 sps:$4 sm:$0xff]   ;;  %v2253_v34 = vld [vmem:[%s2522_s25 + $0x2e0] ss:$8 sps:$4 sm:$0xff]  }
  0x5b   : > { %2040 = vmatprep.mubr.msk.bf16.mxu0 %vm798_vm0, %v2158_v35  ;;  %2065 = vmatprep.mubr.msk.bf16.mxu1 %vm798_vm0, %v2161_v36  ;;  %v2254_v35 = vld [vmem:[%s2522_s25 + $0x164] ss:$8 sps:$4 sm:$0xff]   ;;  %v2257_v36 = vld [vmem:[%s2522_s25 + $0x2f4] ss:$8 sps:$4 sm:$0xff]  }
  0x62   : > { %1027 = vmatmul.mubr.bf16.gmra.mxu0 %v2160_v37  ;;  %1227 = vmatmul.mubr.bf16.gmra.mxu1 %v2163_v38  ;;  %v2256_v37 = vld [vmem:[%s2522_s25 + $0x160] ss:$8 sps:$4 sm:$0xff]   ;;  %v2259_v38 = vld [vmem:[%s2522_s25 + $0x2f0] ss:$8 sps:$4 sm:$0xff]  }
  0x63   : > { %2041 = vmatprep.mubr.msk.bf16.mxu0 %vm798_vm0, %v2164_v39  ;;  %2066 = vmatprep.mubr.msk.bf16.mxu1 %vm798_vm0, %v2167_v40  ;;  %v2260_v39 = vld [vmem:[%s2522_s25 + $0x174] ss:$8 sps:$4 sm:$0xff]   ;;  %v2263_v40 = vld [vmem:[%s2522_s25 + $0x304] ss:$8 sps:$4 sm:$0xff]  }
  0x6a   : > { %1035 = vmatmul.mubr.bf16.gmra.mxu0 %v2166_v41  ;;  %1235 = vmatmul.mubr.bf16.gmra.mxu1 %v2169_v42  ;;  %v2262_v41 = vld [vmem:[%s2522_s25 + $0x170] ss:$8 sps:$4 sm:$0xff]   ;;  %v2265_v42 = vld [vmem:[%s2522_s25 + $0x300] ss:$8 sps:$4 sm:$0xff]  }
  0x6b   : > { %2042 = vmatprep.mubr.msk.bf16.mxu0 %vm798_vm0, %v2170_v43  ;;  %2067 = vmatprep.mubr.msk.bf16.mxu1 %vm798_vm0, %v2173_v44  ;;  %v2266_v43 = vld [vmem:[%s2522_s25 + $0x184] ss:$8 sps:$4 sm:$0xff]  }
  0x6c   : > { %v228_v44 = vld [vmem:[%s2522_s25 + $0x180] sm:$0xff] }
  0x72   : > { %1043 = vmatmul.mubr.bf16.gmra.mxu0 %v2172_v45  ;;  %1243 = vmatmul.mubr.bf16.gmra.mxu1 %v2175_v46  ;;  %v229_v45 = vld [vmem:[%s2522_s25 + $0x188] sm:$0xff] }
  0x73   : > { %2043 = vmatprep.mubr.msk.bf16.mxu0 %vm798_vm0, %v2176_v47  ;;  %2068 = vmatprep.mubr.msk.bf16.mxu1 %vm798_vm0, %v2179_v48  ;;  %v1975_v46 = vcombine.low %v228_v44, %v229_v45  ;;  %v2690_v47 = vld [vmem:[#allocation2] ss:$0 sm:$0xff] }
  0x7a   : > { %1051 = vmatmul.mubr.bf16.gmra.mxu0 %v2178_v49  ;;  %1251 = vmatmul.mubr.bf16.gmra.mxu1 %v2181_v50 }
  0x7b   : > { %2044 = vmatprep.mubr.msk.bf16.mxu0 %vm798_vm0, %v2182_v51  ;;  %2069 = vmatprep.mubr.msk.bf16.mxu1 %vm798_vm0, %v2185_v52 }
  0x82   : > { %1059 = vmatmul.mubr.bf16.gmra.mxu0 %v2184_v53  ;;  %1259 = vmatmul.mubr.bf16.gmra.mxu1 %v2187_v54 }
  0x83   : > { %2045 = vmatprep.mubr.msk.bf16.mxu0 %vm798_vm0, %v2188_v55  ;;  %2070 = vmatprep.mubr.msk.bf16.mxu1 %vm798_vm0, %v2191_v56 }
  0x8a   : > { %1067 = vmatmul.mubr.bf16.gmra.mxu0 %v2190_v57  ;;  %1267 = vmatmul.mubr.bf16.gmra.mxu1 %v2193_v58 }
  0x8b   : > { %2046 = vmatprep.mubr.msk.bf16.mxu0 %vm798_vm0, %v2194_v59  ;;  %2071 = vmatprep.mubr.msk.bf16.mxu1 %vm798_vm0, %v2197_v60 }
  0x92   : > { %1075 = vmatmul.mubr.bf16.gmra.mxu0 %v2196_v61  ;;  %1275 = vmatmul.mubr.bf16.gmra.mxu1 %v2199_v62 }
  0x93   : > { %2047 = vmatprep.mubr.msk.bf16.mxu0 %vm798_vm0, %v2200_v63  ;;  %2072 = vmatprep.mubr.msk.bf16.mxu1 %vm798_vm0, %v2203_v0 }
  0x9a   : > { %1083 = vmatmul.mubr.bf16.gmra.mxu0 %v2202_v1  ;;  %1283 = vmatmul.mubr.bf16.gmra.mxu1 %v2205_v2 }
  0x9b   : > { %2048 = vmatprep.mubr.msk.bf16.mxu0 %vm798_vm0, %v2206_v3  ;;  %2073 = vmatprep.mubr.msk.bf16.mxu1 %vm798_vm0, %v2209_v4 }
  0xa2   : > { %1091 = vmatmul.mubr.bf16.gmra.mxu0 %v2208_v5  ;;  %1291 = vmatmul.mubr.bf16.gmra.mxu1 %v2211_v6 }
  0xa3   : > { %2049 = vmatprep.mubr.msk.bf16.mxu0 %vm798_vm0, %v2212_v7  ;;  %2074 = vmatprep.mubr.msk.bf16.mxu1 %vm798_vm0, %v2215_v8 }
  0xaa   : > { %1099 = vmatmul.mubr.bf16.gmra.mxu0 %v2214_v9  ;;  %1299 = vmatmul.mubr.bf16.gmra.mxu1 %v2217_v10 }
  0xab   : > { %2050 = vmatprep.mubr.msk.bf16.mxu0 %vm798_vm0, %v2218_v11  ;;  %2075 = vmatprep.mubr.msk.bf16.mxu1 %vm798_vm0, %v2221_v12 }
  0xb2   : > { %1107 = vmatmul.mubr.bf16.gmra.mxu0 %v2220_v13  ;;  %1307 = vmatmul.mubr.bf16.gmra.mxu1 %v2223_v14 }
  0xb3   : > { %2051 = vmatprep.mubr.msk.bf16.mxu0 %vm798_vm0, %v2224_v15  ;;  %2076 = vmatprep.mubr.msk.bf16.mxu1 %vm798_vm0, %v2227_v16 }
  0xba   : > { %1115 = vmatmul.mubr.bf16.gmra.mxu0 %v2226_v17  ;;  %1315 = vmatmul.mubr.bf16.gmra.mxu1 %v2229_v18 }
  0xbb   : > { %2052 = vmatprep.mubr.msk.bf16.mxu0 %vm798_vm0, %v2230_v19  ;;  %2077 = vmatprep.mubr.msk.bf16.mxu1 %vm798_vm0, %v2233_v20 }
  0xc2   : > { %1123 = vmatmul.mubr.bf16.gmra.mxu0 %v2232_v21  ;;  %1323 = vmatmul.mubr.bf16.gmra.mxu1 %v2235_v22 }
  0xc3   : > { %2053 = vmatprep.mubr.msk.bf16.mxu0 %vm798_vm0, %v2236_v23  ;;  %2078 = vmatprep.mubr.msk.bf16.mxu1 %vm798_vm0, %v2239_v24 }
  0xca   : > { %1131 = vmatmul.mubr.bf16.gmra.mxu0 %v2238_v25  ;;  %1331 = vmatmul.mubr.bf16.gmra.mxu1 %v2241_v26 }
  0xcb   : > { %2054 = vmatprep.mubr.msk.bf16.mxu0 %vm798_vm0, %v2242_v27  ;;  %2079 = vmatprep.mubr.msk.bf16.mxu1 %vm798_vm0, %v2245_v28 }
  0xd2   : > { %1139 = vmatmul.mubr.bf16.gmra.mxu0 %v2244_v29  ;;  %1339 = vmatmul.mubr.bf16.gmra.mxu1 %v2247_v30 }
  0xd3   : > { %2055 = vmatprep.mubr.msk.bf16.mxu0 %vm798_vm0, %v2248_v31  ;;  %2080 = vmatprep.mubr.msk.bf16.mxu1 %vm798_vm0, %v2251_v32 }
  0xda   : > { %1147 = vmatmul.mubr.bf16.gmra.mxu0 %v2250_v33  ;;  %1347 = vmatmul.mubr.bf16.gmra.mxu1 %v2253_v34 }
  0xdb   : > { %2056 = vmatprep.mubr.msk.bf16.mxu0 %vm798_vm0, %v2254_v35  ;;  %2081 = vmatprep.mubr.msk.bf16.mxu1 %vm798_vm0, %v2257_v36 }
  0xe2   : > { %1155 = vmatmul.mubr.bf16.gmra.mxu0 %v2256_v37  ;;  %1355 = vmatmul.mubr.bf16.gmra.mxu1 %v2259_v38 }
  0xe3   : > { %2057 = vmatprep.mubr.msk.bf16.mxu0 %vm798_vm0, %v2260_v39  ;;  %2082 = vmatprep.mubr.msk.bf16.mxu1 %vm798_vm0, %v2263_v40 }
  0xea   : > { %1163 = vmatmul.mubr.bf16.gmra.mxu0 %v2262_v41  ;;  %1363 = vmatmul.mubr.bf16.gmra.mxu1 %v2265_v42 }
  0xeb   : > { %2058 = vmatprep.mubr.msk.bf16.mxu0 %vm798_vm0, %v2266_v43 }
  0xf2   : > { %v980_v48 = vpop.f32.mrf.mxu0  ;;  %1171 = vmatmul.mubr.bf16.gmra.mxu0 %v1975_v46  ;;  %v1180_v49 = vpop.f32.mrf.mxu1 }
  0xf3   : > { %v981_v50 = vadd.f32 %v2690_v47, %v980_v48  ;;  %v1181_v51 = vadd.f32 %v2690_v47, %v1180_v49 }
  0xf4   : > { %v982_v52 = vpop.f32.mrf.mxu0  ;;  %v1182_v53 = vpop.f32.mrf.mxu1 }
  0xf5   : > { %v1371_v54 = vmul.f32 0.5, %v981_v50  ;;  %v1421_v55 = vmul.f32 0.5, %v1181_v51 }
  0xf6   : > { %v983_v56 = vpop.f32.mrf.mxu0  ;;  %v1183_v57 = vpop.f32.mrf.mxu1 }
  0xf7   : > { %2268 = vtanh.f32 %v1371_v54  ;;  %v984_v58 = vadd.f32 %v2690_v47, %v983_v56  ;;  %v1184_v59 = vadd.f32 %v2690_v47, %v1183_v57 }
  0xf8   : > { %2270 = vtanh.f32 %v1421_v55  ;;  %v985_v60 = vpop.f32.mrf.mxu0  ;;  %v1185_v61 = vpop.f32.mrf.mxu1 }
  0xf9   : > { %v1372_v62 = vmul.f32 0.5, %v984_v58  ;;  %v1422_v63 = vmul.f32 0.5, %v1184_v59 }
  0xfa   : > { %v988_v0 = vpop.f32.mrf.mxu0  ;;  %v1188_v1 = vpop.f32.mrf.mxu1 }
  0xfb   : > { %2272 = vtanh.f32 %v1372_v62  ;;  %v989_v2 = vadd.f32 %v2690_v47, %v988_v0  ;;  %v1189_v3 = vadd.f32 %v2690_v47, %v1188_v1 }
  0xfc   : > { %2274 = vtanh.f32 %v1422_v63  ;;  %v990_v4 = vpop.f32.mrf.mxu0  ;;  %v1190_v5 = vpop.f32.mrf.mxu1 }
  0xfd   : > { %v1373_v6 = vmul.f32 0.5, %v989_v2  ;;  %v1423_v7 = vmul.f32 0.5, %v1189_v3 }
  0xfe   : > { %v991_v8 = vpop.f32.mrf.mxu0  ;;  %v1191_v9 = vpop.f32.mrf.mxu1 }
  0xff   : > { %2276 = vtanh.f32 %v1373_v6  ;;  %v992_v10 = vadd.f32 %v2690_v47, %v991_v8  ;;  %v1192_v11 = vadd.f32 %v2690_v47, %v1191_v9 }
 0x100   : > { %2278 = vtanh.f32 %v1423_v7  ;;  %v993_v12 = vpop.f32.mrf.mxu0  ;;  %v1193_v13 = vpop.f32.mrf.mxu1 }
 0x101   : > { %v1374_v14 = vmul.f32 0.5, %v992_v10  ;;  %v1424_v15 = vmul.f32 0.5, %v1192_v11 }
 0x102   : > { %v996_v16 = vpop.f32.mrf.mxu0  ;;  %v1196_v17 = vpop.f32.mrf.mxu1 }
 0x103   : > { %2280 = vtanh.f32 %v1374_v14  ;;  %v997_v18 = vadd.f32 %v2690_v47, %v996_v16  ;;  %v1197_v19 = vadd.f32 %v2690_v47, %v1196_v17 }
 0x104   : > { %v2269_v20 = vpop.eup %2268  ;;  %2282 = vtanh.f32 %v1424_v15  ;;  %v998_v21 = vpop.f32.mrf.mxu0 }
 0x105   : > { %v1198_v22 = vpop.f32.mrf.mxu1  ;;  %v2271_v23 = vpop.eup %2270  ;;  %v1567_v24 = vadd.f32 1.0, %v2269_v20  ;;  %v1375_v25 = vmul.f32 0.5, %v997_v18  ;;  %v1425_v26 = vmul.f32 0.5, %v1197_v19 }
 0x106   : > { %v1617_v27 = vadd.f32 1.0, %v2271_v23  ;;  %v999_v28 = vpop.f32.mrf.mxu0 }
 0x107   : > { %v1199_v29 = vpop.f32.mrf.mxu1  ;;  %v1665_v30 = vmul.f32 0.5, %v1567_v24  ;;  %2284 = vtanh.f32 %v1375_v25  ;;  %v1000_v31 = vadd.f32 %v2690_v47, %v999_v28 }
 0x108   : > { %v1200_v32 = vadd.f32 %v2690_v47, %v1199_v29  ;;  %v2273_v33 = vpop.eup %2272  ;;  %v1715_v34 = vmul.f32 0.5, %v1617_v27  ;;  %2286 = vtanh.f32 %v1425_v26  ;;  %v1001_v35 = vpop.f32.mrf.mxu0 }
 0x109   : > { %v1201_v36 = vpop.f32.mrf.mxu1  ;;  %v2275_v37 = vpop.eup %2274  ;;  %1764 = vst.msk [vmem:[%s2707_s13] sm:$0xff] %vm1763_vm1, %v1665_v30  ;;  %v1568_v38 = vadd.f32 1.0, %v2273_v33  ;;  %v1376_v39 = vmul.f32 0.5, %v1000_v31 }
 0x10a   : > { %v1426_v40 = vmul.f32 0.5, %v1200_v32  ;;  %1814 = vst.msk [vmem:[%s2707_s13 + $0x190] sm:$0xff] %vm1763_vm1, %v1715_v34  ;;  %v1618_v41 = vadd.f32 1.0, %v2275_v37  ;;  %v1004_v42 = vpop.f32.mrf.mxu0 }
 0x10b   : > { %v1204_v43 = vpop.f32.mrf.mxu1  ;;  %v1666_v44 = vmul.f32 0.5, %v1568_v38  ;;  %2288 = vtanh.f32 %v1376_v39  ;;  %v1005_v45 = vadd.f32 %v2690_v47, %v1004_v42 }
 0x10c   : > { %v1205_v46 = vadd.f32 %v2690_v47, %v1204_v43  ;;  %v2277_v48 = vpop.eup %2276  ;;  %v1716_v49 = vmul.f32 0.5, %v1618_v41  ;;  %2290 = vtanh.f32 %v1426_v40  ;;  %v1006_v50 = vpop.f32.mrf.mxu0 }
 0x10d   : > { %v1206_v51 = vpop.f32.mrf.mxu1  ;;  %v2279_v52 = vpop.eup %2278  ;;  %1765 = vst.msk [vmem:[%s2707_s13 + $0x8] sm:$0xff] %vm1763_vm1, %v1666_v44  ;;  %v1569_v53 = vadd.f32 1.0, %v2277_v48  ;;  %v1377_v54 = vmul.f32 0.5, %v1005_v45 }
 0x10e   : > { %v1427_v55 = vmul.f32 0.5, %v1205_v46  ;;  %1815 = vst.msk [vmem:[%s2707_s13 + $0x198] sm:$0xff] %vm1763_vm1, %v1716_v49  ;;  %v1619_v56 = vadd.f32 1.0, %v2279_v52  ;;  %v1007_v57 = vpop.f32.mrf.mxu0 }
 0x10f   : > { %v1207_v58 = vpop.f32.mrf.mxu1  ;;  %v1667_v59 = vmul.f32 0.5, %v1569_v53  ;;  %2292 = vtanh.f32 %v1377_v54  ;;  %v1008_v60 = vadd.f32 %v2690_v47, %v1007_v57 }
 0x110   : > { %v1208_v61 = vadd.f32 %v2690_v47, %v1207_v58  ;;  %v2281_v62 = vpop.eup %2280  ;;  %v1717_v63 = vmul.f32 0.5, %v1619_v56  ;;  %2294 = vtanh.f32 %v1427_v55  ;;  %v1009_v0 = vpop.f32.mrf.mxu0 }
 0x111   : > { %v1209_v1 = vpop.f32.mrf.mxu1  ;;  %v2283_v2 = vpop.eup %2282  ;;  %1766 = vst.msk [vmem:[%s2707_s13 + $0x10] sm:$0xff] %vm1763_vm1, %v1667_v59  ;;  %v1570_v3 = vadd.f32 1.0, %v2281_v62  ;;  %v1378_v4 = vmul.f32 0.5, %v1008_v60 }
 0x112   : > { %v1428_v5 = vmul.f32 0.5, %v1208_v61  ;;  %1816 = vst.msk [vmem:[%s2707_s13 + $0x1a0] sm:$0xff] %vm1763_vm1, %v1717_v63  ;;  %v1620_v6 = vadd.f32 1.0, %v2283_v2  ;;  %v1012_v7 = vpop.f32.mrf.mxu0 }
 0x113   : > { %v1212_v8 = vpop.f32.mrf.mxu1  ;;  %v1668_v9 = vmul.f32 0.5, %v1570_v3  ;;  %2296 = vtanh.f32 %v1378_v4  ;;  %v1013_v10 = vadd.f32 %v2690_v47, %v1012_v7 }
 0x114   : > { %v1213_v11 = vadd.f32 %v2690_v47, %v1212_v8  ;;  %v2285_v12 = vpop.eup %2284  ;;  %v1718_v13 = vmul.f32 0.5, %v1620_v6  ;;  %2298 = vtanh.f32 %v1428_v5  ;;  %v1014_v14 = vpop.f32.mrf.mxu0 }
 0x115   : > { %v1214_v15 = vpop.f32.mrf.mxu1  ;;  %v2287_v16 = vpop.eup %2286  ;;  %1767 = vst.msk [vmem:[%s2707_s13 + $0x18] sm:$0xff] %vm1763_vm1, %v1668_v9  ;;  %v1571_v17 = vadd.f32 1.0, %v2285_v12  ;;  %v1379_v18 = vmul.f32 0.5, %v1013_v10 }
 0x116   : > { %v1429_v19 = vmul.f32 0.5, %v1213_v11  ;;  %1817 = vst.msk [vmem:[%s2707_s13 + $0x1a8] sm:$0xff] %vm1763_vm1, %v1718_v13  ;;  %v1621_v20 = vadd.f32 1.0, %v2287_v16  ;;  %v1015_v21 = vpop.f32.mrf.mxu0 }
 0x117   : > { %v1215_v22 = vpop.f32.mrf.mxu1  ;;  %v1669_v23 = vmul.f32 0.5, %v1571_v17  ;;  %2300 = vtanh.f32 %v1379_v18  ;;  %v1016_v24 = vadd.f32 %v2690_v47, %v1015_v21 }
 0x118   : > { %v1216_v25 = vadd.f32 %v2690_v47, %v1215_v22  ;;  %v2289_v26 = vpop.eup %2288  ;;  %v1719_v27 = vmul.f32 0.5, %v1621_v20  ;;  %2302 = vtanh.f32 %v1429_v19  ;;  %v1017_v28 = vpop.f32.mrf.mxu0 }
 0x119   : > { %v1217_v29 = vpop.f32.mrf.mxu1  ;;  %v2291_v30 = vpop.eup %2290  ;;  %1768 = vst.msk [vmem:[%s2707_s13 + $0x20] sm:$0xff] %vm1763_vm1, %v1669_v23  ;;  %v1572_v31 = vadd.f32 1.0, %v2289_v26  ;;  %v1380_v32 = vmul.f32 0.5, %v1016_v24 }
 0x11a   : > { %v1430_v33 = vmul.f32 0.5, %v1216_v25  ;;  %1818 = vst.msk [vmem:[%s2707_s13 + $0x1b0] sm:$0xff] %vm1763_vm1, %v1719_v27  ;;  %v1622_v34 = vadd.f32 1.0, %v2291_v30  ;;  %v1020_v35 = vpop.f32.mrf.mxu0 }
 0x11b   : > { %v1220_v36 = vpop.f32.mrf.mxu1  ;;  %v1670_v37 = vmul.f32 0.5, %v1572_v31  ;;  %2304 = vtanh.f32 %v1380_v32  ;;  %v1021_v38 = vadd.f32 %v2690_v47, %v1020_v35 }
 0x11c   : > { %v1221_v39 = vadd.f32 %v2690_v47, %v1220_v36  ;;  %v2293_v40 = vpop.eup %2292  ;;  %v1720_v41 = vmul.f32 0.5, %v1622_v34  ;;  %2306 = vtanh.f32 %v1430_v33  ;;  %v1022_v42 = vpop.f32.mrf.mxu0 }
 0x11d   : > { %v1222_v43 = vpop.f32.mrf.mxu1  ;;  %v2295_v44 = vpop.eup %2294  ;;  %1769 = vst.msk [vmem:[%s2707_s13 + $0x28] sm:$0xff] %vm1763_vm1, %v1670_v37  ;;  %v1573_v45 = vadd.f32 1.0, %v2293_v40  ;;  %v1381_v46 = vmul.f32 0.5, %v1021_v38 }
 0x11e   : > { %v1431_v48 = vmul.f32 0.5, %v1221_v39  ;;  %1819 = vst.msk [vmem:[%s2707_s13 + $0x1b8] sm:$0xff] %vm1763_vm1, %v1720_v41  ;;  %v1623_v49 = vadd.f32 1.0, %v2295_v44  ;;  %v1023_v50 = vpop.f32.mrf.mxu0 }
 0x11f   : > { %v1223_v51 = vpop.f32.mrf.mxu1  ;;  %v1671_v52 = vmul.f32 0.5, %v1573_v45  ;;  %2308 = vtanh.f32 %v1381_v46  ;;  %v1024_v53 = vadd.f32 %v2690_v47, %v1023_v50 }
 0x120   : > { %v1224_v54 = vadd.f32 %v2690_v47, %v1223_v51  ;;  %v2297_v55 = vpop.eup %2296  ;;  %v1721_v56 = vmul.f32 0.5, %v1623_v49  ;;  %2310 = vtanh.f32 %v1431_v48  ;;  %v1025_v57 = vpop.f32.mrf.mxu0 }
 0x121   : > { %v1225_v58 = vpop.f32.mrf.mxu1  ;;  %v2299_v59 = vpop.eup %2298  ;;  %1770 = vst.msk [vmem:[%s2707_s13 + $0x30] sm:$0xff] %vm1763_vm1, %v1671_v52  ;;  %v1574_v60 = vadd.f32 1.0, %v2297_v55  ;;  %v1382_v61 = vmul.f32 0.5, %v1024_v53 }
 0x122   : > { %v1432_v62 = vmul.f32 0.5, %v1224_v54  ;;  %1820 = vst.msk [vmem:[%s2707_s13 + $0x1c0] sm:$0xff] %vm1763_vm1, %v1721_v56  ;;  %v1624_v63 = vadd.f32 1.0, %v2299_v59  ;;  %v1028_v0 = vpop.f32.mrf.mxu0 }
 0x123   : > { %v1228_v1 = vpop.f32.mrf.mxu1  ;;  %v1672_v2 = vmul.f32 0.5, %v1574_v60  ;;  %2312 = vtanh.f32 %v1382_v61  ;;  %v1029_v3 = vadd.f32 %v2690_v47, %v1028_v0 }
 0x124   : > { %v1229_v4 = vadd.f32 %v2690_v47, %v1228_v1  ;;  %v2301_v5 = vpop.eup %2300  ;;  %v1722_v6 = vmul.f32 0.5, %v1624_v63  ;;  %2314 = vtanh.f32 %v1432_v62  ;;  %v1030_v7 = vpop.f32.mrf.mxu0 }
 0x125   : > { %v1230_v8 = vpop.f32.mrf.mxu1  ;;  %v2303_v9 = vpop.eup %2302  ;;  %1771 = vst.msk [vmem:[%s2707_s13 + $0x38] sm:$0xff] %vm1763_vm1, %v1672_v2  ;;  %v1575_v10 = vadd.f32 1.0, %v2301_v5  ;;  %v1383_v11 = vmul.f32 0.5, %v1029_v3 }
 0x126   : > { %v1433_v12 = vmul.f32 0.5, %v1229_v4  ;;  %1821 = vst.msk [vmem:[%s2707_s13 + $0x1c8] sm:$0xff] %vm1763_vm1, %v1722_v6  ;;  %v1625_v13 = vadd.f32 1.0, %v2303_v9  ;;  %v1031_v14 = vpop.f32.mrf.mxu0 }
 0x127   : > { %v1231_v15 = vpop.f32.mrf.mxu1  ;;  %v1673_v16 = vmul.f32 0.5, %v1575_v10  ;;  %2316 = vtanh.f32 %v1383_v11  ;;  %v1032_v17 = vadd.f32 %v2690_v47, %v1031_v14 }
 0x128   : > { %v1232_v18 = vadd.f32 %v2690_v47, %v1231_v15  ;;  %v2305_v19 = vpop.eup %2304  ;;  %v1723_v20 = vmul.f32 0.5, %v1625_v13  ;;  %2318 = vtanh.f32 %v1433_v12  ;;  %v1033_v21 = vpop.f32.mrf.mxu0 }
 0x129   : > { %v1233_v22 = vpop.f32.mrf.mxu1  ;;  %v2307_v23 = vpop.eup %2306  ;;  %1772 = vst.msk [vmem:[%s2707_s13 + $0x40] sm:$0xff] %vm1763_vm1, %v1673_v16  ;;  %v1576_v24 = vadd.f32 1.0, %v2305_v19  ;;  %v1384_v25 = vmul.f32 0.5, %v1032_v17 }
 0x12a   : > { %v1434_v26 = vmul.f32 0.5, %v1232_v18  ;;  %1822 = vst.msk [vmem:[%s2707_s13 + $0x1d0] sm:$0xff] %vm1763_vm1, %v1723_v20  ;;  %v1626_v27 = vadd.f32 1.0, %v2307_v23  ;;  %v1036_v28 = vpop.f32.mrf.mxu0 }
 0x12b   : > { %v1236_v29 = vpop.f32.mrf.mxu1  ;;  %v1674_v30 = vmul.f32 0.5, %v1576_v24  ;;  %2320 = vtanh.f32 %v1384_v25  ;;  %v1037_v31 = vadd.f32 %v2690_v47, %v1036_v28 }
 0x12c   : > { %v1237_v32 = vadd.f32 %v2690_v47, %v1236_v29  ;;  %v2309_v33 = vpop.eup %2308  ;;  %v1724_v34 = vmul.f32 0.5, %v1626_v27  ;;  %2322 = vtanh.f32 %v1434_v26  ;;  %v1038_v35 = vpop.f32.mrf.mxu0 }
 0x12d   : > { %v1238_v36 = vpop.f32.mrf.mxu1  ;;  %v2311_v37 = vpop.eup %2310  ;;  %1773 = vst.msk [vmem:[%s2707_s13 + $0x48] sm:$0xff] %vm1763_vm1, %v1674_v30  ;;  %v1577_v38 = vadd.f32 1.0, %v2309_v33  ;;  %v1385_v39 = vmul.f32 0.5, %v1037_v31 }
 0x12e   : > { %v1435_v40 = vmul.f32 0.5, %v1237_v32  ;;  %1823 = vst.msk [vmem:[%s2707_s13 + $0x1d8] sm:$0xff] %vm1763_vm1, %v1724_v34  ;;  %v1627_v41 = vadd.f32 1.0, %v2311_v37  ;;  %v1039_v42 = vpop.f32.mrf.mxu0 }
 0x12f   : > { %v1239_v43 = vpop.f32.mrf.mxu1  ;;  %v1675_v44 = vmul.f32 0.5, %v1577_v38  ;;  %2324 = vtanh.f32 %v1385_v39  ;;  %v1040_v45 = vadd.f32 %v2690_v47, %v1039_v42 }
 0x130   : > { %v1240_v46 = vadd.f32 %v2690_v47, %v1239_v43  ;;  %v2313_v48 = vpop.eup %2312  ;;  %v1725_v49 = vmul.f32 0.5, %v1627_v41  ;;  %2326 = vtanh.f32 %v1435_v40  ;;  %v1041_v50 = vpop.f32.mrf.mxu0 }
 0x131   : > { %v1241_v51 = vpop.f32.mrf.mxu1  ;;  %v2315_v52 = vpop.eup %2314  ;;  %1774 = vst.msk [vmem:[%s2707_s13 + $0x50] sm:$0xff] %vm1763_vm1, %v1675_v44  ;;  %v1578_v53 = vadd.f32 1.0, %v2313_v48  ;;  %v1386_v54 = vmul.f32 0.5, %v1040_v45 }
 0x132   : > { %v1436_v55 = vmul.f32 0.5, %v1240_v46  ;;  %1824 = vst.msk [vmem:[%s2707_s13 + $0x1e0] sm:$0xff] %vm1763_vm1, %v1725_v49  ;;  %v1628_v56 = vadd.f32 1.0, %v2315_v52  ;;  %v1044_v57 = vpop.f32.mrf.mxu0 }
 0x133   : > { %v1244_v58 = vpop.f32.mrf.mxu1  ;;  %v1676_v59 = vmul.f32 0.5, %v1578_v53  ;;  %2328 = vtanh.f32 %v1386_v54  ;;  %v1045_v60 = vadd.f32 %v2690_v47, %v1044_v57 }
 0x134   : > { %v1245_v61 = vadd.f32 %v2690_v47, %v1244_v58  ;;  %v2317_v62 = vpop.eup %2316  ;;  %v1726_v63 = vmul.f32 0.5, %v1628_v56  ;;  %2330 = vtanh.f32 %v1436_v55  ;;  %v1046_v0 = vpop.f32.mrf.mxu0 }
 0x135   : > { %v1246_v1 = vpop.f32.mrf.mxu1  ;;  %v2319_v2 = vpop.eup %2318  ;;  %1775 = vst.msk [vmem:[%s2707_s13 + $0x58] sm:$0xff] %vm1763_vm1, %v1676_v59  ;;  %v1579_v3 = vadd.f32 1.0, %v2317_v62  ;;  %v1387_v4 = vmul.f32 0.5, %v1045_v60 }
 0x136   : > { %v1437_v5 = vmul.f32 0.5, %v1245_v61  ;;  %1825 = vst.msk [vmem:[%s2707_s13 + $0x1e8] sm:$0xff] %vm1763_vm1, %v1726_v63  ;;  %v1629_v6 = vadd.f32 1.0, %v2319_v2  ;;  %v1047_v7 = vpop.f32.mrf.mxu0 }
 0x137   : > { %v1247_v8 = vpop.f32.mrf.mxu1  ;;  %v1677_v9 = vmul.f32 0.5, %v1579_v3  ;;  %2332 = vtanh.f32 %v1387_v4  ;;  %v1048_v10 = vadd.f32 %v2690_v47, %v1047_v7 }
 0x138   : > { %v1248_v11 = vadd.f32 %v2690_v47, %v1247_v8  ;;  %v2321_v12 = vpop.eup %2320  ;;  %v1727_v13 = vmul.f32 0.5, %v1629_v6  ;;  %2334 = vtanh.f32 %v1437_v5  ;;  %v1049_v14 = vpop.f32.mrf.mxu0 }
 0x139   : > { %v1249_v15 = vpop.f32.mrf.mxu1  ;;  %v2323_v16 = vpop.eup %2322  ;;  %1776 = vst.msk [vmem:[%s2707_s13 + $0x60] sm:$0xff] %vm1763_vm1, %v1677_v9  ;;  %v1580_v17 = vadd.f32 1.0, %v2321_v12  ;;  %v1388_v18 = vmul.f32 0.5, %v1048_v10 }
 0x13a   : > { %v1438_v19 = vmul.f32 0.5, %v1248_v11  ;;  %1826 = vst.msk [vmem:[%s2707_s13 + $0x1f0] sm:$0xff] %vm1763_vm1, %v1727_v13  ;;  %v1630_v20 = vadd.f32 1.0, %v2323_v16  ;;  %v1052_v21 = vpop.f32.mrf.mxu0 }
 0x13b   : > { %v1252_v22 = vpop.f32.mrf.mxu1  ;;  %v1678_v23 = vmul.f32 0.5, %v1580_v17  ;;  %2336 = vtanh.f32 %v1388_v18  ;;  %v1053_v24 = vadd.f32 %v2690_v47, %v1052_v21 }
 0x13c   : > { %v1253_v25 = vadd.f32 %v2690_v47, %v1252_v22  ;;  %v2325_v26 = vpop.eup %2324  ;;  %v1728_v27 = vmul.f32 0.5, %v1630_v20  ;;  %2338 = vtanh.f32 %v1438_v19  ;;  %v1054_v28 = vpop.f32.mrf.mxu0 }
 0x13d   : > { %v1254_v29 = vpop.f32.mrf.mxu1  ;;  %v2327_v30 = vpop.eup %2326  ;;  %1777 = vst.msk [vmem:[%s2707_s13 + $0x68] sm:$0xff] %vm1763_vm1, %v1678_v23  ;;  %v1581_v31 = vadd.f32 1.0, %v2325_v26  ;;  %v1389_v32 = vmul.f32 0.5, %v1053_v24 }
 0x13e   : > { %v1439_v33 = vmul.f32 0.5, %v1253_v25  ;;  %1827 = vst.msk [vmem:[%s2707_s13 + $0x1f8] sm:$0xff] %vm1763_vm1, %v1728_v27  ;;  %v1631_v34 = vadd.f32 1.0, %v2327_v30  ;;  %v1055_v35 = vpop.f32.mrf.mxu0 }
 0x13f   : > { %v1255_v36 = vpop.f32.mrf.mxu1  ;;  %v1679_v37 = vmul.f32 0.5, %v1581_v31  ;;  %2340 = vtanh.f32 %v1389_v32  ;;  %v1056_v38 = vadd.f32 %v2690_v47, %v1055_v35 }
 0x140   : > { %v1256_v39 = vadd.f32 %v2690_v47, %v1255_v36  ;;  %v2329_v40 = vpop.eup %2328  ;;  %v1729_v41 = vmul.f32 0.5, %v1631_v34  ;;  %2342 = vtanh.f32 %v1439_v33  ;;  %v1057_v42 = vpop.f32.mrf.mxu0 }
 0x141   : > { %v1257_v43 = vpop.f32.mrf.mxu1  ;;  %v2331_v44 = vpop.eup %2330  ;;  %1778 = vst.msk [vmem:[%s2707_s13 + $0x70] sm:$0xff] %vm1763_vm1, %v1679_v37  ;;  %v1582_v45 = vadd.f32 1.0, %v2329_v40  ;;  %v1390_v46 = vmul.f32 0.5, %v1056_v38 }
 0x142   : > { %v1440_v48 = vmul.f32 0.5, %v1256_v39  ;;  %1828 = vst.msk [vmem:[%s2707_s13 + $0x200] sm:$0xff] %vm1763_vm1, %v1729_v41  ;;  %v1632_v49 = vadd.f32 1.0, %v2331_v44  ;;  %v1060_v50 = vpop.f32.mrf.mxu0 }
 0x143   : > { %v1260_v51 = vpop.f32.mrf.mxu1  ;;  %v1680_v52 = vmul.f32 0.5, %v1582_v45  ;;  %2344 = vtanh.f32 %v1390_v46  ;;  %v1061_v53 = vadd.f32 %v2690_v47, %v1060_v50 }
 0x144   : > { %v1261_v54 = vadd.f32 %v2690_v47, %v1260_v51  ;;  %v2333_v55 = vpop.eup %2332  ;;  %v1730_v56 = vmul.f32 0.5, %v1632_v49  ;;  %2346 = vtanh.f32 %v1440_v48  ;;  %v1062_v57 = vpop.f32.mrf.mxu0 }
 0x145   : > { %v1262_v58 = vpop.f32.mrf.mxu1  ;;  %v2335_v59 = vpop.eup %2334  ;;  %1779 = vst.msk [vmem:[%s2707_s13 + $0x78] sm:$0xff] %vm1763_vm1, %v1680_v52  ;;  %v1583_v60 = vadd.f32 1.0, %v2333_v55  ;;  %v1391_v61 = vmul.f32 0.5, %v1061_v53 }
 0x146   : > { %v1441_v62 = vmul.f32 0.5, %v1261_v54  ;;  %1829 = vst.msk [vmem:[%s2707_s13 + $0x208] sm:$0xff] %vm1763_vm1, %v1730_v56  ;;  %v1633_v63 = vadd.f32 1.0, %v2335_v59  ;;  %v1063_v0 = vpop.f32.mrf.mxu0 }
 0x147   : > { %v1263_v1 = vpop.f32.mrf.mxu1  ;;  %v1681_v2 = vmul.f32 0.5, %v1583_v60  ;;  %2348 = vtanh.f32 %v1391_v61  ;;  %v1064_v3 = vadd.f32 %v2690_v47, %v1063_v0 }
 0x148   : > { %v1264_v4 = vadd.f32 %v2690_v47, %v1263_v1  ;;  %v2337_v5 = vpop.eup %2336  ;;  %v1731_v6 = vmul.f32 0.5, %v1633_v63  ;;  %2350 = vtanh.f32 %v1441_v62  ;;  %v1065_v7 = vpop.f32.mrf.mxu0 }
 0x149   : > { %v1265_v8 = vpop.f32.mrf.mxu1  ;;  %v2339_v9 = vpop.eup %2338  ;;  %1780 = vst.msk [vmem:[%s2707_s13 + $0x80] sm:$0xff] %vm1763_vm1, %v1681_v2  ;;  %v1584_v10 = vadd.f32 1.0, %v2337_v5  ;;  %v1392_v11 = vmul.f32 0.5, %v1064_v3 }
 0x14a   : > { %v1442_v12 = vmul.f32 0.5, %v1264_v4  ;;  %1830 = vst.msk [vmem:[%s2707_s13 + $0x210] sm:$0xff] %vm1763_vm1, %v1731_v6  ;;  %v1634_v13 = vadd.f32 1.0, %v2339_v9  ;;  %v1068_v14 = vpop.f32.mrf.mxu0 }
 0x14b   : > { %v1268_v15 = vpop.f32.mrf.mxu1  ;;  %v1682_v16 = vmul.f32 0.5, %v1584_v10  ;;  %2352 = vtanh.f32 %v1392_v11  ;;  %v1069_v17 = vadd.f32 %v2690_v47, %v1068_v14 }
 0x14c   : > { %v1269_v18 = vadd.f32 %v2690_v47, %v1268_v15  ;;  %v2341_v19 = vpop.eup %2340  ;;  %v1732_v20 = vmul.f32 0.5, %v1634_v13  ;;  %2354 = vtanh.f32 %v1442_v12  ;;  %v1070_v21 = vpop.f32.mrf.mxu0 }
 0x14d   : > { %v1270_v22 = vpop.f32.mrf.mxu1  ;;  %v2343_v23 = vpop.eup %2342  ;;  %1781 = vst.msk [vmem:[%s2707_s13 + $0x88] sm:$0xff] %vm1763_vm1, %v1682_v16  ;;  %v1585_v24 = vadd.f32 1.0, %v2341_v19  ;;  %v1393_v25 = vmul.f32 0.5, %v1069_v17 }
 0x14e   : > { %v1443_v26 = vmul.f32 0.5, %v1269_v18  ;;  %1831 = vst.msk [vmem:[%s2707_s13 + $0x218] sm:$0xff] %vm1763_vm1, %v1732_v20  ;;  %v1635_v27 = vadd.f32 1.0, %v2343_v23  ;;  %v1071_v28 = vpop.f32.mrf.mxu0 }
 0x14f   : > { %v1271_v29 = vpop.f32.mrf.mxu1  ;;  %v1683_v30 = vmul.f32 0.5, %v1585_v24  ;;  %2356 = vtanh.f32 %v1393_v25  ;;  %v1072_v31 = vadd.f32 %v2690_v47, %v1071_v28 }
 0x150   : > { %v1272_v32 = vadd.f32 %v2690_v47, %v1271_v29  ;;  %v2345_v33 = vpop.eup %2344  ;;  %v1733_v34 = vmul.f32 0.5, %v1635_v27  ;;  %2358 = vtanh.f32 %v1443_v26  ;;  %v1073_v35 = vpop.f32.mrf.mxu0 }
 0x151   : > { %v1273_v36 = vpop.f32.mrf.mxu1  ;;  %v2347_v37 = vpop.eup %2346  ;;  %1782 = vst.msk [vmem:[%s2707_s13 + $0x90] sm:$0xff] %vm1763_vm1, %v1683_v30  ;;  %v1586_v38 = vadd.f32 1.0, %v2345_v33  ;;  %v1394_v39 = vmul.f32 0.5, %v1072_v31 }
 0x152   : > { %v1444_v40 = vmul.f32 0.5, %v1272_v32  ;;  %1832 = vst.msk [vmem:[%s2707_s13 + $0x220] sm:$0xff] %vm1763_vm1, %v1733_v34  ;;  %v1636_v41 = vadd.f32 1.0, %v2347_v37  ;;  %v1076_v42 = vpop.f32.mrf.mxu0 }
 0x153   : > { %v1276_v43 = vpop.f32.mrf.mxu1  ;;  %v1684_v44 = vmul.f32 0.5, %v1586_v38  ;;  %2360 = vtanh.f32 %v1394_v39  ;;  %v1077_v45 = vadd.f32 %v2690_v47, %v1076_v42 }
 0x154   : > { %v1277_v46 = vadd.f32 %v2690_v47, %v1276_v43  ;;  %v2349_v48 = vpop.eup %2348  ;;  %v1734_v49 = vmul.f32 0.5, %v1636_v41  ;;  %2362 = vtanh.f32 %v1444_v40  ;;  %v1078_v50 = vpop.f32.mrf.mxu0 }
 0x155   : > { %v1278_v51 = vpop.f32.mrf.mxu1  ;;  %v2351_v52 = vpop.eup %2350  ;;  %1783 = vst.msk [vmem:[%s2707_s13 + $0x98] sm:$0xff] %vm1763_vm1, %v1684_v44  ;;  %v1587_v53 = vadd.f32 1.0, %v2349_v48  ;;  %v1395_v54 = vmul.f32 0.5, %v1077_v45 }
 0x156   : > { %v1445_v55 = vmul.f32 0.5, %v1277_v46  ;;  %1833 = vst.msk [vmem:[%s2707_s13 + $0x228] sm:$0xff] %vm1763_vm1, %v1734_v49  ;;  %v1637_v56 = vadd.f32 1.0, %v2351_v52  ;;  %v1079_v57 = vpop.f32.mrf.mxu0 }
 0x157   : > { %v1279_v58 = vpop.f32.mrf.mxu1  ;;  %v1685_v59 = vmul.f32 0.5, %v1587_v53  ;;  %2364 = vtanh.f32 %v1395_v54  ;;  %v1080_v60 = vadd.f32 %v2690_v47, %v1079_v57 }
 0x158   : > { %v1280_v61 = vadd.f32 %v2690_v47, %v1279_v58  ;;  %v2353_v62 = vpop.eup %2352  ;;  %v1735_v63 = vmul.f32 0.5, %v1637_v56  ;;  %2366 = vtanh.f32 %v1445_v55  ;;  %v1081_v0 = vpop.f32.mrf.mxu0 }
 0x159   : > { %v1281_v1 = vpop.f32.mrf.mxu1  ;;  %v2355_v2 = vpop.eup %2354  ;;  %1784 = vst.msk [vmem:[%s2707_s13 + $0xa0] sm:$0xff] %vm1763_vm1, %v1685_v59  ;;  %v1588_v3 = vadd.f32 1.0, %v2353_v62  ;;  %v1396_v4 = vmul.f32 0.5, %v1080_v60 }
 0x15a   : > { %v1446_v5 = vmul.f32 0.5, %v1280_v61  ;;  %1834 = vst.msk [vmem:[%s2707_s13 + $0x230] sm:$0xff] %vm1763_vm1, %v1735_v63  ;;  %v1638_v6 = vadd.f32 1.0, %v2355_v2  ;;  %v1084_v7 = vpop.f32.mrf.mxu0 }
 0x15b   : > { %v1284_v8 = vpop.f32.mrf.mxu1  ;;  %v1686_v9 = vmul.f32 0.5, %v1588_v3  ;;  %2368 = vtanh.f32 %v1396_v4  ;;  %v1085_v10 = vadd.f32 %v2690_v47, %v1084_v7 }
 0x15c   : > { %v1285_v11 = vadd.f32 %v2690_v47, %v1284_v8  ;;  %v2357_v12 = vpop.eup %2356  ;;  %v1736_v13 = vmul.f32 0.5, %v1638_v6  ;;  %2370 = vtanh.f32 %v1446_v5  ;;  %v1086_v14 = vpop.f32.mrf.mxu0 }
 0x15d   : > { %v1286_v15 = vpop.f32.mrf.mxu1  ;;  %v2359_v16 = vpop.eup %2358  ;;  %1785 = vst.msk [vmem:[%s2707_s13 + $0xa8] sm:$0xff] %vm1763_vm1, %v1686_v9  ;;  %v1589_v17 = vadd.f32 1.0, %v2357_v12  ;;  %v1397_v18 = vmul.f32 0.5, %v1085_v10 }
 0x15e   : > { %v1447_v19 = vmul.f32 0.5, %v1285_v11  ;;  %1835 = vst.msk [vmem:[%s2707_s13 + $0x238] sm:$0xff] %vm1763_vm1, %v1736_v13  ;;  %v1639_v20 = vadd.f32 1.0, %v2359_v16  ;;  %v1087_v21 = vpop.f32.mrf.mxu0 }
 0x15f   : > { %v1287_v22 = vpop.f32.mrf.mxu1  ;;  %v1687_v23 = vmul.f32 0.5, %v1589_v17  ;;  %2372 = vtanh.f32 %v1397_v18  ;;  %v1088_v24 = vadd.f32 %v2690_v47, %v1087_v21 }
 0x160   : > { %v1288_v25 = vadd.f32 %v2690_v47, %v1287_v22  ;;  %v2361_v26 = vpop.eup %2360  ;;  %v1737_v27 = vmul.f32 0.5, %v1639_v20  ;;  %2374 = vtanh.f32 %v1447_v19  ;;  %v1089_v28 = vpop.f32.mrf.mxu0 }
 0x161   : > { %v1289_v29 = vpop.f32.mrf.mxu1  ;;  %v2363_v30 = vpop.eup %2362  ;;  %1786 = vst.msk [vmem:[%s2707_s13 + $0xb0] sm:$0xff] %vm1763_vm1, %v1687_v23  ;;  %v1590_v31 = vadd.f32 1.0, %v2361_v26  ;;  %v1398_v32 = vmul.f32 0.5, %v1088_v24 }
 0x162   : > { %v1448_v33 = vmul.f32 0.5, %v1288_v25  ;;  %1836 = vst.msk [vmem:[%s2707_s13 + $0x240] sm:$0xff] %vm1763_vm1, %v1737_v27  ;;  %v1640_v34 = vadd.f32 1.0, %v2363_v30  ;;  %v1092_v35 = vpop.f32.mrf.mxu0 }
 0x163   : > { %v1292_v36 = vpop.f32.mrf.mxu1  ;;  %v1688_v37 = vmul.f32 0.5, %v1590_v31  ;;  %2376 = vtanh.f32 %v1398_v32  ;;  %v1093_v38 = vadd.f32 %v2690_v47, %v1092_v35 }
 0x164   : > { %v1293_v39 = vadd.f32 %v2690_v47, %v1292_v36  ;;  %v2365_v40 = vpop.eup %2364  ;;  %v1738_v41 = vmul.f32 0.5, %v1640_v34  ;;  %2378 = vtanh.f32 %v1448_v33  ;;  %v1094_v42 = vpop.f32.mrf.mxu0 }
 0x165   : > { %v1294_v43 = vpop.f32.mrf.mxu1  ;;  %v2367_v44 = vpop.eup %2366  ;;  %1787 = vst.msk [vmem:[%s2707_s13 + $0xb8] sm:$0xff] %vm1763_vm1, %v1688_v37  ;;  %v1591_v45 = vadd.f32 1.0, %v2365_v40  ;;  %v1399_v46 = vmul.f32 0.5, %v1093_v38 }
 0x166   : > { %v1449_v48 = vmul.f32 0.5, %v1293_v39  ;;  %1837 = vst.msk [vmem:[%s2707_s13 + $0x248] sm:$0xff] %vm1763_vm1, %v1738_v41  ;;  %v1641_v49 = vadd.f32 1.0, %v2367_v44  ;;  %v1095_v50 = vpop.f32.mrf.mxu0 }
 0x167   : > { %v1295_v51 = vpop.f32.mrf.mxu1  ;;  %v1689_v52 = vmul.f32 0.5, %v1591_v45  ;;  %2380 = vtanh.f32 %v1399_v46  ;;  %v1096_v53 = vadd.f32 %v2690_v47, %v1095_v50 }
 0x168   : > { %v1296_v54 = vadd.f32 %v2690_v47, %v1295_v51  ;;  %v2369_v55 = vpop.eup %2368  ;;  %v1739_v56 = vmul.f32 0.5, %v1641_v49  ;;  %2382 = vtanh.f32 %v1449_v48  ;;  %v1097_v57 = vpop.f32.mrf.mxu0 }
 0x169   : > { %v1297_v58 = vpop.f32.mrf.mxu1  ;;  %v2371_v59 = vpop.eup %2370  ;;  %1788 = vst.msk [vmem:[%s2707_s13 + $0xc0] sm:$0xff] %vm1763_vm1, %v1689_v52  ;;  %v1592_v60 = vadd.f32 1.0, %v2369_v55  ;;  %v1400_v61 = vmul.f32 0.5, %v1096_v53 }
 0x16a   : > { %v1450_v62 = vmul.f32 0.5, %v1296_v54  ;;  %1838 = vst.msk [vmem:[%s2707_s13 + $0x250] sm:$0xff] %vm1763_vm1, %v1739_v56  ;;  %v1642_v63 = vadd.f32 1.0, %v2371_v59  ;;  %v1100_v0 = vpop.f32.mrf.mxu0 }
 0x16b   : > { %v1300_v1 = vpop.f32.mrf.mxu1  ;;  %v1690_v2 = vmul.f32 0.5, %v1592_v60  ;;  %2384 = vtanh.f32 %v1400_v61  ;;  %v1101_v3 = vadd.f32 %v2690_v47, %v1100_v0 }
 0x16c   : > { %v1301_v4 = vadd.f32 %v2690_v47, %v1300_v1  ;;  %v2373_v5 = vpop.eup %2372  ;;  %v1740_v6 = vmul.f32 0.5, %v1642_v63  ;;  %2386 = vtanh.f32 %v1450_v62  ;;  %v1102_v7 = vpop.f32.mrf.mxu0  ;;  %v2865_v47 = vld [vmem:[#allocation2] ss:$0 sm:$0xff] }
 0x16d   : > { %v1302_v8 = vpop.f32.mrf.mxu1  ;;  %v2375_v9 = vpop.eup %2374  ;;  %1789 = vst.msk [vmem:[%s2707_s13 + $0xc8] sm:$0xff] %vm1763_vm1, %v1690_v2  ;;  %v1593_v10 = vadd.f32 1.0, %v2373_v5  ;;  %v1401_v11 = vmul.f32 0.5, %v1101_v3 }
 0x16e   : > { %v1451_v12 = vmul.f32 0.5, %v1301_v4  ;;  %1839 = vst.msk [vmem:[%s2707_s13 + $0x258] sm:$0xff] %vm1763_vm1, %v1740_v6  ;;  %v1643_v13 = vadd.f32 1.0, %v2375_v9  ;;  %v1103_v14 = vpop.f32.mrf.mxu0 }
 0x16f   : > { %v1303_v15 = vpop.f32.mrf.mxu1  ;;  %v1691_v16 = vmul.f32 0.5, %v1593_v10  ;;  %2388 = vtanh.f32 %v1401_v11  ;;  %v1104_v17 = vadd.f32 %v2865_v47, %v1103_v14 }
 0x170   : > { %v1304_v18 = vadd.f32 %v2865_v47, %v1303_v15  ;;  %v2377_v19 = vpop.eup %2376  ;;  %v1741_v20 = vmul.f32 0.5, %v1643_v13  ;;  %2390 = vtanh.f32 %v1451_v12  ;;  %v1105_v21 = vpop.f32.mrf.mxu0 }
 0x171   : > { %v1305_v22 = vpop.f32.mrf.mxu1  ;;  %v2379_v23 = vpop.eup %2378  ;;  %1790 = vst.msk [vmem:[%s2707_s13 + $0xd0] sm:$0xff] %vm1763_vm1, %v1691_v16  ;;  %v1594_v24 = vadd.f32 1.0, %v2377_v19  ;;  %v1402_v25 = vmul.f32 0.5, %v1104_v17 }
 0x172   : > { %v1452_v26 = vmul.f32 0.5, %v1304_v18  ;;  %1840 = vst.msk [vmem:[%s2707_s13 + $0x260] sm:$0xff] %vm1763_vm1, %v1741_v20  ;;  %v1644_v27 = vadd.f32 1.0, %v2379_v23  ;;  %v1108_v28 = vpop.f32.mrf.mxu0 }
 0x173   : > { %v1308_v29 = vpop.f32.mrf.mxu1  ;;  %v1692_v30 = vmul.f32 0.5, %v1594_v24  ;;  %2392 = vtanh.f32 %v1402_v25  ;;  %v1109_v31 = vadd.f32 %v2865_v47, %v1108_v28 }
 0x174   : > { %v1309_v32 = vadd.f32 %v2865_v47, %v1308_v29  ;;  %v2381_v33 = vpop.eup %2380  ;;  %v1742_v34 = vmul.f32 0.5, %v1644_v27  ;;  %2394 = vtanh.f32 %v1452_v26  ;;  %v1110_v35 = vpop.f32.mrf.mxu0 }
 0x175   : > { %v1310_v36 = vpop.f32.mrf.mxu1  ;;  %v2383_v37 = vpop.eup %2382  ;;  %1791 = vst.msk [vmem:[%s2707_s13 + $0xd8] sm:$0xff] %vm1763_vm1, %v1692_v30  ;;  %v1595_v38 = vadd.f32 1.0, %v2381_v33  ;;  %v1403_v39 = vmul.f32 0.5, %v1109_v31 }
 0x176   : > { %v1453_v40 = vmul.f32 0.5, %v1309_v32  ;;  %1841 = vst.msk [vmem:[%s2707_s13 + $0x268] sm:$0xff] %vm1763_vm1, %v1742_v34  ;;  %v1645_v41 = vadd.f32 1.0, %v2383_v37  ;;  %v1111_v42 = vpop.f32.mrf.mxu0 }
 0x177   : > { %v1311_v43 = vpop.f32.mrf.mxu1  ;;  %v1693_v44 = vmul.f32 0.5, %v1595_v38  ;;  %2396 = vtanh.f32 %v1403_v39  ;;  %v1112_v45 = vadd.f32 %v2865_v47, %v1111_v42 }
 0x178   : > { %v1312_v46 = vadd.f32 %v2865_v47, %v1311_v43  ;;  %v2385_v48 = vpop.eup %2384  ;;  %v1743_v49 = vmul.f32 0.5, %v1645_v41  ;;  %2398 = vtanh.f32 %v1453_v40  ;;  %v1113_v50 = vpop.f32.mrf.mxu0 }
 0x179   : > { %v1313_v51 = vpop.f32.mrf.mxu1  ;;  %v2387_v52 = vpop.eup %2386  ;;  %1792 = vst.msk [vmem:[%s2707_s13 + $0xe0] sm:$0xff] %vm1763_vm1, %v1693_v44  ;;  %v1596_v53 = vadd.f32 1.0, %v2385_v48  ;;  %v1404_v54 = vmul.f32 0.5, %v1112_v45 }
 0x17a   : > { %v1454_v55 = vmul.f32 0.5, %v1312_v46  ;;  %1842 = vst.msk [vmem:[%s2707_s13 + $0x270] sm:$0xff] %vm1763_vm1, %v1743_v49  ;;  %v1646_v56 = vadd.f32 1.0, %v2387_v52  ;;  %v1116_v57 = vpop.f32.mrf.mxu0 }
 0x17b   : > { %v1316_v58 = vpop.f32.mrf.mxu1  ;;  %v1694_v59 = vmul.f32 0.5, %v1596_v53  ;;  %2400 = vtanh.f32 %v1404_v54  ;;  %v1117_v60 = vadd.f32 %v2865_v47, %v1116_v57 }
 0x17c   : > { %v1317_v61 = vadd.f32 %v2865_v47, %v1316_v58  ;;  %v2389_v62 = vpop.eup %2388  ;;  %v1744_v63 = vmul.f32 0.5, %v1646_v56  ;;  %2402 = vtanh.f32 %v1454_v55  ;;  %v1118_v0 = vpop.f32.mrf.mxu0 }
 0x17d   : > { %v1318_v1 = vpop.f32.mrf.mxu1  ;;  %v2391_v2 = vpop.eup %2390  ;;  %1793 = vst.msk [vmem:[%s2707_s13 + $0xe8] sm:$0xff] %vm1763_vm1, %v1694_v59  ;;  %v1597_v3 = vadd.f32 1.0, %v2389_v62  ;;  %v1405_v4 = vmul.f32 0.5, %v1117_v60 }
 0x17e   : > { %v1455_v5 = vmul.f32 0.5, %v1317_v61  ;;  %1843 = vst.msk [vmem:[%s2707_s13 + $0x278] sm:$0xff] %vm1763_vm1, %v1744_v63  ;;  %v1647_v6 = vadd.f32 1.0, %v2391_v2  ;;  %v1119_v7 = vpop.f32.mrf.mxu0 }
 0x17f   : > { %v1319_v8 = vpop.f32.mrf.mxu1  ;;  %v1695_v9 = vmul.f32 0.5, %v1597_v3  ;;  %2404 = vtanh.f32 %v1405_v4  ;;  %v1120_v10 = vadd.f32 %v2865_v47, %v1119_v7 }
 0x180   : > { %v1320_v11 = vadd.f32 %v2865_v47, %v1319_v8  ;;  %v2393_v12 = vpop.eup %2392  ;;  %v1745_v13 = vmul.f32 0.5, %v1647_v6  ;;  %2406 = vtanh.f32 %v1455_v5  ;;  %v1121_v14 = vpop.f32.mrf.mxu0 }
 0x181   : > { %v1321_v15 = vpop.f32.mrf.mxu1  ;;  %v2395_v16 = vpop.eup %2394  ;;  %1794 = vst.msk [vmem:[%s2707_s13 + $0xf0] sm:$0xff] %vm1763_vm1, %v1695_v9  ;;  %v1598_v17 = vadd.f32 1.0, %v2393_v12  ;;  %v1406_v18 = vmul.f32 0.5, %v1120_v10 }
 0x182   : > { %v1456_v19 = vmul.f32 0.5, %v1320_v11  ;;  %1844 = vst.msk [vmem:[%s2707_s13 + $0x280] sm:$0xff] %vm1763_vm1, %v1745_v13  ;;  %v1648_v20 = vadd.f32 1.0, %v2395_v16  ;;  %v1124_v21 = vpop.f32.mrf.mxu0 }
 0x183   : > { %v1324_v22 = vpop.f32.mrf.mxu1  ;;  %v1696_v23 = vmul.f32 0.5, %v1598_v17  ;;  %2408 = vtanh.f32 %v1406_v18  ;;  %v1125_v24 = vadd.f32 %v2865_v47, %v1124_v21 }
 0x184   : > { %v1325_v25 = vadd.f32 %v2865_v47, %v1324_v22  ;;  %v2397_v26 = vpop.eup %2396  ;;  %v1746_v27 = vmul.f32 0.5, %v1648_v20  ;;  %2410 = vtanh.f32 %v1456_v19  ;;  %v1126_v28 = vpop.f32.mrf.mxu0 }
 0x185   : > { %v1326_v29 = vpop.f32.mrf.mxu1  ;;  %v2399_v30 = vpop.eup %2398  ;;  %1795 = vst.msk [vmem:[%s2707_s13 + $0xf8] sm:$0xff] %vm1763_vm1, %v1696_v23  ;;  %v1599_v31 = vadd.f32 1.0, %v2397_v26  ;;  %v1407_v32 = vmul.f32 0.5, %v1125_v24 }
 0x186   : > { %v1457_v33 = vmul.f32 0.5, %v1325_v25  ;;  %1845 = vst.msk [vmem:[%s2707_s13 + $0x288] sm:$0xff] %vm1763_vm1, %v1746_v27  ;;  %v1649_v34 = vadd.f32 1.0, %v2399_v30  ;;  %v1127_v35 = vpop.f32.mrf.mxu0 }
 0x187   : > { %v1327_v36 = vpop.f32.mrf.mxu1  ;;  %v1697_v37 = vmul.f32 0.5, %v1599_v31  ;;  %2412 = vtanh.f32 %v1407_v32  ;;  %v1128_v38 = vadd.f32 %v2865_v47, %v1127_v35 }
 0x188   : > { %v1328_v39 = vadd.f32 %v2865_v47, %v1327_v36  ;;  %v2401_v40 = vpop.eup %2400  ;;  %v1747_v41 = vmul.f32 0.5, %v1649_v34  ;;  %2414 = vtanh.f32 %v1457_v33  ;;  %v1129_v42 = vpop.f32.mrf.mxu0 }
 0x189   : > { %v1329_v43 = vpop.f32.mrf.mxu1  ;;  %v2403_v44 = vpop.eup %2402  ;;  %1796 = vst.msk [vmem:[%s2707_s13 + $0x100] sm:$0xff] %vm1763_vm1, %v1697_v37  ;;  %v1600_v45 = vadd.f32 1.0, %v2401_v40  ;;  %v1408_v46 = vmul.f32 0.5, %v1128_v38 }
 0x18a   : > { %v1458_v48 = vmul.f32 0.5, %v1328_v39  ;;  %1846 = vst.msk [vmem:[%s2707_s13 + $0x290] sm:$0xff] %vm1763_vm1, %v1747_v41  ;;  %v1650_v49 = vadd.f32 1.0, %v2403_v44  ;;  %v1132_v50 = vpop.f32.mrf.mxu0 }
 0x18b   : > { %v1332_v51 = vpop.f32.mrf.mxu1  ;;  %v1698_v52 = vmul.f32 0.5, %v1600_v45  ;;  %2416 = vtanh.f32 %v1408_v46  ;;  %v1133_v53 = vadd.f32 %v2865_v47, %v1132_v50 }
 0x18c   : > { %v1333_v54 = vadd.f32 %v2865_v47, %v1332_v51  ;;  %v2405_v55 = vpop.eup %2404  ;;  %v1748_v56 = vmul.f32 0.5, %v1650_v49  ;;  %2418 = vtanh.f32 %v1458_v48  ;;  %v1134_v57 = vpop.f32.mrf.mxu0 }
 0x18d   : > { %v1334_v58 = vpop.f32.mrf.mxu1  ;;  %v2407_v59 = vpop.eup %2406  ;;  %1797 = vst.msk [vmem:[%s2707_s13 + $0x108] sm:$0xff] %vm1763_vm1, %v1698_v52  ;;  %v1601_v60 = vadd.f32 1.0, %v2405_v55  ;;  %v1409_v61 = vmul.f32 0.5, %v1133_v53 }
 0x18e   : > { %v1459_v62 = vmul.f32 0.5, %v1333_v54  ;;  %1847 = vst.msk [vmem:[%s2707_s13 + $0x298] sm:$0xff] %vm1763_vm1, %v1748_v56  ;;  %v1651_v63 = vadd.f32 1.0, %v2407_v59  ;;  %v1135_v0 = vpop.f32.mrf.mxu0 }
 0x18f   : > { %v1335_v1 = vpop.f32.mrf.mxu1  ;;  %v1699_v2 = vmul.f32 0.5, %v1601_v60  ;;  %2420 = vtanh.f32 %v1409_v61  ;;  %v1136_v3 = vadd.f32 %v2865_v47, %v1135_v0 }
 0x190   : > { %v1336_v4 = vadd.f32 %v2865_v47, %v1335_v1  ;;  %v2409_v5 = vpop.eup %2408  ;;  %v1749_v6 = vmul.f32 0.5, %v1651_v63  ;;  %2422 = vtanh.f32 %v1459_v62  ;;  %v1137_v7 = vpop.f32.mrf.mxu0 }
 0x191   : > { %v1337_v8 = vpop.f32.mrf.mxu1  ;;  %v2411_v9 = vpop.eup %2410  ;;  %1798 = vst.msk [vmem:[%s2707_s13 + $0x110] sm:$0xff] %vm1763_vm1, %v1699_v2  ;;  %v1602_v10 = vadd.f32 1.0, %v2409_v5  ;;  %v1410_v11 = vmul.f32 0.5, %v1136_v3 }
 0x192   : > { %v1460_v12 = vmul.f32 0.5, %v1336_v4  ;;  %1848 = vst.msk [vmem:[%s2707_s13 + $0x2a0] sm:$0xff] %vm1763_vm1, %v1749_v6  ;;  %v1652_v13 = vadd.f32 1.0, %v2411_v9  ;;  %v1140_v14 = vpop.f32.mrf.mxu0 }
 0x193   : > { %v1340_v15 = vpop.f32.mrf.mxu1  ;;  %v1700_v16 = vmul.f32 0.5, %v1602_v10  ;;  %2424 = vtanh.f32 %v1410_v11  ;;  %v1141_v17 = vadd.f32 %v2865_v47, %v1140_v14 }
 0x194   : > { %v1341_v18 = vadd.f32 %v2865_v47, %v1340_v15  ;;  %v2413_v19 = vpop.eup %2412  ;;  %v1750_v20 = vmul.f32 0.5, %v1652_v13  ;;  %2426 = vtanh.f32 %v1460_v12  ;;  %v1142_v21 = vpop.f32.mrf.mxu0 }
 0x195   : > { %v1342_v22 = vpop.f32.mrf.mxu1  ;;  %v2415_v23 = vpop.eup %2414  ;;  %1799 = vst.msk [vmem:[%s2707_s13 + $0x118] sm:$0xff] %vm1763_vm1, %v1700_v16  ;;  %v1603_v24 = vadd.f32 1.0, %v2413_v19  ;;  %v1411_v25 = vmul.f32 0.5, %v1141_v17 }
 0x196   : > { %v1461_v26 = vmul.f32 0.5, %v1341_v18  ;;  %1849 = vst.msk [vmem:[%s2707_s13 + $0x2a8] sm:$0xff] %vm1763_vm1, %v1750_v20  ;;  %v1653_v27 = vadd.f32 1.0, %v2415_v23  ;;  %v1143_v28 = vpop.f32.mrf.mxu0 }
 0x197   : > { %v1343_v29 = vpop.f32.mrf.mxu1  ;;  %v1701_v30 = vmul.f32 0.5, %v1603_v24  ;;  %2428 = vtanh.f32 %v1411_v25  ;;  %v1144_v31 = vadd.f32 %v2865_v47, %v1143_v28 }
 0x198   : > { %v1344_v32 = vadd.f32 %v2865_v47, %v1343_v29  ;;  %v2417_v33 = vpop.eup %2416  ;;  %v1751_v34 = vmul.f32 0.5, %v1653_v27  ;;  %2430 = vtanh.f32 %v1461_v26  ;;  %v1145_v35 = vpop.f32.mrf.mxu0 }
 0x199   : > { %v1345_v36 = vpop.f32.mrf.mxu1  ;;  %v2419_v37 = vpop.eup %2418  ;;  %1800 = vst.msk [vmem:[%s2707_s13 + $0x120] sm:$0xff] %vm1763_vm1, %v1701_v30  ;;  %v1604_v38 = vadd.f32 1.0, %v2417_v33  ;;  %v1412_v39 = vmul.f32 0.5, %v1144_v31 }
 0x19a   : > { %v1462_v40 = vmul.f32 0.5, %v1344_v32  ;;  %1850 = vst.msk [vmem:[%s2707_s13 + $0x2b0] sm:$0xff] %vm1763_vm1, %v1751_v34  ;;  %v1654_v41 = vadd.f32 1.0, %v2419_v37  ;;  %v1148_v42 = vpop.f32.mrf.mxu0 }
 0x19b   : > { %v1348_v43 = vpop.f32.mrf.mxu1  ;;  %v1702_v44 = vmul.f32 0.5, %v1604_v38  ;;  %2432 = vtanh.f32 %v1412_v39  ;;  %v1149_v45 = vadd.f32 %v2865_v47, %v1148_v42 }
 0x19c   : > { %v1349_v46 = vadd.f32 %v2865_v47, %v1348_v43  ;;  %v2421_v48 = vpop.eup %2420  ;;  %v1752_v49 = vmul.f32 0.5, %v1654_v41  ;;  %2434 = vtanh.f32 %v1462_v40  ;;  %v1150_v50 = vpop.f32.mrf.mxu0 }
 0x19d   : > { %v1350_v51 = vpop.f32.mrf.mxu1  ;;  %v2423_v52 = vpop.eup %2422  ;;  %1801 = vst.msk [vmem:[%s2707_s13 + $0x128] sm:$0xff] %vm1763_vm1, %v1702_v44  ;;  %v1605_v53 = vadd.f32 1.0, %v2421_v48  ;;  %v1413_v54 = vmul.f32 0.5, %v1149_v45 }
 0x19e   : > { %v1463_v55 = vmul.f32 0.5, %v1349_v46  ;;  %1851 = vst.msk [vmem:[%s2707_s13 + $0x2b8] sm:$0xff] %vm1763_vm1, %v1752_v49  ;;  %v1655_v56 = vadd.f32 1.0, %v2423_v52  ;;  %v1151_v57 = vpop.f32.mrf.mxu0 }
 0x19f   : > { %v1351_v58 = vpop.f32.mrf.mxu1  ;;  %v1703_v59 = vmul.f32 0.5, %v1605_v53  ;;  %2436 = vtanh.f32 %v1413_v54  ;;  %v1152_v60 = vadd.f32 %v2865_v47, %v1151_v57 }
 0x1a0   : > { %v1352_v61 = vadd.f32 %v2865_v47, %v1351_v58  ;;  %v2425_v62 = vpop.eup %2424  ;;  %v1753_v63 = vmul.f32 0.5, %v1655_v56  ;;  %2438 = vtanh.f32 %v1463_v55  ;;  %v1153_v0 = vpop.f32.mrf.mxu0 }
 0x1a1   : > { %v1353_v1 = vpop.f32.mrf.mxu1  ;;  %v2427_v2 = vpop.eup %2426  ;;  %1802 = vst.msk [vmem:[%s2707_s13 + $0x130] sm:$0xff] %vm1763_vm1, %v1703_v59  ;;  %v1606_v3 = vadd.f32 1.0, %v2425_v62  ;;  %v1414_v4 = vmul.f32 0.5, %v1152_v60 }
 0x1a2   : > { %v1464_v5 = vmul.f32 0.5, %v1352_v61  ;;  %1852 = vst.msk [vmem:[%s2707_s13 + $0x2c0] sm:$0xff] %vm1763_vm1, %v1753_v63  ;;  %v1656_v6 = vadd.f32 1.0, %v2427_v2  ;;  %v1156_v7 = vpop.f32.mrf.mxu0 }
 0x1a3   : > { %v1356_v8 = vpop.f32.mrf.mxu1  ;;  %v1704_v9 = vmul.f32 0.5, %v1606_v3  ;;  %2440 = vtanh.f32 %v1414_v4  ;;  %v1157_v10 = vadd.f32 %v2865_v47, %v1156_v7 }
 0x1a4   : > { %v1357_v11 = vadd.f32 %v2865_v47, %v1356_v8  ;;  %v2429_v12 = vpop.eup %2428  ;;  %v1754_v13 = vmul.f32 0.5, %v1656_v6  ;;  %2442 = vtanh.f32 %v1464_v5  ;;  %v1158_v14 = vpop.f32.mrf.mxu0 }
 0x1a5   : > { %v1358_v15 = vpop.f32.mrf.mxu1  ;;  %v2431_v16 = vpop.eup %2430  ;;  %1803 = vst.msk [vmem:[%s2707_s13 + $0x138] sm:$0xff] %vm1763_vm1, %v1704_v9  ;;  %v1607_v17 = vadd.f32 1.0, %v2429_v12  ;;  %v1415_v18 = vmul.f32 0.5, %v1157_v10 }
 0x1a6   : > { %v1465_v19 = vmul.f32 0.5, %v1357_v11  ;;  %1853 = vst.msk [vmem:[%s2707_s13 + $0x2c8] sm:$0xff] %vm1763_vm1, %v1754_v13  ;;  %v1657_v20 = vadd.f32 1.0, %v2431_v16  ;;  %v1159_v21 = vpop.f32.mrf.mxu0 }
 0x1a7   : > { %v1359_v22 = vpop.f32.mrf.mxu1  ;;  %v1705_v23 = vmul.f32 0.5, %v1607_v17  ;;  %2444 = vtanh.f32 %v1415_v18  ;;  %v1160_v24 = vadd.f32 %v2865_v47, %v1159_v21 }
 0x1a8   : > { %v1360_v25 = vadd.f32 %v2865_v47, %v1359_v22  ;;  %v2433_v26 = vpop.eup %2432  ;;  %v1755_v27 = vmul.f32 0.5, %v1657_v20  ;;  %2446 = vtanh.f32 %v1465_v19  ;;  %v1161_v28 = vpop.f32.mrf.mxu0 }
 0x1a9   : > { %v1361_v29 = vpop.f32.mrf.mxu1  ;;  %v2435_v30 = vpop.eup %2434  ;;  %1804 = vst.msk [vmem:[%s2707_s13 + $0x140] sm:$0xff] %vm1763_vm1, %v1705_v23  ;;  %v1608_v31 = vadd.f32 1.0, %v2433_v26  ;;  %v1416_v32 = vmul.f32 0.5, %v1160_v24 }
 0x1aa   : > { %v1466_v33 = vmul.f32 0.5, %v1360_v25  ;;  %1854 = vst.msk [vmem:[%s2707_s13 + $0x2d0] sm:$0xff] %vm1763_vm1, %v1755_v27  ;;  %v1658_v34 = vadd.f32 1.0, %v2435_v30  ;;  %v1164_v35 = vpop.f32.mrf.mxu0 }
 0x1ab   : > { %v1364_v36 = vpop.f32.mrf.mxu1  ;;  %v1706_v37 = vmul.f32 0.5, %v1608_v31  ;;  %2448 = vtanh.f32 %v1416_v32  ;;  %v1165_v38 = vadd.f32 %v2865_v47, %v1164_v35 }
 0x1ac   : > { %v1365_v39 = vadd.f32 %v2865_v47, %v1364_v36  ;;  %v2437_v40 = vpop.eup %2436  ;;  %v1756_v41 = vmul.f32 0.5, %v1658_v34  ;;  %2450 = vtanh.f32 %v1466_v33  ;;  %v1166_v42 = vpop.f32.mrf.mxu0 }
 0x1ad   : > { %v1366_v43 = vpop.f32.mrf.mxu1  ;;  %v2439_v44 = vpop.eup %2438  ;;  %1805 = vst.msk [vmem:[%s2707_s13 + $0x148] sm:$0xff] %vm1763_vm1, %v1706_v37  ;;  %v1609_v45 = vadd.f32 1.0, %v2437_v40  ;;  %v1417_v46 = vmul.f32 0.5, %v1165_v38 }
 0x1ae   : > { %v1467_v48 = vmul.f32 0.5, %v1365_v39  ;;  %1855 = vst.msk [vmem:[%s2707_s13 + $0x2d8] sm:$0xff] %vm1763_vm1, %v1756_v41  ;;  %v1659_v49 = vadd.f32 1.0, %v2439_v44  ;;  %v1167_v50 = vpop.f32.mrf.mxu0 }
 0x1af   : > { %v1367_v51 = vpop.f32.mrf.mxu1  ;;  %v1707_v52 = vmul.f32 0.5, %v1609_v45  ;;  %2452 = vtanh.f32 %v1417_v46  ;;  %v1168_v53 = vadd.f32 %v2865_v47, %v1167_v50 }
 0x1b0   : > { %v1368_v54 = vadd.f32 %v2865_v47, %v1367_v51  ;;  %v2441_v55 = vpop.eup %2440  ;;  %v1757_v56 = vmul.f32 0.5, %v1659_v49  ;;  %2454 = vtanh.f32 %v1467_v48  ;;  %v1169_v57 = vpop.f32.mrf.mxu0 }
 0x1b1   : > { %v1369_v58 = vpop.f32.mrf.mxu1  ;;  %v2443_v59 = vpop.eup %2442  ;;  %1806 = vst.msk [vmem:[%s2707_s13 + $0x150] sm:$0xff] %vm1763_vm1, %v1707_v52  ;;  %v1610_v60 = vadd.f32 1.0, %v2441_v55  ;;  %v1418_v61 = vmul.f32 0.5, %v1168_v53 }
 0x1b2   : > { %v1468_v62 = vmul.f32 0.5, %v1368_v54  ;;  %1856 = vst.msk [vmem:[%s2707_s13 + $0x2e0] sm:$0xff] %vm1763_vm1, %v1757_v56  ;;  %v1660_v63 = vadd.f32 1.0, %v2443_v59  ;;  %v1172_v0 = vpop.f32.mrf.mxu0 }
 0x1b3   : > { %v1708_v1 = vmul.f32 0.5, %v1610_v60  ;;  %2456 = vtanh.f32 %v1418_v61  ;;  %v1173_v2 = vadd.f32 %v2865_v47, %v1172_v0 }
 0x1b4   : > { %v2445_v3 = vpop.eup %2444  ;;  %v1758_v4 = vmul.f32 0.5, %v1660_v63  ;;  %2458 = vtanh.f32 %v1468_v62  ;;  %v1174_v5 = vpop.f32.mrf.mxu0 }
 0x1b5   : > { %v2447_v6 = vpop.eup %2446  ;;  %1807 = vst.msk [vmem:[%s2707_s13 + $0x158] sm:$0xff] %vm1763_vm1, %v1708_v1  ;;  %v1611_v7 = vadd.f32 1.0, %v2445_v3  ;;  %v1419_v8 = vmul.f32 0.5, %v1173_v2 }
 0x1b6   : > { %1857 = vst.msk [vmem:[%s2707_s13 + $0x2e8] sm:$0xff] %vm1763_vm1, %v1758_v4  ;;  %v1661_v9 = vadd.f32 1.0, %v2447_v6  ;;  %v1175_v10 = vpop.f32.mrf.mxu0 }
 0x1b7   : > { %v1709_v11 = vmul.f32 0.5, %v1611_v7  ;;  %2460 = vtanh.f32 %v1419_v8  ;;  %v1176_v12 = vadd.f32 %v2865_v47, %v1175_v10 }
 0x1b8   : > { %v2449_v13 = vpop.eup %2448  ;;  %v1759_v14 = vmul.f32 0.5, %v1661_v9  ;;  %v1177_v15 = vpop.f32.mrf.mxu0 }
 0x1b9   : > { %v2451_v16 = vpop.eup %2450  ;;  %1808 = vst.msk [vmem:[%s2707_s13 + $0x160] sm:$0xff] %vm1763_vm1, %v1709_v11  ;;  %v1612_v17 = vadd.f32 1.0, %v2449_v13  ;;  %v1420_v18 = vmul.f32 0.5, %v1176_v12 }
 0x1ba   : > { %1858 = vst.msk [vmem:[%s2707_s13 + $0x2f0] sm:$0xff] %vm1763_vm1, %v1759_v14  ;;  %v1662_v19 = vadd.f32 1.0, %v2451_v16 }
 0x1bb   : > { %v1710_v20 = vmul.f32 0.5, %v1612_v17  ;;  %2462 = vtanh.f32 %v1420_v18 }
 0x1bc   : > { %v2453_v21 = vpop.eup %2452  ;;  %v1760_v22 = vmul.f32 0.5, %v1662_v19 }
 0x1bd   : > { %v2455_v23 = vpop.eup %2454  ;;  %1809 = vst.msk [vmem:[%s2707_s13 + $0x168] sm:$0xff] %vm1763_vm1, %v1710_v20  ;;  %v1613_v47 = vadd.f32 1.0, %v2453_v21 }
 0x1be   : > { %1859 = vst.msk [vmem:[%s2707_s13 + $0x2f8] sm:$0xff] %vm1763_vm1, %v1760_v22  ;;  %v1663_v24 = vadd.f32 1.0, %v2455_v23 }
 0x1bf   : > { %v1711_v25 = vmul.f32 0.5, %v1613_v47 }
 0x1c0   : > { %v2457_v26 = vpop.eup %2456  ;;  %v1761_v27 = vmul.f32 0.5, %v1663_v24 }
 0x1c1   : > { %v2459_v28 = vpop.eup %2458  ;;  %1810 = vst.msk [vmem:[%s2707_s13 + $0x170] sm:$0xff] %vm1763_vm1, %v1711_v25  ;;  %v1614_v29 = vadd.f32 1.0, %v2457_v26 }
 0x1c2   : > { %1860 = vst.msk [vmem:[%s2707_s13 + $0x300] sm:$0xff] %vm1763_vm1, %v1761_v27  ;;  %v1664_v30 = vadd.f32 1.0, %v2459_v28 }
 0x1c3   : > { %v1712_v31 = vmul.f32 0.5, %v1614_v29 }
 0x1c4   : > { %v2461_v32 = vpop.eup %2460  ;;  %v1762_v33 = vmul.f32 0.5, %v1664_v30 }
 0x1c5   : > { %1811 = vst.msk [vmem:[%s2707_s13 + $0x178] sm:$0xff] %vm1763_vm1, %v1712_v31  ;;  %v1615_v34 = vadd.f32 1.0, %v2461_v32 }
 0x1c6   : > { %1861 = vst.msk [vmem:[%s2707_s13 + $0x308] sm:$0xff] %vm1763_vm1, %v1762_v33 }
 0x1c7   : > { %v1713_v35 = vmul.f32 0.5, %v1615_v34 }
 0x1c8   : > { %v2463_v36 = vpop.eup %2462 }
 0x1c9   : > { %1812 = vst.msk [vmem:[%s2707_s13 + $0x180] sm:$0xff] %vm1763_vm1, %v1713_v35  ;;  %v1616_v37 = vadd.f32 1.0, %v2463_v36 }
 0x1cb   : > { %v1714_v38 = vmul.f32 0.5, %v1616_v37 }
 0x1cd   : > { %1813 = vst.msk [vmem:[%s2707_s13 + $0x188] sm:$0xff] %vm1763_vm1, %v1714_v38 }
 0x1ce PF: > { %s15_s14 = sadd.s32 1, %s2471_s14  }
 0x1cf   : > { %p12_p4 = scmp.ge.s32.totalorder %s15_s14, 4  }
 0x1d1   :  { %14 = sbr.rel (!%p12_p4) target bundleno = 3 (0x3), region = 62 }

</bundles_post_ra>
